<compile_context>
chip_gen: v5e
topology: v5e:2x2
jax: 0.10.0
libtpu: 0.0.40
codegen_flags: <defaults>
</compile_context>

<pallas_src>
import functools

import numpy as np
import jax
import jax.numpy as jnp
from jax.experimental import pallas as pl
from jax.experimental.pallas import tpu as pltpu

NEG_INF = -1e30

# dot_general dimension-number shorthands (same convention as the pallas flash kernels)
NN = (((1,), (0,)), ((), ()))   # natural        @ natural
NT = (((1,), (1,)), ((), ()))   # natural        @ transposed-rhs
TN = (((0,), (0,)), ((), ()))   # transposed-lhs @ natural


# ----------------------------------------------------------------------------
# Fused kernel: qkv linear -> split-head neighborhood attention -> proj linear
# ----------------------------------------------------------------------------
def _fused_na_kernel(x_ref, wqkv_ref, bqkv_ref, biasT_ref, wproj_ref, bproj_ref,
                     o_ref, *, num_heads, head_dim):
    N = x_ref.shape[1]
    C = num_heads * head_dim
    D = head_dim

    x = x_ref[0].astype(jnp.bfloat16)                                 # (N, C)

    # qkv^T = Wqkv^T @ x^T  -> (3C, N): lane-dense, heads stacked on the sublane axis.
    # (q rows of Wqkv^T / bqkv already carry the 1/sqrt(D) scale.)
    qkvT = jax.lax.dot_general(wqkv_ref[...], x, NT,
                               preferred_element_type=jnp.float32)
    qkvT = qkvT + bqkv_ref[...]                                       # (3C, N) f32

    ones_row = jnp.ones((1, N), dtype=jnp.float32)                    # hoisted
    head_outs = []
    for h in range(num_heads):                                        # static unroll
        qh = qkvT[h * D:(h + 1) * D].astype(jnp.bfloat16)             # (D, N)
        kh = qkvT[C + h * D:C + (h + 1) * D].astype(jnp.bfloat16)     # (D, N)
        vh = qkvT[2 * C + h * D:2 * C + (h + 1) * D]                  # (D, N) f32

        # Key-major scores: sT[j, i] = k_j . q_i   (transpose lands on the small kh)
        sT = jax.lax.dot_general(kh, qh, TN,
                                 preferred_element_type=jnp.float32)  # (Nk, Nq)
        sT = sT + biasT_ref[h]                                        # rpb / -1e30 mask
        m = jnp.max(sT, axis=0, keepdims=True)                        # (1, Nq)
        p = jnp.exp(sT - m).astype(jnp.bfloat16)                      # (Nk, Nq)

        # Fused row-sum: last row of v_aug is ones -> last output row = softmax denom.
        v_aug = jnp.concatenate([vh, ones_row], axis=0).astype(jnp.bfloat16)  # (D+1, N)
        o_aug = jax.lax.dot_general(v_aug, p, NN,
                                    preferred_element_type=jnp.float32)       # (D+1, Nq)
        l = o_aug[D:D + 1, :]                                         # (1, Nq)
        head_outs.append(o_aug[:D, :] * pl.reciprocal(l))             # exact recip

    xoT = jnp.concatenate(head_outs, axis=0).astype(jnp.bfloat16)     # (C, N)
    # proj: out(N, C) = xoT^T @ Wproj  (transpose again on the small (C, N) operand)
    out = jax.lax.dot_general(xoT, wproj_ref[...], TN,
                              preferred_element_type=jnp.float32)     # (N, C)
    o_ref[0] = (out + bproj_ref[...]).astype(o_ref.dtype)


def _fused_na_call(x_nc, prep):
    """x_nc: (B, N, C) f32 -> (B, N, C) f32."""
    B, N, C = x_nc.shape
    nh, hd = prep["num_heads"], prep["head_dim"]
    kernel = functools.partial(_fused_na_kernel, num_heads=nh, head_dim=hd)
    return pl.pallas_call(
        kernel,
        out_shape=jax.ShapeDtypeStruct((B, N, C), jnp.float32),
        grid=(B,),
        in_specs=[
            pl.BlockSpec((1, N, C), lambda b: (b, 0, 0)),       # x (per batch element)
            pl.BlockSpec((3 * C, C), lambda b: (0, 0)),         # Wqkv^T (bf16, resident)
            pl.BlockSpec((3 * C, 1), lambda b: (0, 0)),         # bqkv column (f32)
            pl.BlockSpec((nh, N, N), lambda b: (0, 0, 0)),      # key-major bias (f32, resident)
            pl.BlockSpec((C, C), lambda b: (0, 0)),             # Wproj (bf16)
            pl.BlockSpec((1, C), lambda b: (0, 0)),             # bproj row (f32)
        ],
        out_specs=pl.BlockSpec((1, N, C), lambda b: (b, 0, 0)),
        compiler_params=pltpu.CompilerParams(
            dimension_semantics=("parallel",)),                  # extent B=2: both v7x TCs busy
    )(x_nc, prep["wqkv_t"], prep["bqkv_col"], prep["biasT"],
      prep["wproj"], prep["bproj_row"])


# ----------------------------------------------------------------------------
# NATTEN neighborhood / rpb indexing (static config -> cached numpy indices)
# ----------------------------------------------------------------------------
def _window_start(i, L, K, d):
    n = K // 2
    if d <= 1:
        s = max(i - n, 0)
        if i + n >= L:
            s += L - i - n - 1
        return s
    ni = i - n * d
    if ni < 0:
        return i % d
    if i + n * d >= L:
        imodd = i % d
        a = (L // d) * d
        b = L - a
        if imodd < b:
            return L - b + imodd - 2 * n * d
        return a + imodd - K * d
    return ni


def _pb_start(i, L, K, d):
    n = K // 2
    if d <= 1:
        s = n
        if i < n:
            s += n - i
        if i + n >= L:
            s += L - i - 1 - n
        return s
    if i - n * d < 0:
        return K - 1 - (i // d)
    if i + n * d >= L:
        return (L - i - 1) // d
    return n


@functools.lru_cache(maxsize=None)
def _na_index_arrays(H, W, K, dilation):
    q_idx, k_idx, pi_idx, pj_idx = [], [], [], []
    for i in range(H):
        ni = _window_start(i, H, K, dilation)
        pi = _pb_start(i, H, K, dilation)
        for j in range(W):
            nj = _window_start(j, W, K, dilation)
            pj = _pb_start(j, W, K, dilation)
            for ki in range(K):
                for kj in range(K):
                    q_idx.append(i * W + j)
                    k_idx.append((ni + ki * dilation) * W + (nj + kj * dilation))
                    pi_idx.append(pi + ki)
                    pj_idx.append(pj + kj)
    return (np.asarray(q_idx), np.asarray(k_idx),
            np.asarray(pi_idx), np.asarray(pj_idx))


def build_na_bias(rpb, H, W, K, dilation, neg=NEG_INF):
    """rpb: (heads_half, 2K-1, 2K-1) -> dense query-major bias (heads_half, N, N)."""
    nh = rpb.shape[0]
    N = H * W
    q_idx, k_idx, pi_idx, pj_idx = _na_index_arrays(H, W, K, dilation)
    vals = rpb[:, pi_idx, pj_idx].astype(jnp.float32)
    bias = jnp.full((nh, N, N), neg, dtype=jnp.float32)
    return bias.at[:, q_idx, k_idx].set(vals)


def build_split_head_bias(params, H, W, kernel_size_0, kernel_size_1,
                          dilation_0=1, dilation_1=1):
    """Merged (num_heads, N, N) query-major bias (branch-0 heads first)."""
    b0 = build_na_bias(params["rpb0"], H, W, kernel_size_0, dilation_0)
    b1 = build_na_bias(params["rpb1"], H, W, kernel_size_1, dilation_1)
    return jnp.concatenate([b0, b1], axis=0)


# ----------------------------------------------------------------------------
# One-time parameter preparation + module forward
# ----------------------------------------------------------------------------
def prepare_module(params, H, W, *, num_heads, kernel_size_0, kernel_size_1,
                   dilation_0=1, dilation_1=1, qk_scale=None):
    C = params["w_qkv"].shape[0]
    head_dim = C // num_heads
    scale = qk_scale if qk_scale is not None else head_dim ** (-0.5)
    # Fold the q scaling into the q rows of Wqkv^T / bqkv.
    row_scale = jnp.concatenate([jnp.full((C,), scale, jnp.float32),
                                 jnp.ones((2 * C,), jnp.float32)])
    wqkv_t = (params["w_qkv"].astype(jnp.float32).T
              * row_scale[:, None]).astype(jnp.bfloat16)              # (3C, C)
    bqkv_col = (params["b_qkv"].astype(jnp.float32) * row_scale).reshape(3 * C, 1)
    bias = build_split_head_bias(params, H, W, kernel_size_0, kernel_size_1,
                                 dilation_0, dilation_1)              # (h, N, N) query-major
    return {
        "num_heads": num_heads,
        "head_dim": head_dim,
        "wqkv_t": wqkv_t,
        "bqkv_col": bqkv_col,
        "biasT": jnp.swapaxes(bias, 1, 2),                            # key-major for the kernel
        "wproj": params["w_proj"].astype(jnp.bfloat16),
        "bproj_row": params["b_proj"].astype(jnp.float32).reshape(1, C),
    }


def neighborhood_attention_split_head(x, params=None, *, num_heads=None,
                                      kernel_size_0=None, kernel_size_1=None,
                                      dilation_0=1, dilation_1=1, prep=None):
    """x: (B, H, W, C) f32 -> (B, H, W, C) f32. attn_drop/proj_drop have p=0 (identity)."""
    B, H, W, C = x.shape
    if prep is None:
        prep = prepare_module(params, H, W, num_heads=num_heads,
                              kernel_size_0=kernel_size_0, kernel_size_1=kernel_size_1,
                              dilation_0=dilation_0, dilation_1=dilation_1)
    out = _fused_na_call(x.reshape(B, H * W, C).astype(jnp.float32), prep)
    return out.reshape(B, H, W, C)


# ----------------------------------------------------------------------------
# Pure-JAX f32 reference (dense masked attention, same NA semantics)
# ----------------------------------------------------------------------------
def reference_forward(x, params, *, num_heads, kernel_size_0, kernel_size_1,
                      dilation_0=1, dilation_1=1):
    B, H, W, C = x.shape
    hd = C // num_heads
    scale = hd ** (-0.5)
    N = H * W
    qkv = x.reshape(B, N, C) @ params["w_qkv"] + params["b_qkv"]
    qkv = qkv.reshape(B, N, 3, num_heads, hd).transpose(2, 0, 3, 1, 4)
    q, k, v = qkv[0] * scale, qkv[1], qkv[2]
    bias = build_split_head_bias(params, H, W, kernel_size_0, kernel_size_1,
                                 dilation_0, dilation_1)
    s = jnp.einsum("bhnd,bhmd->bhnm", q, k) + bias[None]
    p = jax.nn.softmax(s, axis=-1)
    xo = jnp.einsum("bhnm,bhmd->bhnd", p, v)
    xo = xo.transpose(0, 2, 1, 3).reshape(B, N, C)
    out = xo @ params["w_proj"] + params["b_proj"]
    return out.reshape(B, H, W, C)


# ----------------------------------------------------------------------------
# Main
# ----------------------------------------------------------------------------
if __name__ == "__main__":
    B, H, W = 2, 16, 16
    dim = 32
    num_heads = 4                        # head_dim = 8
    kernel_size_0, kernel_size_1 = 3, 5
    dilation_0, dilation_1 = 1, 1

    key = jax.random.PRNGKey(0)
    k1, k2, k3, k4, k5 = jax.random.split(key, 5)

    params = {
        # nn.Linear(dim, 3*dim): stored transposed (Cin, Cout) for x @ W + b
        "w_qkv": (0.02 * jax.random.normal(k1, (dim, 3 * dim))).astype(jnp.float32),
        "b_qkv": jnp.zeros((3 * dim,), jnp.float32),
        # trunc_normal_(std=0.02, a=-2, b=2)
        "rpb0": (0.02 * jax.random.truncated_normal(
            k2, -2.0, 2.0,
            (num_heads // 2, 2 * kernel_size_0 - 1, 2 * kernel_size_0 - 1))).astype(jnp.float32),
        "rpb1": (0.02 * jax.random.truncated_normal(
            k3, -2.0, 2.0,
            (num_heads // 2, 2 * kernel_size_1 - 1, 2 * kernel_size_1 - 1))).astype(jnp.float32),
        "w_proj": (0.02 * jax.random.normal(k4, (dim, dim))).astype(jnp.float32),
        "b_proj": jnp.zeros((dim,), jnp.float32),
    }

    x = jax.random.normal(k5, (B, H, W, dim), dtype=jnp.float32)

    # One-time prep (module-setup style): fold q-scale into weights, build the merged
    # key-major neighborhood bias, cast matmul weights to bf16.
    prep = prepare_module(params, H, W, num_heads=num_heads,
                          kernel_size_0=kernel_size_0, kernel_size_1=kernel_size_1,
                          dilation_0=dilation_0, dilation_1=dilation_1)

    out = neighborhood_attention_split_head(x, prep=prep)
    out = jax.block_until_ready(out)
    assert out.shape == (B, H, W, dim)
    assert bool(jnp.all(jnp.isfinite(out)))

    # Numerical check vs. the pure-JAX f32 reference (kernel runs the MXU in bf16).
    ref = jax.block_until_ready(reference_forward(
        x, params, num_heads=num_heads,
        kernel_size_0=kernel_size_0, kernel_size_1=kernel_size_1,
        dilation_0=dilation_0, dilation_1=dilation_1))
    np.testing.assert_allclose(np.asarray(out), np.asarray(ref), rtol=5e-2, atol=5e-3)

    print("KERNEL_OK")
</pallas_src>

<mosaic_0001>
module attributes {stable_mosaic.version = 11 : i64} {
  func.func @_fused_na_kernel(%arg0: i32, %arg1: memref<1x256x32xf32, #tpu.memory_space<vmem>>, %arg2: memref<96x32xbf16, #tpu.memory_space<vmem>>, %arg3: memref<96x1xf32, #tpu.memory_space<vmem>>, %arg4: memref<4x256x256xf32, #tpu.memory_space<vmem>>, %arg5: memref<32x32xbf16, #tpu.memory_space<vmem>>, %arg6: memref<1x32xf32, #tpu.memory_space<vmem>>, %arg7: memref<1x256x32xf32, #tpu.memory_space<vmem>>) attributes {dimension_semantics = [#tpu.dimension_semantics<parallel>], iteration_bounds = array<i64: 2>, scalar_prefetch = 0 : i64, scratch_operands = 0 : i64, tpu.core_type = #tpu.core_type<tc>, window_params = [{transform_indices = @transform_0, window_bounds = array<i64: 1, 256, 32>}, {pipeline_mode = #tpu.pipeline_mode<synchronous>, transform_indices = @transform_1, window_bounds = array<i64: 96, 32>}, {pipeline_mode = #tpu.pipeline_mode<synchronous>, transform_indices = @transform_2, window_bounds = array<i64: 96, 1>}, {pipeline_mode = #tpu.pipeline_mode<synchronous>, transform_indices = @transform_3, window_bounds = array<i64: 4, 256, 256>}, {pipeline_mode = #tpu.pipeline_mode<synchronous>, transform_indices = @transform_4, window_bounds = array<i64: 32, 32>}, {pipeline_mode = #tpu.pipeline_mode<synchronous>, transform_indices = @transform_5, window_bounds = array<i64: 1, 32>}, {transform_indices = @transform_6, window_bounds = array<i64: 1, 256, 32>}]} {
    %c0 = arith.constant 0 : index
    %c0_0 = arith.constant 0 : index
    %c0_1 = arith.constant 0 : index
    %0 = vector.load %arg1[%c0, %c0_0, %c0_1] : memref<1x256x32xf32, #tpu.memory_space<vmem>>, vector<1x256x32xf32>
    %1 = vector.shape_cast %0 : vector<1x256x32xf32> to vector<256x32xf32>
    %2 = arith.truncf %1 : vector<256x32xf32> to vector<256x32xbf16>
    %c0_2 = arith.constant 0 : index
    %c0_3 = arith.constant 0 : index
    %3 = vector.load %arg2[%c0_2, %c0_3] : memref<96x32xbf16, #tpu.memory_space<vmem>>, vector<96x32xbf16>
    %cst = arith.constant dense<0.000000e+00> : vector<96x256xf32>
    %4 = tpu.matmul %3, %2, %cst {dimension_numbers = #tpu.dot_dimension_numbers<[1], [1], [0], [0], [0, 0, 1, 0], [], []>} : vector<96x32xbf16>, vector<256x32xbf16>, vector<96x256xf32> -> vector<96x256xf32>
    %c0_4 = arith.constant 0 : index
    %c0_5 = arith.constant 0 : index
    %5 = vector.load %arg3[%c0_4, %c0_5] : memref<96x1xf32, #tpu.memory_space<vmem>>, vector<96x1xf32>
    %6 = vector.broadcast %5 : vector<96x1xf32> to vector<96x256xf32>
    %7 = arith.addf %4, %6 : vector<96x256xf32>
    %cst_6 = arith.constant 1.000000e+00 : f32
    %8 = vector.broadcast %cst_6 : f32 to vector<1x256xf32>
    %9 = vector.extract_strided_slice %7 {offsets = [0, 0], sizes = [8, 256], strides = [1, 1]} : vector<96x256xf32> to vector<8x256xf32>
    %10 = arith.truncf %9 : vector<8x256xf32> to vector<8x256xbf16>
    %11 = vector.extract_strided_slice %7 {offsets = [32, 0], sizes = [8, 256], strides = [1, 1]} : vector<96x256xf32> to vector<8x256xf32>
    %12 = arith.truncf %11 : vector<8x256xf32> to vector<8x256xbf16>
    %13 = vector.extract_strided_slice %7 {offsets = [64, 0], sizes = [8, 256], strides = [1, 1]} : vector<96x256xf32> to vector<8x256xf32>
    %cst_7 = arith.constant dense<0.000000e+00> : vector<256x256xf32>
    %14 = tpu.matmul %12, %10, %cst_7 {dimension_numbers = #tpu.dot_dimension_numbers<[0], [0], [1], [1], [0, 1, 1, 1], [], []>} : vector<8x256xbf16>, vector<8x256xbf16>, vector<256x256xf32> -> vector<256x256xf32>
    %c0_8 = arith.constant 0 : index
    %c0_9 = arith.constant 0 : index
    %c0_10 = arith.constant 0 : index
    %15 = vector.load %arg4[%c0_8, %c0_9, %c0_10] : memref<4x256x256xf32, #tpu.memory_space<vmem>>, vector<1x256x256xf32>
    %16 = vector.shape_cast %15 : vector<1x256x256xf32> to vector<256x256xf32>
    %17 = arith.addf %14, %16 : vector<256x256xf32>
    %cst_11 = arith.constant dense<0xFF800000> : vector<256xf32>
    %18 = vector.multi_reduction <maximumf>, %17, %cst_11 [0] : vector<256x256xf32> to vector<256xf32>
    %19 = vector.shape_cast %18 : vector<256xf32> to vector<1x256xf32>
    %20 = vector.broadcast %19 : vector<1x256xf32> to vector<256x256xf32>
    %21 = arith.subf %17, %20 : vector<256x256xf32>
    %22 = math.exp %21 : vector<256x256xf32>
    %23 = arith.truncf %22 : vector<256x256xf32> to vector<256x256xbf16>
    %24 = tpu.concatenate %13, %8 in 0 : vector<8x256xf32>, vector<1x256xf32> -> vector<9x256xf32>
    %25 = arith.truncf %24 : vector<9x256xf32> to vector<9x256xbf16>
    %cst_12 = arith.constant dense<0.000000e+00> : vector<9x256xf32>
    %26 = tpu.matmul %25, %23, %cst_12 {dimension_numbers = #tpu.dot_dimension_numbers<[1], [0], [0], [1], [0, 0, 1, 1], [], []>} : vector<9x256xbf16>, vector<256x256xbf16>, vector<9x256xf32> -> vector<9x256xf32>
    %27 = vector.extract_strided_slice %26 {offsets = [8, 0], sizes = [1, 256], strides = [1, 1]} : vector<9x256xf32> to vector<1x256xf32>
    %28 = vector.extract_strided_slice %26 {offsets = [0, 0], sizes = [8, 256], strides = [1, 1]} : vector<9x256xf32> to vector<8x256xf32>
    %29 = tpu.reciprocal %27 : vector<1x256xf32> -> vector<1x256xf32>
    %30 = vector.broadcast %29 : vector<1x256xf32> to vector<8x256xf32>
    %31 = arith.mulf %28, %30 : vector<8x256xf32>
    %32 = vector.extract_strided_slice %7 {offsets = [8, 0], sizes = [8, 256], strides = [1, 1]} : vector<96x256xf32> to vector<8x256xf32>
    %33 = arith.truncf %32 : vector<8x256xf32> to vector<8x256xbf16>
    %34 = vector.extract_strided_slice %7 {offsets = [40, 0], sizes = [8, 256], strides = [1, 1]} : vector<96x256xf32> to vector<8x256xf32>
    %35 = arith.truncf %34 : vector<8x256xf32> to vector<8x256xbf16>
    %36 = vector.extract_strided_slice %7 {offsets = [72, 0], sizes = [8, 256], strides = [1, 1]} : vector<96x256xf32> to vector<8x256xf32>
    %cst_13 = arith.constant dense<0.000000e+00> : vector<256x256xf32>
    %37 = tpu.matmul %35, %33, %cst_13 {dimension_numbers = #tpu.dot_dimension_numbers<[0], [0], [1], [1], [0, 1, 1, 1], [], []>} : vector<8x256xbf16>, vector<8x256xbf16>, vector<256x256xf32> -> vector<256x256xf32>
    %c1 = arith.constant 1 : index
    %c0_14 = arith.constant 0 : index
    %c0_15 = arith.constant 0 : index
    %38 = vector.load %arg4[%c1, %c0_14, %c0_15] : memref<4x256x256xf32, #tpu.memory_space<vmem>>, vector<1x256x256xf32>
    %39 = vector.shape_cast %38 : vector<1x256x256xf32> to vector<256x256xf32>
    %40 = arith.addf %37, %39 : vector<256x256xf32>
    %cst_16 = arith.constant dense<0xFF800000> : vector<256xf32>
    %41 = vector.multi_reduction <maximumf>, %40, %cst_16 [0] : vector<256x256xf32> to vector<256xf32>
    %42 = vector.shape_cast %41 : vector<256xf32> to vector<1x256xf32>
    %43 = vector.broadcast %42 : vector<1x256xf32> to vector<256x256xf32>
    %44 = arith.subf %40, %43 : vector<256x256xf32>
    %45 = math.exp %44 : vector<256x256xf32>
    %46 = arith.truncf %45 : vector<256x256xf32> to vector<256x256xbf16>
    %47 = tpu.concatenate %36, %8 in 0 : vector<8x256xf32>, vector<1x256xf32> -> vector<9x256xf32>
    %48 = arith.truncf %47 : vector<9x256xf32> to vector<9x256xbf16>
    %cst_17 = arith.constant dense<0.000000e+00> : vector<9x256xf32>
    %49 = tpu.matmul %48, %46, %cst_17 {dimension_numbers = #tpu.dot_dimension_numbers<[1], [0], [0], [1], [0, 0, 1, 1], [], []>} : vector<9x256xbf16>, vector<256x256xbf16>, vector<9x256xf32> -> vector<9x256xf32>
    %50 = vector.extract_strided_slice %49 {offsets = [8, 0], sizes = [1, 256], strides = [1, 1]} : vector<9x256xf32> to vector<1x256xf32>
    %51 = vector.extract_strided_slice %49 {offsets = [0, 0], sizes = [8, 256], strides = [1, 1]} : vector<9x256xf32> to vector<8x256xf32>
    %52 = tpu.reciprocal %50 : vector<1x256xf32> -> vector<1x256xf32>
    %53 = vector.broadcast %52 : vector<1x256xf32> to vector<8x256xf32>
    %54 = arith.mulf %51, %53 : vector<8x256xf32>
    %55 = vector.extract_strided_slice %7 {offsets = [16, 0], sizes = [8, 256], strides = [1, 1]} : vector<96x256xf32> to vector<8x256xf32>
    %56 = arith.truncf %55 : vector<8x256xf32> to vector<8x256xbf16>
    %57 = vector.extract_strided_slice %7 {offsets = [48, 0], sizes = [8, 256], strides = [1, 1]} : vector<96x256xf32> to vector<8x256xf32>
    %58 = arith.truncf %57 : vector<8x256xf32> to vector<8x256xbf16>
    %59 = vector.extract_strided_slice %7 {offsets = [80, 0], sizes = [8, 256], strides = [1, 1]} : vector<96x256xf32> to vector<8x256xf32>
    %cst_18 = arith.constant dense<0.000000e+00> : vector<256x256xf32>
    %60 = tpu.matmul %58, %56, %cst_18 {dimension_numbers = #tpu.dot_dimension_numbers<[0], [0], [1], [1], [0, 1, 1, 1], [], []>} : vector<8x256xbf16>, vector<8x256xbf16>, vector<256x256xf32> -> vector<256x256xf32>
    %c2 = arith.constant 2 : index
    %c0_19 = arith.constant 0 : index
    %c0_20 = arith.constant 0 : index
    %61 = vector.load %arg4[%c2, %c0_19, %c0_20] : memref<4x256x256xf32, #tpu.memory_space<vmem>>, vector<1x256x256xf32>
    %62 = vector.shape_cast %61 : vector<1x256x256xf32> to vector<256x256xf32>
    %63 = arith.addf %60, %62 : vector<256x256xf32>
    %cst_21 = arith.constant dense<0xFF800000> : vector<256xf32>
    %64 = vector.multi_reduction <maximumf>, %63, %cst_21 [0] : vector<256x256xf32> to vector<256xf32>
    %65 = vector.shape_cast %64 : vector<256xf32> to vector<1x256xf32>
    %66 = vector.broadcast %65 : vector<1x256xf32> to vector<256x256xf32>
    %67 = arith.subf %63, %66 : vector<256x256xf32>
    %68 = math.exp %67 : vector<256x256xf32>
    %69 = arith.truncf %68 : vector<256x256xf32> to vector<256x256xbf16>
    %70 = tpu.concatenate %59, %8 in 0 : vector<8x256xf32>, vector<1x256xf32> -> vector<9x256xf32>
    %71 = arith.truncf %70 : vector<9x256xf32> to vector<9x256xbf16>
    %cst_22 = arith.constant dense<0.000000e+00> : vector<9x256xf32>
    %72 = tpu.matmul %71, %69, %cst_22 {dimension_numbers = #tpu.dot_dimension_numbers<[1], [0], [0], [1], [0, 0, 1, 1], [], []>} : vector<9x256xbf16>, vector<256x256xbf16>, vector<9x256xf32> -> vector<9x256xf32>
    %73 = vector.extract_strided_slice %72 {offsets = [8, 0], sizes = [1, 256], strides = [1, 1]} : vector<9x256xf32> to vector<1x256xf32>
    %74 = vector.extract_strided_slice %72 {offsets = [0, 0], sizes = [8, 256], strides = [1, 1]} : vector<9x256xf32> to vector<8x256xf32>
    %75 = tpu.reciprocal %73 : vector<1x256xf32> -> vector<1x256xf32>
    %76 = vector.broadcast %75 : vector<1x256xf32> to vector<8x256xf32>
    %77 = arith.mulf %74, %76 : vector<8x256xf32>
    %78 = vector.extract_strided_slice %7 {offsets = [24, 0], sizes = [8, 256], strides = [1, 1]} : vector<96x256xf32> to vector<8x256xf32>
    %79 = arith.truncf %78 : vector<8x256xf32> to vector<8x256xbf16>
    %80 = vector.extract_strided_slice %7 {offsets = [56, 0], sizes = [8, 256], strides = [1, 1]} : vector<96x256xf32> to vector<8x256xf32>
    %81 = arith.truncf %80 : vector<8x256xf32> to vector<8x256xbf16>
    %82 = vector.extract_strided_slice %7 {offsets = [88, 0], sizes = [8, 256], strides = [1, 1]} : vector<96x256xf32> to vector<8x256xf32>
    %cst_23 = arith.constant dense<0.000000e+00> : vector<256x256xf32>
    %83 = tpu.matmul %81, %79, %cst_23 {dimension_numbers = #tpu.dot_dimension_numbers<[0], [0], [1], [1], [0, 1, 1, 1], [], []>} : vector<8x256xbf16>, vector<8x256xbf16>, vector<256x256xf32> -> vector<256x256xf32>
    %c3 = arith.constant 3 : index
    %c0_24 = arith.constant 0 : index
    %c0_25 = arith.constant 0 : index
    %84 = vector.load %arg4[%c3, %c0_24, %c0_25] : memref<4x256x256xf32, #tpu.memory_space<vmem>>, vector<1x256x256xf32>
    %85 = vector.shape_cast %84 : vector<1x256x256xf32> to vector<256x256xf32>
    %86 = arith.addf %83, %85 : vector<256x256xf32>
    %cst_26 = arith.constant dense<0xFF800000> : vector<256xf32>
    %87 = vector.multi_reduction <maximumf>, %86, %cst_26 [0] : vector<256x256xf32> to vector<256xf32>
    %88 = vector.shape_cast %87 : vector<256xf32> to vector<1x256xf32>
    %89 = vector.broadcast %88 : vector<1x256xf32> to vector<256x256xf32>
    %90 = arith.subf %86, %89 : vector<256x256xf32>
    %91 = math.exp %90 : vector<256x256xf32>
    %92 = arith.truncf %91 : vector<256x256xf32> to vector<256x256xbf16>
    %93 = tpu.concatenate %82, %8 in 0 : vector<8x256xf32>, vector<1x256xf32> -> vector<9x256xf32>
    %94 = arith.truncf %93 : vector<9x256xf32> to vector<9x256xbf16>
    %cst_27 = arith.constant dense<0.000000e+00> : vector<9x256xf32>
    %95 = tpu.matmul %94, %92, %cst_27 {dimension_numbers = #tpu.dot_dimension_numbers<[1], [0], [0], [1], [0, 0, 1, 1], [], []>} : vector<9x256xbf16>, vector<256x256xbf16>, vector<9x256xf32> -> vector<9x256xf32>
    %96 = vector.extract_strided_slice %95 {offsets = [8, 0], sizes = [1, 256], strides = [1, 1]} : vector<9x256xf32> to vector<1x256xf32>
    %97 = vector.extract_strided_slice %95 {offsets = [0, 0], sizes = [8, 256], strides = [1, 1]} : vector<9x256xf32> to vector<8x256xf32>
    %98 = tpu.reciprocal %96 : vector<1x256xf32> -> vector<1x256xf32>
    %99 = vector.broadcast %98 : vector<1x256xf32> to vector<8x256xf32>
    %100 = arith.mulf %97, %99 : vector<8x256xf32>
    %101 = tpu.concatenate %31, %54, %77, %100 in 0 : vector<8x256xf32>, vector<8x256xf32>, vector<8x256xf32>, vector<8x256xf32> -> vector<32x256xf32>
    %102 = arith.truncf %101 : vector<32x256xf32> to vector<32x256xbf16>
    %c0_28 = arith.constant 0 : index
    %c0_29 = arith.constant 0 : index
    %103 = vector.load %arg5[%c0_28, %c0_29] : memref<32x32xbf16, #tpu.memory_space<vmem>>, vector<32x32xbf16>
    %cst_30 = arith.constant dense<0.000000e+00> : vector<256x32xf32>
    %104 = tpu.matmul %102, %103, %cst_30 {dimension_numbers = #tpu.dot_dimension_numbers<[0], [0], [1], [1], [0, 1, 1, 1], [], []>} : vector<32x256xbf16>, vector<32x32xbf16>, vector<256x32xf32> -> vector<256x32xf32>
    %c0_31 = arith.constant 0 : index
    %c0_32 = arith.constant 0 : index
    %105 = vector.load %arg6[%c0_31, %c0_32] : memref<1x32xf32, #tpu.memory_space<vmem>>, vector<1x32xf32>
    %106 = vector.broadcast %105 : vector<1x32xf32> to vector<256x32xf32>
    %107 = arith.addf %104, %106 : vector<256x32xf32>
    %c0_33 = arith.constant 0 : index
    %c0_34 = arith.constant 0 : index
    %c0_35 = arith.constant 0 : index
    %108 = vector.load %arg7[%c0_33, %c0_34, %c0_35] : memref<1x256x32xf32, #tpu.memory_space<vmem>>, vector<1x256x32xf32>
    %109 = vector.shape_cast %108 : vector<1x256x32xf32> to vector<256x32xf32>
    %110 = vector.shape_cast %107 : vector<256x32xf32> to vector<1x256x32xf32>
    tpu.vector_store %arg7[%c0_33, %c0_34, %c0_35], %110 {strides = array<i32>} : memref<1x256x32xf32, #tpu.memory_space<vmem>>, vector<1x256x32xf32>,
    return
  }
  func.func @transform_0(%arg0: i32) -> (i32, i32, i32) {
    %c0_i32 = arith.constant 0 : i32
    %c0_i32_0 = arith.constant 0 : i32
    %c0_i32_1 = arith.constant 0 : i32
    return %arg0, %c0_i32, %c0_i32_0 : i32, i32, i32
  }
  func.func @transform_1(%arg0: i32) -> (i32, i32) {
    %c0_i32 = arith.constant 0 : i32
    %c0_i32_0 = arith.constant 0 : i32
    %c0_i32_1 = arith.constant 0 : i32
    return %c0_i32, %c0_i32_0 : i32, i32
  }
  func.func @transform_2(%arg0: i32) -> (i32, i32) {
    %c0_i32 = arith.constant 0 : i32
    %c0_i32_0 = arith.constant 0 : i32
    %c0_i32_1 = arith.constant 0 : i32
    return %c0_i32, %c0_i32_0 : i32, i32
  }
  func.func @transform_3(%arg0: i32) -> (i32, i32, i32) {
    %c0_i32 = arith.constant 0 : i32
    %c0_i32_0 = arith.constant 0 : i32
    %c0_i32_1 = arith.constant 0 : i32
    %c0_i32_2 = arith.constant 0 : i32
    return %c0_i32, %c0_i32_0, %c0_i32_1 : i32, i32, i32
  }
  func.func @transform_4(%arg0: i32) -> (i32, i32) {
    %c0_i32 = arith.constant 0 : i32
    %c0_i32_0 = arith.constant 0 : i32
    %c0_i32_1 = arith.constant 0 : i32
    return %c0_i32, %c0_i32_0 : i32, i32
  }
  func.func @transform_5(%arg0: i32) -> (i32, i32) {
    %c0_i32 = arith.constant 0 : i32
    %c0_i32_0 = arith.constant 0 : i32
    %c0_i32_1 = arith.constant 0 : i32
    return %c0_i32, %c0_i32_0 : i32, i32
  }
  func.func @transform_6(%arg0: i32) -> (i32, i32, i32) {
    %c0_i32 = arith.constant 0 : i32
    %c0_i32_0 = arith.constant 0 : i32
    %c0_i32_1 = arith.constant 0 : i32
    return %arg0, %c0_i32, %c0_i32_0 : i32, i32, i32
  }
}

</mosaic_0001>

<bundles_post_ra>
// kernel: tpu_custom_call.1
= control target key start
LH: loop header
LB: loop body
LE: loop exit
PB: predicated region body
PF: predicated region fallthrough
CT: control target
= control target key end

     0   :  { %11 = vsyncpa [#allocation3], 0  ;;  %s4561_s21 = smov 0   ;;  %s7310_s0 = inlined_call_operand.vmem [shape: f32[2,256,32], index: 0, kind: input, shape index: {}]   ;;  %s7311_s1 = inlined_call_operand.vmem [shape: bf16[96,32], index: 1, kind: input, shape index: {}]   ;;  %s7312_s2 = inlined_call_operand.vmem [shape: f32[96,1], index: 2, kind: input, shape index: {}]   ;;  %s7313_s3 = inlined_call_operand.hbm [shape: f32[4,256,256], index: 3, kind: input, shape index: {}]   ;;  %s7314_s4 = inlined_call_operand.vmem [shape: bf16[32,32], index: 4, kind: input, shape index: {}]   ;;  %s7315_s5 = inlined_call_operand.vmem [shape: f32[1,32], index: 5, kind: input, shape index: {}]   ;;  %s7316_s6 = inlined_call_operand.vmem [shape: f32[2,256,32], index: 6, kind: output, shape index: {}]  }
   0x1 LB: > { %s196_s24 = sshll.u32 %s7313_s3, 4  ;;  %s3714_s25 = sadd.s32 4294967295, %s4520_s21   ;;  %s4520_s21 = sphi %s4561_s21, %s17_s21   ;;  %s197_s24 = int_to_ptr.hbm [resolvable:$true] %s196_s24 }
   0x2   : > { %p3716_p0 = scmp.ge.s32.totalorder %s4520_s21, 1  ;;  %p179_p1 = scmp.lt.s32.totalorder %s4520_s21, 3 }
   0x3   : > { %p3934_p2 = scmp.eq.s32.totalorder %s3714_s25, 0  ;;  %s4522_s26 = smov [#allocation2]  }
   0x4   : > { %p180_p3 = pnand %p3716_p0, %p179_p1  ;;  %s198_s27 = sshll.u32 %s4522_s26, 4  ;;  %s199_s27 = int_to_ptr.vmem [resolvable:$true] %s198_s27 }
   0x5   : > { %s4523_s28 = smov 256   ;;  %s4524_s29 = smov 16  }
   0x6   : > { %p3930_p4 = pneg %p180_p3  ;;  %228 = sbr.rel (%p180_p3) target bundleno = 3309 (0xced), region = 44 }
   0x8   : > { %p3931_p5 = pnand %p3934_p2, %p3930_p4 }
   0xa   : > { %3933 = dma.hbm_to_vmem [thread:$0]  (!%p3931_p5), %s197_s24, 32768, %s199_s27, [#allocation3], %s4523_s28, %s4523_s28, %s4524_s29  }
   0xb   : > { %4515 = dma.done.wait (%p3934_p2), [#allocation3], 32768  }
   0xc   : > { %4517 = vsyncadd (%p3934_p2), [#allocation3], 4294934528  ;;  %p259_p6 = scmp.lt.s32.totalorder %s3714_s25, 1  ;;  %vm432_vm0 = vcmask 261120   ;;  %v334_v44 = vld [vmem:[%s7312_s2 + $0x20] sm:$0xff]  ;;  %v4525_v46 = vmov 0  }
   0xd   : > { %3948 = vset.pattern.permute.xlu0 %v4525_v46  ;;  %3950 = vset.pattern.permute.xlu2 %v4525_v46  ;;  %v330_v54 = vld [vmem:[%s7312_s2] sm:$0xff]  ;;  %vm718_vm1 = vcmask 1043456   ;;  %vm669_vm2 = vcmask 64512  }
   0xe   : > { %s7600_s25 = smov (!%p259_p6, %s3714_s25), 1  ;;  %364 = vperm.xlu0 %3948, %v334_v44   ;;  %v338_v63 = vld [vmem:[%s7312_s2 + $0x40] sm:$0xff] }
   0xf   : > { %s3915_s30 = sshll.u32 %s7600_s25, 8  ;;  %384 = vperm.xlu2 %3950, %v338_v63  }
  0x10   : > { %s4580_s9 = scalar_lea.vmem %s7310_s0, %s3915_s30  ;;  %s7202_s12 = scalar_lea.vmem %s7316_s6, %s3915_s30 }
  0x11   : > { %v284_v0 = vld [vmem:[%s4580_s9 + $0x70] sm:$0xff]  ;;  %v285_v1 = vld [vmem:[%s4580_s9 + $0x78] sm:$0xff]  ;;  %v282_v6 = vld [vmem:[%s4580_s9 + $0x60] sm:$0xff] }
  0x12   : > { %v300_v2 = vld [vmem:[%s4580_s9 + $0xf0] sm:$0xff]  ;;  %v309_v3 = vpack.c.bf16 %v285_v1, %v284_v0  ;;  %v301_v4 = vld [vmem:[%s4580_s9 + $0xf8] sm:$0xff]  ;;  %v283_v7 = vld [vmem:[%s4580_s9 + $0x68] sm:$0xff] }
  0x13   : > { %v317_v5 = vpack.c.bf16 %v301_v4, %v300_v2  ;;  %v298_v9 = vld [vmem:[%s4580_s9 + $0xe0] sm:$0xff]  ;;  %v299_v10 = vld [vmem:[%s4580_s9 + $0xe8] sm:$0xff]  ;;  %v308_v12 = vpack.c.bf16 %v283_v7, %v282_v6  ;;  %v280_v16 = vld [vmem:[%s4580_s9 + $0x50] sm:$0xff] }
  0x14   : > { %v473_v8 = vsel %vm432_vm0, %v309_v3, 0  ;;  %v316_v13 = vpack.c.bf16 %v299_v10, %v298_v9  ;;  %v281_v17 = vld [vmem:[%s4580_s9 + $0x58] sm:$0xff]  ;;  %v296_v18 = vld [vmem:[%s4580_s9 + $0xd0] sm:$0xff]  ;;  %v278_v24 = vld [vmem:[%s4580_s9 + $0x40] sm:$0xff] }
  0x15   : > { %499 = vmatpush.bf16.xpose.msra.mxu0 %v473_v8  ;;  %v497_v11 = vsel %vm432_vm0, %v317_v5, 0  ;;  %v470_v14 = vsel %vm432_vm0, %v308_v12, 0  ;;  %v297_v19 = vld [vmem:[%s4580_s9 + $0xd8] sm:$0xff]  ;;  %v307_v20 = vpack.c.bf16 %v281_v17, %v280_v16  ;;  %v279_v25 = vld [vmem:[%s4580_s9 + $0x48] sm:$0xff]  ;;  %v294_v26 = vld [vmem:[%s4580_s9 + $0xc0] sm:$0xff] }
  0x16   : > { %538 = vmatpush.bf16.xpose.msra.mxu1 %v497_v11  ;;  %v494_v15 = vsel %vm432_vm0, %v316_v13, 0  ;;  %v315_v21 = vpack.c.bf16 %v297_v19, %v296_v18  ;;  %v295_v27 = vld [vmem:[%s4580_s9 + $0xc8] sm:$0xff]  ;;  %v306_v28 = vpack.c.bf16 %v279_v25, %v278_v24  ;;  %v276_v32 = vld [vmem:[%s4580_s9 + $0x30] sm:$0xff]  ;;  %v277_v33 = vld [vmem:[%s4580_s9 + $0x38] sm:$0xff]  ;;  %344 = vperm.xlu0 %3948, %v330_v54  }
  0x17   : > { %v467_v22 = vsel %vm432_vm0, %v307_v20, 0  ;;  %v314_v29 = vpack.c.bf16 %v295_v27, %v294_v26  ;;  %v292_v34 = vld [vmem:[%s4580_s9 + $0xb0] sm:$0xff]  ;;  %v293_v35 = vld [vmem:[%s4580_s9 + $0xb8] sm:$0xff]  ;;  %v305_v36 = vpack.c.bf16 %v277_v33, %v276_v32  ;;  %v274_v40 = vld [vmem:[%s4580_s9 + $0x20] sm:$0xff] }
  0x18   : > { %v491_v23 = vsel %vm432_vm0, %v315_v21, 0  ;;  %v464_v30 = vsel %vm432_vm0, %v306_v28, 0  ;;  %v313_v37 = vpack.c.bf16 %v293_v35, %v292_v34  ;;  %v275_v41 = vld [vmem:[%s4580_s9 + $0x28] sm:$0xff]  ;;  %v290_v42 = vld [vmem:[%s4580_s9 + $0xa0] sm:$0xff]  ;;  %v272_v50 = vld [vmem:[%s4580_s9 + $0x10] sm:$0xff] }
  0x19   : > { %v488_v31 = vsel %vm432_vm0, %v314_v29, 0  ;;  %v461_v38 = vsel %vm432_vm0, %v305_v36, 0  ;;  %v291_v43 = vld [vmem:[%s4580_s9 + $0xa8] sm:$0xff]  ;;  %v304_v45 = vpack.c.bf16 %v275_v41, %v274_v40  ;;  %v273_v51 = vld [vmem:[%s4580_s9 + $0x18] sm:$0xff]  ;;  %v288_v52 = vld [vmem:[%s4580_s9 + $0x90] sm:$0xff] }
  0x1a   : > { %v485_v39 = vsel %vm432_vm0, %v313_v37, 0  ;;  %v312_v47 = vpack.c.bf16 %v291_v43, %v290_v42  ;;  %v289_v53 = vld [vmem:[%s4580_s9 + $0x98] sm:$0xff]  ;;  %v303_v55 = vpack.c.bf16 %v273_v51, %v272_v50  ;;  %v270_v59 = vld [vmem:[%s4580_s9] sm:$0xff]  ;;  %v271_v60 = vld [vmem:[%s4580_s9 + $0x8] sm:$0xff] }
  0x1b   : > { %v458_v48 = vsel %vm432_vm0, %v304_v45, 0  ;;  %v311_v56 = vpack.c.bf16 %v289_v53, %v288_v52  ;;  %v286_v61 = vld [vmem:[%s4580_s9 + $0x80] sm:$0xff]  ;;  %v287_v62 = vld [vmem:[%s4580_s9 + $0x88] sm:$0xff]  ;;  %v302_v0 = vpack.c.bf16 %v271_v60, %v270_v59  ;;  %v336_v7 = vld [vmem:[%s7312_s2 + $0x30] sm:$0xff] }
  0x1c   : > { %v482_v49 = vsel %vm432_vm0, %v312_v47, 0  ;;  %v455_v57 = vsel %vm432_vm0, %v303_v55, 0  ;;  %v310_v1 = vpack.c.bf16 %v287_v62, %v286_v61  ;;  %v331_v4 = vld [vmem:[%s7312_s2 + $0x8] sm:$0xff]  ;;  %v3917_v5 = vld [vmem:[%s7311_s1] sm:$0xff]  ;;  %v332_v9 = vld [vmem:[%s7312_s2 + $0x10] sm:$0xff] }
  0x1d   : > { %500 = vmatpush.bf16.xpose.msra.mxu0 %v470_v14  ;;  %v479_v58 = vsel %vm432_vm0, %v311_v56, 0  ;;  %v452_v2 = vsel %vm432_vm0, %v302_v0, 0  ;;  %349 = vperm.xlu2 %3950, %v331_v4   ;;  %v339_v6 = vld [vmem:[%s7312_s2 + $0x48] sm:$0xff]  ;;  %v3919_v10 = vld [vmem:[%s7311_s1 + $0x10] sm:$0xff]  ;;  %v3920_v11 = vld [vmem:[%s7311_s1 + $0x18] sm:$0xff] }
  0x1e   : > { %539 = vmatpush.bf16.xpose.msra.mxu1 %v494_v15  ;;  %v476_v3 = vsel %vm432_vm0, %v310_v1, 0  ;;  %v3918_v8 = vld [vmem:[%s7311_s1 + $0x8] sm:$0xff]  ;;  %v337_v0 = vld [vmem:[%s7312_s2 + $0x38] sm:$0xff] }
  0x1f   : > { %v335_v54 = vld [vmem:[%s7312_s2 + $0x28] sm:$0xff] }
  0x25   : > { %501 = vmatpush.bf16.xpose.msra.mxu0 %v467_v22  ;;  %389 = vperm.xlu2 %3950, %v339_v6  }
  0x26   : > { %540 = vmatpush.bf16.xpose.msra.mxu1 %v491_v23 }
  0x2d   : > { %502 = vmatpush.bf16.xpose.msra.mxu0 %v464_v30  ;;  %374 = vperm.xlu2 %3950, %v336_v7  }
  0x2e   : > { %541 = vmatpush.bf16.xpose.msra.mxu1 %v488_v31 }
  0x35   : > { %503 = vmatpush.bf16.xpose.msra.mxu0 %v461_v38  ;;  %354 = vperm.xlu2 %3950, %v332_v9  }
  0x36   : > { %542 = vmatpush.bf16.xpose.msra.mxu1 %v485_v39 }
  0x3d   : > { %504 = vmatpush.bf16.xpose.msra.mxu0 %v458_v48 }
  0x3e   : > { %543 = vmatpush.bf16.xpose.msra.mxu1 %v482_v49 }
  0x45   : > { %505 = vmatpush.bf16.xpose.msra.mxu0 %v455_v57  ;;  %v333_v57 = vld [vmem:[%s7312_s2 + $0x18] sm:$0xff] }
  0x46   : > { %544 = vmatpush.bf16.xpose.msra.mxu1 %v479_v58 }
  0x4d   : > { %506 = vmatpush.bf16.xpose.msra.mxu0 %v452_v2 }
  0x4e   : > { %545 = vmatpush.bf16.xpose.msra.mxu1 %v476_v3 }
  0x54   : > { %3749 = vmatmul.msk.bf16.vlgmr.msra.gmra.mxu0 %vm432_vm0, %v3917_v5 }
  0x55   : > { %3755 = vmatmul.msk.bf16.vlgmr.msra.gmra.mxu1 %vm432_vm0, %v3917_v5 }
  0x64   : > { %3750 = vmatmul.msk.bf16.gmra.mxu0 %vm432_vm0, %v3918_v8 }
  0x65   : > { %3756 = vmatmul.msk.bf16.gmra.mxu1 %vm432_vm0, %v3918_v8 }
  0x69   : > { %v4683_v26 = vpop.permute.xlu2 %384 }
  0x74   : > { %3751 = vmatmul.msk.bf16.gmra.mxu0 %vm432_vm0, %v3919_v10 }
  0x75   : > { %3757 = vmatmul.msk.bf16.gmra.mxu1 %vm432_vm0, %v3919_v10 }
  0x77   : > { %v4689_v29 = vpop.permute.xlu2 %349 }
  0x7f   : > { %v4691_v36 = vpop.permute.xlu2 %389 }
  0x80   : > { %v365_v12 = vpop.permute.xlu0 %364  ;;  %7394 = vst [vmem:[#allocation9_spill] sm:$0xff] %v4691_v36 }
  0x84   : > { %3752 = vmatmul.msk.bf16.gmra.mxu0 %vm432_vm0, %v3920_v11 }
  0x85   : > { %3758 = vmatmul.msk.bf16.gmra.mxu1 %vm432_vm0, %v3920_v11 }
  0x87   : > { %v375_v39 = vpop.permute.xlu2 %374 }
  0x88   : > { %v345_v13 = vpop.permute.xlu0 %344 }
  0x8f   : > { %v4698_v47 = vpop.permute.xlu2 %354 }
  0x90   : > { %7395 = vst [vmem:[#allocation10_spill] sm:$0xff] %v4698_v47 }
  0xd1   : > { %v508_v14 = vpop.f32.mrf.mxu0 }
  0xd2   : > { %v509_v15 = vadd.f32 %v508_v14, %v345_v13  ;;  %v547_v16 = vpop.f32.mrf.mxu1 }
  0xd3   : > { %v548_v17 = vadd.f32 %v547_v16, %v345_v13 }
  0xd4   : > { %v577_v18 = vpack.c.bf16 %v509_v15, %v509_v15 }
  0xd5   : > { %v578_v19 = vpack.c.bf16 %v548_v17, %v548_v17 }
  0xd6   : > { %v720_v20 = vsel %vm718_vm1, %v577_v18, 0 }
  0xd7   : > { %732 = vmatpush.bf16.msra.mxu2 %v720_v20  ;;  %3925 = vmatpush.bf16.msra.mxu3 %v720_v20  ;;  %v723_v21 = vsel %vm718_vm1, %v578_v19, 0 }
  0xd9   : > { %v4675_v22 = vpop.f32.mrf.mxu0 }
  0xda   : > { %v4677_v23 = vpop.f32.mrf.mxu1 }
  0xdb   : > { %821 = vmatpush.bf16.msrb.mxu3 %v723_v21 }
  0xe1   : > { %v4679_v24 = vpop.f32.mrf.mxu0 }
  0xe2   : > { %7390 = vst [vmem:[#allocation5_spill] sm:$0xff] %v4679_v24  ;;  %v4681_v25 = vpop.f32.mrf.mxu1  ;;  %v1318_v24 = vld [vmem:[#allocation2 + $0x2b0] sm:$0xff] }
  0xe3   : > { %7391 = vst [vmem:[#allocation6_spill] sm:$0xff] %v4681_v25  ;;  %v625_v25 = vld [vmem:[#allocation2 + $0x160] sm:$0xff] }
  0xe9   : > { %v4685_v27 = vpop.f32.mrf.mxu0 }
  0xea   : > { %7392 = vst [vmem:[#allocation7_spill] sm:$0xff] %v4685_v27  ;;  %v4687_v28 = vpop.f32.mrf.mxu1  ;;  %v587_v27 = vld [vmem:[#allocation2 + $0x30] sm:$0xff] }
  0xeb   : > { %7393 = vst [vmem:[#allocation8_spill] sm:$0xff] %v4687_v28 }
  0xf1   : > { %v518_v30 = vpop.f32.mrf.mxu0 }
  0xf2   : > { %v519_v31 = vadd.f32 %v518_v30, %v365_v12  ;;  %v557_v32 = vpop.f32.mrf.mxu1 }
  0xf3   : > { %v558_v33 = vadd.f32 %v557_v32, %v365_v12 }
  0xf4   : > { %v579_v34 = vpack.c.bf16 %v519_v31, %v519_v31 }
  0xf5   : > { %v580_v35 = vpack.c.bf16 %v558_v33, %v558_v33 }
  0xf7   : > { %645 = vxpose.binary.xlu1.c.b16.start.end [1/2] (short) %v580_v35, %v579_v34, 128 }
  0xf9   : > { %v4693_v37 = vpop.f32.mrf.mxu0 }
  0xfa   : > { %v4695_v38 = vpop.f32.mrf.mxu1 }
 0x101   : > { %v523_v40 = vpop.f32.mrf.mxu0 }
 0x102   : > { %v524_v41 = vadd.f32 %v523_v40, %v375_v39  ;;  %v562_v42 = vpop.f32.mrf.mxu1 }
 0x103   : > { %v563_v43 = vadd.f32 %v562_v42, %v375_v39 }
 0x104   : > { %v2006_v44 = vpack.c.bf16 %v524_v41, %v524_v41 }
 0x105   : > { %v2007_v45 = vpack.c.bf16 %v563_v43, %v563_v43 }
 0x107   : > { %2073 = vxpose.binary.xlu2.c.b16.start.end [1/2] (short) %v2007_v45, %v2006_v44, 128 }
 0x109   : > { %v525_v34 = vpop.f32.mrf.mxu0 }
 0x10a   : > { %v564_v35 = vpop.f32.mrf.mxu1 }
 0x14a   : > { %3949 = vset.pattern.permute.xlu1 %v4525_v46 }
 0x1a3   : > { %v653_v48 = vpop.trf.xlu1 }
 0x1a4   : > { %3761 = vmatmul.msk.bf16.vlgmr.msra.gmra.mxu2 %vm669_vm2, %v653_v48 }
 0x1a8   : > { %v4701_v49 = vpop.trf.xlu2 }
 0x1a9   : > { %7396 = vst [vmem:[#allocation11_spill] sm:$0xff] %v4701_v49 }
 0x1ab   : > { %v4703_v50 = vpop.trf.xlu1 }
 0x1b0   : > { %v4705_v51 = vpop.trf.xlu2 }
 0x1b1   : > { %7397 = vst [vmem:[#allocation12_spill] sm:$0xff] %v4705_v51  ;;  %v609_v51 = vld [vmem:[#allocation2 + $0xe0] sm:$0xff] }
 0x1b3   : > { %v4707_v52 = vpop.trf.xlu1 }
 0x1b4   : > { %3762 = vmatmul.msk.bf16.gmra.mxu2 %vm669_vm2, %v4707_v52 }
 0x1b8   : > { %v4711_v53 = vpop.trf.xlu2 }
 0x1b9   : > { %7398 = vst [vmem:[#allocation13_spill] sm:$0xff] %v4711_v53 }
 0x1bb   : > { %v4713_v46 = vpop.trf.xlu1 }
 0x1bc   : > { %3770 = vmatmul.msk.bf16.vlgmr.msra.gmra.mxu3 %vm669_vm2, %v4713_v46 }
 0x1c0   : > { %v4720_v55 = vpop.trf.xlu2 }
 0x1c1   : > { %7399 = vst [vmem:[#allocation14_spill] sm:$0xff] %v4720_v55  ;;  %369 = vperm.xlu1 %3949, %v335_v54   ;;  %v595_v55 = vld [vmem:[#allocation2 + $0x70] sm:$0xff] }
 0x1c3   : > { %v4722_v56 = vpop.trf.xlu1 }
 0x1c4   : > { %3763 = vmatmul.msk.bf16.gmra.mxu2 %vm669_vm2, %v4722_v56 }
 0x1c8   : > { %v4729_v58 = vpop.trf.xlu2 }
 0x1c9   : > { %7400 = vst [vmem:[#allocation15_spill] sm:$0xff] %v4729_v58  ;;  %359 = vperm.xlu1 %3949, %v333_v57  }
 0x1cb   : > { %v4731_v59 = vpop.trf.xlu1 }
 0x1cc   : > { %3771 = vmatmul.msk.bf16.gmra.mxu3 %vm669_vm2, %v4731_v59 }
 0x1d0   : > { %v4735_v60 = vpop.trf.xlu2 }
 0x1d1   : > { %7401 = vst [vmem:[#allocation16_spill] sm:$0xff] %v4735_v60 }
 0x1d3   : > { %v4737_v61 = vpop.trf.xlu1 }
 0x1d4   : > { %3764 = vmatmul.msk.bf16.gmra.mxu2 %vm669_vm2, %v4737_v61 }
 0x1d8   : > { %v4741_v62 = vpop.trf.xlu2 }
 0x1d9   : > { %7402 = vst [vmem:[#allocation17_spill] sm:$0xff] %v4741_v62 }
 0x1db   : > { %v4743_v63 = vpop.trf.xlu1 }
 0x1dc   : > { %3772 = vmatmul.msk.bf16.gmra.mxu3 %vm669_vm2, %v4743_v63 }
 0x1e0   : > { %379 = vperm.xlu2 %3950, %v337_v0   ;;  %v4750_v1 = vpop.trf.xlu2  ;;  %v581_v0 = vld [vmem:[#allocation2] sm:$0xff] }
 0x1e1   : > { %7403 = vst [vmem:[#allocation18_spill] sm:$0xff] %v4750_v1 }
 0x1e3   : > { %v4752_v2 = vpop.trf.xlu1 }
 0x1e4   : > { %3765 = vmatmul.msk.bf16.gmra.mxu2 %vm669_vm2, %v4752_v2 }
 0x1e8   : > { %v4756_v3 = vpop.trf.xlu2 }
 0x1e9   : > { %7404 = vst [vmem:[#allocation19_spill] sm:$0xff] %v4756_v3 }
 0x1eb   : > { %v4758_v4 = vpop.trf.xlu1 }
 0x1ec   : > { %3773 = vmatmul.msk.bf16.gmra.mxu3 %vm669_vm2, %v4758_v4 }
 0x1f0   : > { %v4766_v6 = vpop.trf.xlu2 }
 0x1f1   : > { %7405 = vst [vmem:[#allocation20_spill] sm:$0xff] %v4766_v6 }
 0x1f3   : > { %v4762_v5 = vpop.trf.xlu1 }
 0x1f4   : > { %3766 = vmatmul.msk.bf16.gmra.mxu2 %vm669_vm2, %v4762_v5 }
 0x1f8   : > { %v4772_v8 = vpop.trf.xlu2 }
 0x1f9   : > { %7406 = vst [vmem:[#allocation21_spill] sm:$0xff] %v4772_v8  ;;  %v599_v8 = vld [vmem:[#allocation2 + $0x90] sm:$0xff] }
 0x1fb   : > { %v4768_v7 = vpop.trf.xlu1 }
 0x1fc   : > { %3774 = vmatmul.msk.bf16.gmra.mxu3 %vm669_vm2, %v4768_v7 }
 0x200   : > { %v4778_v10 = vpop.trf.xlu2 }
 0x201   : > { %7407 = vst [vmem:[#allocation22_spill] sm:$0xff] %v4778_v10  ;;  %v605_v10 = vld [vmem:[#allocation2 + $0xc0] sm:$0xff] }
 0x203   : > { %v4774_v9 = vpop.trf.xlu1 }
 0x204   : > { %3767 = vmatmul.msk.bf16.gmra.mxu2 %vm669_vm2, %v4774_v9 }
 0x208   : > { %v4784_v12 = vpop.trf.xlu2 }
 0x209   : > { %7408 = vst [vmem:[#allocation23_spill] sm:$0xff] %v4784_v12 }
 0x20b   : > { %v4780_v11 = vpop.trf.xlu1 }
 0x20c   : > { %3775 = vmatmul.msk.bf16.gmra.mxu3 %vm669_vm2, %v4780_v11 }
 0x210   : > { %v4794_v15 = vpop.trf.xlu2 }
 0x211   : > { %7409 = vst [vmem:[#allocation24_spill] sm:$0xff] %v4794_v15  ;;  %v591_v15 = vld [vmem:[#allocation2 + $0x50] sm:$0xff] }
 0x213   : > { %v4786_v13 = vpop.trf.xlu1 }
 0x214   : > { %3768 = vmatmul.msk.bf16.gmra.mxu2 %vm669_vm2, %v4786_v13 }
 0x218   : > { %v4798_v16 = vpop.trf.xlu2 }
 0x219   : > { %7410 = vst [vmem:[#allocation25_spill] sm:$0xff] %v4798_v16 }
 0x21b   : > { %v4790_v14 = vpop.trf.xlu1 }
 0x21c   : > { %3776 = vmatmul.msk.bf16.gmra.mxu3 %vm669_vm2, %v4790_v14 }
 0x220   : > { %v4803_v19 = vpop.trf.xlu2 }
 0x221   : > { %7411 = vst [vmem:[#allocation26_spill] sm:$0xff] %v4803_v19  ;;  %v583_v19 = vld [vmem:[#allocation2 + $0x10] sm:$0xff] }
 0x224   : > { %3769 = vmatmul.msk.bf16.gmra.mxu2 %vm669_vm2, %v4703_v50 }
 0x227   : > { %v734_v17 = vpop.f32.mrf.mxu2 }
 0x22c   : > { %3777 = vmatmul.msk.bf16.vlgmr.msrb.gmra.mxu3 %vm669_vm2, %v653_v48  ;;  %v585_v48 = vld [vmem:[#allocation2 + $0x20] sm:$0xff] }
 0x22f   : > { %v4801_v18 = vpop.f32.mrf.mxu2 }
 0x230   : > { %v4867_v16 = vadd.f32 %v4801_v18, %v583_v19  ;;  %v607_v19 = vld [vmem:[#allocation2 + $0xd0] sm:$0xff] }
 0x233   : > { %v370_v20 = vpop.permute.xlu1 %369 }
 0x234   : > { %v521_v21 = vadd.f32 %v4693_v37, %v370_v20  ;;  %v560_v30 = vadd.f32 %v4695_v38, %v370_v20  ;;  %v589_v20 = vld [vmem:[#allocation2 + $0x40] sm:$0xff] }
 0x236   : > { %v1293_v31 = vpack.c.bf16 %v521_v21, %v521_v21  ;;  %v1294_v32 = vpack.c.bf16 %v560_v30, %v560_v30 }
 0x237   : > { %v739_v33 = vpop.f32.mrf.mxu2 }
 0x238   : > { %1360 = vxpose.binary.xlu0.c.b16.start.end [1/2] (short) %v1294_v32, %v1293_v31, 128  ;;  %v4817_v21 = vadd.f32 %v739_v33, %v585_v48  ;;  %v593_v31 = vld [vmem:[#allocation2 + $0x60] sm:$0xff] }
 0x23a   : > { %v380_v39 = vpop.permute.xlu2 %379 }
 0x23b   : > { %v526_v40 = vadd.f32 %v525_v34, %v380_v39  ;;  %v565_v41 = vadd.f32 %v564_v35, %v380_v39 }
 0x23c   : > { %3778 = vmatmul.msk.bf16.gmra.mxu3 %vm669_vm2, %v4707_v52  ;;  %v4819_v52 = vadd.f32 %v734_v17, %v581_v0 }
 0x23d   : > { %v2719_v42 = vpack.c.bf16 %v526_v40, %v526_v40  ;;  %v2720_v43 = vpack.c.bf16 %v565_v41, %v565_v41  ;;  %v597_v41 = vld [vmem:[#allocation2 + $0x80] sm:$0xff] }
 0x23e   : > { %v903_v32 = vmax.f32 %v4819_v52, %v4817_v21 }
 0x23f   : > { %2786 = vxpose.binary.xlu1.c.b16.start.end [1/2] (short) %v2720_v43, %v2719_v42, 128  ;;  %v741_v44 = vpop.f32.mrf.mxu2  ;;  %v4809_v45 = vpop.f32.mrf.mxu3 }
 0x240   : > { %v4862_v60 = vadd.f32 %v741_v44, %v587_v27 }
 0x242   : > { %v904_v3 = vmax.f32 %v4867_v16, %v4862_v60 }
 0x247   : > { %v744_v37 = vpop.f32.mrf.mxu2  ;;  %v4811_v38 = vpop.f32.mrf.mxu3 }
 0x248   : > { %v4821_v30 = vadd.f32 %v744_v37, %v589_v20 }
 0x24c   : > { %3779 = vmatmul.msk.bf16.gmra.mxu3 %vm669_vm2, %v4722_v56  ;;  %v905_v56 = vmax.f32 %v903_v32, %v4821_v30 }
 0x24f   : > { %v746_v54 = vpop.f32.mrf.mxu2  ;;  %v4815_v57 = vpop.f32.mrf.mxu3 }
 0x250   : > { %v4869_v12 = vadd.f32 %v746_v54, %v591_v15 }
 0x252   : > { %v906_v58 = vmax.f32 %v904_v3, %v4869_v12 }
 0x257   : > { %v749_v34 = vpop.f32.mrf.mxu2  ;;  %v4825_v35 = vpop.f32.mrf.mxu3 }
 0x258   : > { %v4828_v39 = vadd.f32 %v749_v34, %v593_v31 }
 0x25a   : > { %v907_v40 = vmax.f32 %v905_v56, %v4828_v39 }
 0x25c   : > { %3780 = vmatmul.msk.bf16.gmra.mxu3 %vm669_vm2, %v4737_v61 }
 0x25f   : > { %v751_v17 = vpop.f32.mrf.mxu2  ;;  %v4833_v33 = vpop.f32.mrf.mxu3 }
 0x260   : > { %v4875_v62 = vadd.f32 %v751_v17, %v595_v55 }
 0x262   : > { %v908_v53 = vmax.f32 %v906_v58, %v4875_v62 }
 0x267   : > { %v754_v42 = vpop.f32.mrf.mxu2  ;;  %v4835_v43 = vpop.f32.mrf.mxu3 }
 0x268   : > { %v4837_v37 = vadd.f32 %v754_v42, %v597_v41 }
 0x26a   : > { %v909_v48 = vmax.f32 %v907_v40, %v4837_v37 }
 0x26c   : > { %3781 = vmatmul.msk.bf16.gmra.mxu3 %vm669_vm2, %v4752_v2 }
 0x26f   : > { %v756_v0 = vpop.f32.mrf.mxu2  ;;  %v4842_v20 = vpop.f32.mrf.mxu3 }
 0x270   : > { %v4881_v18 = vadd.f32 %v756_v0, %v599_v8 }
 0x272   : > { %v910_v8 = vmax.f32 %v908_v53, %v4881_v18  ;;  %v4907_v53 = vadd.f32 %v4833_v33, %v625_v25 }
 0x277   : > { %v759_v31 = vpop.f32.mrf.mxu2  ;;  %v4844_v32 = vpop.f32.mrf.mxu3 }
 0x27c   : > { %3782 = vmatmul.msk.bf16.gmra.mxu3 %vm669_vm2, %v4762_v5  ;;  %v601_v5 = vld [vmem:[#allocation2 + $0xa0] sm:$0xff] }
 0x27f   : > { %v761_v61 = vpop.f32.mrf.mxu2  ;;  %v4848_v34 = vpop.f32.mrf.mxu3 }
 0x287   : > { %v764_v56 = vpop.f32.mrf.mxu2  ;;  %v4850_v41 = vpop.f32.mrf.mxu3 }
 0x28c   : > { %3783 = vmatmul.msk.bf16.gmra.mxu3 %vm669_vm2, %v4774_v9  ;;  %v4864_v9 = vadd.f32 %v759_v31, %v601_v5  ;;  %v603_v31 = vld [vmem:[#allocation2 + $0xb0] sm:$0xff]  ;;  %v613_v5 = vld [vmem:[#allocation2 + $0x100] sm:$0xff] }
 0x28d   : > { %v4885_v55 = vadd.f32 %v761_v61, %v603_v31 }
 0x28e   : > { %v911_v27 = vmax.f32 %v909_v48, %v4864_v9  ;;  %v621_v48 = vld [vmem:[#allocation2 + $0x140] sm:$0xff] }
 0x28f   : > { %v766_v40 = vpop.f32.mrf.mxu2  ;;  %v4854_v2 = vpop.f32.mrf.mxu3  ;;  %v4898_v58 = vadd.f32 %v4815_v57, %v621_v48  ;;  %v912_v61 = vmax.f32 %v910_v8, %v4885_v55  ;;  %v619_v57 = vld [vmem:[#allocation2 + $0x130] sm:$0xff] }
 0x290   : > { %v4894_v0 = vadd.f32 %v766_v40, %v607_v19  ;;  %v4919_v25 = vadd.f32 %v4811_v38, %v619_v57  ;;  %v637_v57 = vld [vmem:[#allocation2 + $0x1c0] sm:$0xff] }
 0x292   : > { %v914_v40 = vmax.f32 %v912_v61, %v4894_v0  ;;  %v633_v61 = vld [vmem:[#allocation2 + $0x1a0] sm:$0xff] }
 0x297   : > { %v769_v42 = vpop.f32.mrf.mxu2  ;;  %v4856_v28 = vpop.f32.mrf.mxu3 }
 0x298   : > { %v4878_v44 = vadd.f32 %v769_v42, %v609_v51  ;;  %v611_v42 = vld [vmem:[#allocation2 + $0xf0] sm:$0xff] }
 0x29c   : > { %3784 = vmatmul.msk.bf16.gmra.mxu3 %vm669_vm2, %v4786_v13  ;;  %v4871_v13 = vadd.f32 %v764_v56, %v605_v10  ;;  %v617_v10 = vld [vmem:[#allocation2 + $0x120] sm:$0xff] }
 0x29d   : > { %v4891_v3 = vadd.f32 %v4809_v45, %v617_v10  ;;  %v629_v45 = vld [vmem:[#allocation2 + $0x180] sm:$0xff] }
 0x29e   : > { %v913_v15 = vmax.f32 %v911_v27, %v4871_v13 }
 0x29f   : > { %v771_v6 = vpop.f32.mrf.mxu2  ;;  %v4860_v1 = vpop.f32.mrf.mxu3 }
 0x2a0   : > { %v915_v17 = vmax.f32 %v913_v15, %v4878_v44  ;;  %v4901_v31 = vadd.f32 %v771_v6, %v611_v42  ;;  %v615_v15 = vld [vmem:[#allocation2 + $0x110] sm:$0xff]  ;;  %v4914_v6 = vadd.f32 %v4842_v20, %v629_v45 }
 0x2a1   : > { %v623_v42 = vld [vmem:[#allocation2 + $0x150] sm:$0xff] }
 0x2a2   : > { %v631_v45 = vld [vmem:[#allocation2 + $0x190] sm:$0xff] }
 0x2a7   : > { %v774_v54 = vpop.f32.mrf.mxu2  ;;  %v811_v56 = vpop.f32.mrf.mxu3 }
 0x2a8   : > { %v4888_v51 = vadd.f32 %v774_v54, %v613_v5 }
 0x2aa   : > { %v917_v27 = vmax.f32 %v915_v17, %v4888_v51  ;;  %v916_v17 = vmax.f32 %v914_v40, %v4901_v31 }
 0x2ac   : > { %v919_v5 = vmax.f32 %v917_v27, %v4891_v3  ;;  %3785 = vmatmul.msk.bf16.gmra.mxu3 %vm669_vm2, %v4703_v50  ;;  %v627_v27 = vld [vmem:[#allocation2 + $0x170] sm:$0xff] }
 0x2ad   : > { %v4927_v40 = vadd.f32 %v4835_v43, %v627_v27  ;;  %v641_v27 = vld [vmem:[#allocation2 + $0x1e0] sm:$0xff] }
 0x2ae   : > { %v921_v10 = vmax.f32 %v919_v5, %v4898_v58  ;;  %v4923_v5 = vadd.f32 %v4825_v35, %v623_v42 }
 0x2af   : > { %v776_v19 = vpop.f32.mrf.mxu2  ;;  %v4911_v54 = vpop.f32.mrf.mxu3 }
 0x2b0   : > { %v923_v50 = vmax.f32 %v921_v10, %v4907_v53  ;;  %v777_v48 = vadd.f32 %v776_v19, %v615_v15  ;;  %v4930_v15 = vadd.f32 %v4848_v34, %v633_v61  ;;  %v635_v10 = vld [vmem:[#allocation2 + $0x1b0] sm:$0xff]  ;;  %v4934_v19 = vadd.f32 %v4844_v32, %v631_v45 }
 0x2b1   : > { %v4941_v43 = vadd.f32 %v4850_v41, %v635_v10  ;;  %v4944_v34 = vadd.f32 %v4854_v2, %v637_v57  ;;  %v643_v61 = vld [vmem:[#allocation2 + $0x1f0] sm:$0xff]  ;;  %v4955_v41 = vadd.f32 %v4860_v1, %v641_v27 }
 0x2b2   : > { %v925_v33 = vmax.f32 %v923_v50, %v4914_v6  ;;  %v918_v8 = vmax.f32 %v916_v17, %v777_v48  ;;  %v639_v50 = vld [vmem:[#allocation2 + $0x1d0] sm:$0xff]  ;;  %v4957_v45 = vadd.f32 %v811_v56, %v643_v61 }
 0x2b3   : > { %v4948_v32 = vadd.f32 %v4856_v28, %v639_v50 }
 0x2b4   : > { %v920_v20 = vmax.f32 %v918_v8, %v4919_v25  ;;  %v927_v17 = vmax.f32 %v925_v33, %v4930_v15 }
 0x2b6   : > { %v922_v38 = vmax.f32 %v920_v20, %v4923_v5  ;;  %v929_v33 = vmax.f32 %v927_v17, %v4944_v34 }
 0x2b7   : > { %v4938_v42 = vpop.f32.mrf.mxu3 }
 0x2b8   : > { %v924_v35 = vmax.f32 %v922_v38, %v4927_v40  ;;  %v931_v38 = vmax.f32 %v929_v33, %v4955_v41 }
 0x2ba   : > { %v926_v8 = vmax.f32 %v924_v35, %v4934_v19 }
 0x2bc   : > { %v928_v20 = vmax.f32 %v926_v8, %v4941_v43  ;;  %3786 = vmatmul.msk.bf16.gmra.mxu3 %vm669_vm2, %v4713_v46 }
 0x2be   : > { %v930_v2 = vmax.f32 %v928_v20, %v4948_v32 }
 0x2bf   : > { %v828_v57 = vpop.f32.mrf.mxu3 }
 0x2c0   : > { %v932_v10 = vmax.f32 %v930_v2, %v4957_v45 }
 0x2c2   : > { %v933_v28 = vmax.f32 %v931_v38, %v932_v10 }
 0x2c4   : > { %v934_v35 = vrot.slane %v933_v28, 4 }
 0x2c6   : > { %v935_v17 = vmax.f32 %v933_v28, %v934_v35 }
 0x2c7   : > { %v4962_v49 = vpop.f32.mrf.mxu3 }
 0x2c8   : > { %v936_v50 = vrot.slane %v935_v17, 2 }
 0x2ca   : > { %v937_v8 = vmax.f32 %v935_v17, %v936_v50 }
 0x2cc   : > { %v938_v46 = vrot.slane %v937_v8, 1  ;;  %3787 = vmatmul.msk.bf16.gmra.mxu3 %vm669_vm2, %v4731_v59 }
 0x2ce   : > { %v4966_v1 = vmax.f32 %v937_v8, %v938_v46  ;;  %v586_v46 = vld [vmem:[#allocation2 + $0x28] sm:$0xff] }
 0x2cf   : > { %v833_v20 = vpop.f32.mrf.mxu3 }
 0x2d0   : > { %v1011_v56 = vsub.f32 %v777_v48, %v4966_v1  ;;  %v985_v27 = vsub.f32 %v4821_v30, %v4966_v1  ;;  %v989_v61 = vsub.f32 %v4828_v39, %v4966_v1  ;;  %v993_v33 = vsub.f32 %v4837_v37, %v4966_v1  ;;  %v582_v30 = vld [vmem:[#allocation2 + $0x8] sm:$0xff] }
 0x2d1   : > { %v1009_v2 = vsub.f32 %v4888_v51, %v4966_v1  ;;  %v1013_v59 = vsub.f32 %v4891_v3, %v4966_v1  ;;  %v1015_v38 = vsub.f32 %v4919_v25, %v4966_v1  ;;  %v1025_v51 = vsub.f32 %v4914_v6, %v4966_v1 }
 0x2d2   : > { %v987_v10 = vsub.f32 %v4869_v12, %v4966_v1  ;;  %v1109_v28 = vmul.f32 1.442695, %v1011_v56  ;;  %v991_v35 = vsub.f32 %v4875_v62, %v4966_v1  ;;  %v1057_v17 = vmul.f32 1.442695, %v985_v27  ;;  %v590_v56 = vld [vmem:[#allocation2 + $0x48] sm:$0xff] }
 0x2d3   : > { %v995_v50 = vsub.f32 %v4881_v18, %v4966_v1  ;;  %v997_v37 = vsub.f32 %v4864_v9, %v4966_v1  ;;  %v1065_v48 = vmul.f32 1.442695, %v989_v61  ;;  %v999_v12 = vsub.f32 %v4885_v55, %v4966_v1 }
 0x2d4   : > { %v1061_v8 = vmul.f32 1.442695, %v987_v10  ;;  %3952 = vpow2.f32 %v1109_v28  ;;  %v1069_v62 = vmul.f32 1.442695, %v991_v35  ;;  %v1001_v18 = vsub.f32 %v4871_v13, %v4966_v1 }
 0x2d5   : > { %v1073_v27 = vmul.f32 1.442695, %v993_v33  ;;  %3954 = vpow2.f32 %v1057_v17  ;;  %v5005_v10 = vadd.f32 %v828_v57, %v586_v46  ;;  %v1003_v9 = vsub.f32 %v4894_v0, %v4966_v1 }
 0x2d6   : > { %v5010_v61 = vadd.f32 %v4911_v54, %v582_v30  ;;  %3956 = vpow2.f32 %v1061_v8  ;;  %v1005_v55 = vsub.f32 %v4878_v44, %v4966_v1  ;;  %v1081_v28 = vmul.f32 1.442695, %v997_v37  ;;  %v588_v54 = vld [vmem:[#allocation2 + $0x38] sm:$0xff]  ;;  %v594_v30 = vld [vmem:[#allocation2 + $0x68] sm:$0xff] }
 0x2d7   : > { %v835_v39 = vpop.f32.mrf.mxu3  ;;  %3958 = vpow2.f32 %v1065_v48  ;;  %v5014_v35 = vadd.f32 %v833_v20, %v590_v56  ;;  %v1007_v13 = vsub.f32 %v4901_v31, %v4966_v1  ;;  %v1085_v57 = vmul.f32 1.442695, %v999_v12  ;;  %v584_v37 = vld [vmem:[#allocation2 + $0x18] sm:$0xff] }
 0x2d8   : > { %3960 = vpow2.f32 %v1069_v62  ;;  %v1089_v33 = vmul.f32 1.442695, %v1001_v18  ;;  %v940_v0 = vmax.f32 %v5010_v61, %v5005_v10  ;;  %v1097_v20 = vmul.f32 1.442695, %v1005_v55  ;;  %v592_v56 = vld [vmem:[#allocation2 + $0x58] sm:$0xff] }
 0x2d9   : > { %3962 = vpow2.f32 %v1073_v27  ;;  %v1101_v12 = vmul.f32 1.442695, %v1007_v13  ;;  %v5032_v62 = vadd.f32 %v4962_v49, %v588_v54  ;;  %v1105_v27 = vmul.f32 1.442695, %v1009_v2 }
 0x2da   : > { %v5020_v17 = vpop.eup %3952  ;;  %v5025_v31 = vmax.f32 %v940_v0, %v5014_v35  ;;  %v5046_v49 = vadd.f32 %v4938_v42, %v584_v37  ;;  %v1117_v2 = vmul.f32 1.442695, %v1015_v38  ;;  %v7412_v42 = vsub.f32 %v4898_v58, %v4966_v1  ;;  %v596_v38 = vld [vmem:[#allocation2 + $0x78] sm:$0xff] }
 0x2db   : > { %v5022_v48 = vpop.eup %3954  ;;  %v1027_v54 = vsub.f32 %v4934_v19, %v4966_v1 }
 0x2dc   : > { %3788 = vmatmul.msk.bf16.gmra.mxu3 %vm669_vm2, %v4743_v63  ;;  %v1077_v63 = vmul.f32 1.442695, %v995_v50  ;;  %v1093_v50 = vmul.f32 1.442695, %v1003_v9  ;;  %v5029_v46 = vpop.eup %3956  ;;  %v1121_v0 = vmul.f32 1.442695, %v7412_v42  ;;  %v941_v25 = vmax.f32 %v5046_v49, %v5032_v62 }
 0x2dd   : > { %v5034_v18 = vpop.eup %3958 }
 0x2de   : > { %3964 = vpow2.f32 %v1077_v63  ;;  %v1173_v63 = vpack.c.bf16 %v5029_v46, %v5022_v48  ;;  %v5040_v55 = vpop.eup %3960  ;;  %v606_v48 = vld [vmem:[#allocation2 + $0xc8] sm:$0xff] }
 0x2df   : > { %v838_v44 = vpop.f32.mrf.mxu3  ;;  %3966 = vpow2.f32 %v1081_v28  ;;  %v1113_v28 = vmul.f32 1.442695, %v1013_v59  ;;  %v5048_v13 = vpop.eup %3962  ;;  %v1175_v3 = vpack.c.bf16 %v5040_v55, %v5034_v18  ;;  %v341_v18 = vld [vmem:[%s7312_s2 + $0x58] sm:$0xff] }
 0x2e0   : > { %v5027_v8 = vadd.f32 %v838_v44, %v594_v30  ;;  %3968 = vpow2.f32 %v1085_v57  ;;  %v5053_v57 = vadd.f32 %v835_v39, %v592_v56  ;;  %v7413_v30 = vsub.f32 %v4923_v5, %v4966_v1 }
 0x2e1   : > { %3970 = vpow2.f32 %v1089_v33  ;;  %v3921_v33 = vld [vmem:[%s7311_s1 + $0x20] sm:$0xff]  ;;  %v7415_v5 = vsub.f32 %v4927_v40, %v4966_v1 }
 0x2e2   : > { %v944_v9 = vmax.f32 %v5025_v31, %v5027_v8  ;;  %3972 = vpow2.f32 %v1093_v50  ;;  %v1125_v50 = vmul.f32 1.442695, %v7413_v30  ;;  %3753 = vmatmul.msk.bf16.gmra.mxu0 %vm432_vm0, %v3921_v33  ;;  %3759 = vmatmul.msk.bf16.gmra.mxu1 %vm432_vm0, %v3921_v33  ;;  %v1141_v30 = vmul.f32 1.442695, %v1027_v54  ;;  %v598_v54 = vld [vmem:[#allocation2 + $0x88] sm:$0xff] }
 0x2e3   : > { %3974 = vpow2.f32 %v1097_v20  ;;  %v7414_v20 = vsub.f32 %v4907_v53, %v4966_v1  ;;  %v1133_v56 = vmul.f32 1.442695, %v7415_v5  ;;  %v1137_v53 = vmul.f32 1.442695, %v1025_v51  ;;  %v3922_v31 = vld [vmem:[%s7311_s1 + $0x28] sm:$0xff] }
 0x2e4   : > { %v5060_v59 = vpop.eup %3964  ;;  %3976 = vpow2.f32 %v1101_v12 }
 0x2e5   : > { %v5067_v39 = vpop.eup %3966  ;;  %3978 = vpow2.f32 %v1105_v27  ;;  %v1177_v58 = vpack.c.bf16 %v5060_v59, %v5048_v13  ;;  %v1129_v37 = vmul.f32 1.442695, %v7414_v20  ;;  %v5087_v27 = vmax.f32 %v941_v25, %v5053_v57 }
 0x2e6   : > { %v5078_v44 = vpop.eup %3968  ;;  %3980 = vpow2.f32 %v1113_v28  ;;  %v1037_v25 = vsub.f32 %v4955_v41, %v4966_v1  ;;  %v1035_v41 = vsub.f32 %v4948_v32, %v4966_v1  ;;  %v1029_v32 = vsub.f32 %v4930_v15, %v4966_v1 }
 0x2e7   : > { %v840_v19 = vpop.f32.mrf.mxu3  ;;  %v3971_v12 = vpop.eup %3970  ;;  %3982 = vpow2.f32 %v1117_v2  ;;  %v983_v15 = vsub.f32 %v4862_v60, %v4966_v1  ;;  %v977_v60 = vsub.f32 %v4819_v52, %v4966_v1 }
 0x2e8   : > { %v5089_v33 = vadd.f32 %v840_v19, %v596_v38  ;;  %v3973_v42 = vpop.eup %3972  ;;  %3984 = vpow2.f32 %v1121_v0  ;;  %v1033_v0 = vsub.f32 %v4944_v34, %v4966_v1  ;;  %v1157_v5 = vmul.f32 1.442695, %v1035_v41 }
 0x2e9   : > { %v3975_v28 = vpop.eup %3974  ;;  %3986 = vpow2.f32 %v1125_v50  ;;  %v1031_v50 = vsub.f32 %v4941_v43, %v4966_v1  ;;  %v1179_v43 = vpack.c.bf16 %v5078_v44, %v5067_v39 }
 0x2ea   : > { %v3977_v2 = vpop.eup %3976  ;;  %3988 = vpow2.f32 %v1129_v37  ;;  %v1161_v37 = vmul.f32 1.442695, %v1037_v25 }
 0x2eb   : > { %v5100_v38 = vpop.eup %3978  ;;  %3990 = vpow2.f32 %v1133_v56  ;;  %v1183_v6 = vpack.c.bf16 %v3977_v2, %v3975_v28  ;;  %v981_v56 = vsub.f32 %v4817_v21, %v4966_v1  ;;  %v1181_v28 = vpack.c.bf16 %v3973_v42, %v3971_v12 }
 0x2ec   : > { %3789 = vmatmul.msk.bf16.gmra.mxu3 %vm669_vm2, %v4758_v4  ;;  %v1039_v4 = vsub.f32 %v4957_v45, %v4966_v1  ;;  %v5104_v51 = vpop.eup %3980  ;;  %3992 = vpow2.f32 %v1137_v53  ;;  %v1149_v41 = vmul.f32 1.442695, %v1031_v50  ;;  %v1041_v50 = vmul.f32 1.442695, %v977_v60 }
 0x2ed   : > { %v5110_v20 = vpop.eup %3982  ;;  %3994 = vpow2.f32 %v1141_v30  ;;  %1203 = vmatpush.bf16.msra.mxu3 %v1183_v6  ;;  %v1153_v30 = vmul.f32 1.442695, %v1033_v0  ;;  %v1049_v0 = vmul.f32 1.442695, %v981_v56  ;;  %v602_v56 = vld [vmem:[#allocation2 + $0xa8] sm:$0xff] }
 0x2ee   : > { %v5114_v45 = vpop.eup %3984  ;;  %v1165_v53 = vmul.f32 1.442695, %v1039_v4  ;;  %3996 = vpow2.f32 %v1161_v37  ;;  %v1053_v37 = vmul.f32 1.442695, %v983_v15 }
 0x2ef   : > { %v843_v19 = vpop.f32.mrf.mxu3  ;;  %v5118_v34 = vpop.eup %3986 }
 0x2f0   : > { %v5122_v2 = vadd.f32 %v843_v19, %v598_v54  ;;  %v5124_v40 = vpop.eup %3988  ;;  %v1189_v25 = vpack.c.bf16 %v5118_v34, %v5114_v45  ;;  %3998 = vpow2.f32 %v1165_v53 }
 0x2f1   : > { %v5130_v6 = vpop.eup %3990  ;;  %1204 = vmatpush.bf16.msra.mxu3 %v1181_v28  ;;  %4000 = vpow2.f32 %v1153_v30 }
 0x2f2   : > { %v5138_v21 = vmax.f32 %v944_v9, %v5122_v2  ;;  %v3993_v12 = vpop.eup %3992  ;;  %v1191_v42 = vpack.c.bf16 %v5130_v6, %v5124_v40  ;;  %v1145_v9 = vmul.f32 1.442695, %v1029_v32  ;;  %4002 = vpow2.f32 %v1157_v5  ;;  %3754 = vmatmul.msk.bf16.gmra.mxu0 %vm432_vm0, %v3922_v31  ;;  %3760 = vmatmul.msk.bf16.gmra.mxu1 %vm432_vm0, %v3922_v31  ;;  %v610_v31 = vld [vmem:[#allocation2 + $0xe8] sm:$0xff] }
 0x2f3   : > { %v3995_v4 = vpop.eup %3994  ;;  %v979_v40 = vsub.f32 %v4867_v16, %v4966_v1  ;;  %4004 = vpow2.f32 %v1049_v0 }
 0x2f4   : > { %v1193_v54 = vpack.c.bf16 %v3995_v4, %v3993_v12  ;;  %v3997_v44 = vpop.eup %3996  ;;  %4006 = vpow2.f32 %v1145_v9 }
 0x2f5   : > { %1205 = vmatpush.bf16.msra.mxu3 %v1179_v43  ;;  %4008 = vpow2.f32 %v1149_v41  ;;  %v1045_v16 = vmul.f32 1.442695, %v979_v40  ;;  %v7417_v43 = vpack.c.bf16 %v5020_v17, %v5100_v38  ;;  %v618_v40 = vld [vmem:[#allocation2 + $0x128] sm:$0xff] }
 0x2f6   : > { %v3999_v52 = vpop.eup %3998  ;;  %4010 = vpow2.f32 %v1053_v37 }
 0x2f7   : > { %v5155_v39 = vpop.f32.mrf.mxu3  ;;  %v4001_v19 = vpop.eup %4000  ;;  %v1199_v1 = vpack.c.bf16 %v3999_v52, %v3997_v44  ;;  %4012 = vpow2.f32 %v1041_v50  ;;  %v622_v44 = vld [vmem:[#allocation2 + $0x148] sm:$0xff] }
 0x2f8   : > { %v4003_v5 = vpop.eup %4002  ;;  %4014 = vpow2.f32 %v1045_v16 }
 0x2f9   : > { %1206 = vmatpush.bf16.msra.mxu3 %v1177_v58  ;;  %1217 = vmatpush.bf16.msrb.mxu1 %v1199_v1  ;;  %v4005_v53 = vpop.eup %4004  ;;  %v1197_v28 = vpack.c.bf16 %v4003_v5, %v4001_v19  ;;  %v626_v1 = vld [vmem:[#allocation2 + $0x168] sm:$0xff] }
 0x2fc   : > { %3790 = vmatmul.msk.bf16.gmra.mxu3 %vm669_vm2, %v4768_v7  ;;  %v4007_v7 = vpop.eup %4006 }
 0x2fd   : > { %1207 = vmatpush.bf16.msra.mxu3 %v1175_v3  ;;  %v4009_v30 = vpop.eup %4008  ;;  %1218 = vmatpush.bf16.msrb.mxu1 %v1197_v28 }
 0x2fe   : > { %v4011_v59 = vpop.eup %4010  ;;  %v1195_v55 = vpack.c.bf16 %v4009_v30, %v4007_v7 }
 0x2ff   : > { %v848_v32 = vpop.f32.mrf.mxu3  ;;  %v4013_v3 = vpop.eup %4012  ;;  %v1171_v6 = vpack.c.bf16 %v4011_v59, %v4005_v53 }
 0x300   : > { %v5165_v13 = vadd.f32 %v848_v32, %v602_v56  ;;  %v4015_v12 = vpop.eup %4014 }
 0x301   : > { %1208 = vmatpush.bf16.msra.mxu3 %v1173_v63  ;;  %1219 = vmatpush.bf16.msrb.mxu1 %v1195_v55  ;;  %v1169_v4 = vpack.c.bf16 %v4015_v12, %v4013_v3  ;;  %v340_v63 = vld [vmem:[%s7312_s2 + $0x50] sm:$0xff] }
 0x302   : > { %v948_v58 = vmax.f32 %v5138_v21, %v5165_v13 }
 0x305   : > { %1209 = vmatpush.bf16.msra.mxu3 %v1171_v6  ;;  %1220 = vmatpush.bf16.msrb.mxu1 %v1193_v54 }
 0x307   : > { %v850_v15 = vpop.f32.mrf.mxu3 }
 0x309   : > { %399 = vperm.xlu1 %3949, %v341_v18   ;;  %1210 = vmatpush.bf16.msra.mxu3 %v1169_v4  ;;  %v600_v4 = vld [vmem:[#allocation2 + $0x98] sm:$0xff] }
 0x30a   : > { %1221 = vmatpush.bf16.msrb.mxu1 %v1191_v42 }
 0x30c   : > { %3791 = vmatmul.msk.bf16.gmra.mxu3 %vm669_vm2, %v4780_v11  ;;  %v7416_v11 = vpack.c.bf16 %v5110_v20, %v5104_v51  ;;  %v614_v51 = vld [vmem:[#allocation2 + $0x108] sm:$0xff] }
 0x30e   : > { %1222 = vmatpush.bf16.msrb.mxu1 %v1189_v25 }
 0x30f   : > { %v853_v46 = vpop.f32.mrf.mxu3 }
 0x310   : > { %v5180_v21 = vadd.f32 %v853_v46, %v606_v48  ;;  %v604_v48 = vld [vmem:[#allocation2 + $0xb8] sm:$0xff] }
 0x312   : > { %v950_v0 = vmax.f32 %v948_v58, %v5180_v21  ;;  %1223 = vmatpush.bf16.msrb.mxu1 %v7416_v11  ;;  %v612_v11 = vld [vmem:[#allocation2 + $0xf8] sm:$0xff] }
 0x316   : > { %394 = vperm.xlu0 %3948, %v340_v63   ;;  %1224 = vmatpush.bf16.msrb.mxu1 %v7417_v43  ;;  %v608_v63 = vld [vmem:[#allocation2 + $0xd8] sm:$0xff]  ;;  %v7418_v43 = vmax.f32 %v5087_v27, %v5089_v33 }
 0x317   : > { %v855_v42 = vpop.f32.mrf.mxu3  ;;  %v628_v27 = vld [vmem:[#allocation2 + $0x178] sm:$0xff] }
 0x31c   : > { %3792 = vmatmul.msk.bf16.gmra.mxu3 %vm669_vm2, %v4790_v14 }
 0x31f   : > { %v858_v9 = vpop.f32.mrf.mxu3 }
 0x320   : > { %v5194_v54 = vadd.f32 %v858_v9, %v610_v31  ;;  %v5230_v9 = vadd.f32 %v855_v42, %v608_v63  ;;  %v638_v63 = vld [vmem:[#allocation2 + $0x1c8] sm:$0xff] }
 0x322   : > { %v952_v45 = vmax.f32 %v950_v0, %v5194_v54  ;;  %v5224_v0 = vadd.f32 %v850_v15, %v604_v48  ;;  %v624_v15 = vld [vmem:[#allocation2 + $0x158] sm:$0xff] }
 0x327   : > { %v860_v34 = vpop.f32.mrf.mxu3 }
 0x32f   : > { %v863_v25 = vpop.f32.mrf.mxu3 }
 0x330   : > { %v5197_v37 = vadd.f32 %v863_v25, %v614_v51  ;;  %v620_v51 = vld [vmem:[#allocation2 + $0x138] sm:$0xff] }
 0x332   : > { %v954_v17 = vmax.f32 %v952_v45, %v5197_v37  ;;  %v616_v45 = vld [vmem:[#allocation2 + $0x118] sm:$0xff] }
 0x337   : > { %v865_v60 = vpop.f32.mrf.mxu3 }
 0x33f   : > { %v868_v41 = vpop.f32.mrf.mxu3 }
 0x340   : > { %v5199_v14 = vadd.f32 %v868_v41, %v618_v40  ;;  %v5233_v41 = vadd.f32 %v860_v34, %v612_v11  ;;  %v640_v11 = vld [vmem:[#allocation2 + $0x1d8] sm:$0xff] }
 0x342   : > { %v956_v52 = vmax.f32 %v954_v17, %v5199_v14 }
 0x347   : > { %v870_v20 = vpop.f32.mrf.mxu3 }
 0x34f   : > { %v873_v38 = vpop.f32.mrf.mxu3 }
 0x350   : > { %v5203_v50 = vadd.f32 %v873_v38, %v622_v44  ;;  %v5236_v44 = vadd.f32 %v865_v60, %v616_v45  ;;  %v5239_v38 = vadd.f32 %v870_v20, %v620_v51  ;;  %v642_v45 = vld [vmem:[#allocation2 + $0x1e8] sm:$0xff] }
 0x352   : > { %v958_v19 = vmax.f32 %v956_v52, %v5203_v50 }
 0x357   : > { %v875_v16 = vpop.f32.mrf.mxu3 }
 0x358   : > { %v5242_v52 = vadd.f32 %v875_v16, %v624_v15 }
 0x35f   : > { %v878_v5 = vpop.f32.mrf.mxu3  ;;  %v528_v7 = vpop.f32.mrf.mxu0 }
 0x360   : > { %v5206_v56 = vadd.f32 %v878_v5, %v626_v1  ;;  %v567_v28 = vpop.f32.mrf.mxu1  ;;  %v5210_v32 = vadd.f32 %v528_v7, %v4683_v26  ;;  %v632_v1 = vld [vmem:[#allocation2 + $0x198] sm:$0xff]  ;;  %v634_v7 = vld [vmem:[#allocation2 + $0x1a8] sm:$0xff] }
 0x361   : > { %v5213_v30 = vadd.f32 %v567_v28, %v4683_v26  ;;  %v5222_v26 = vadd.f32 %v5155_v39, %v600_v4  ;;  %v636_v28 = vld [vmem:[#allocation2 + $0x1b8] sm:$0xff] }
 0x362   : > { %v960_v53 = vmax.f32 %v958_v19, %v5206_v56  ;;  %v1201_v59 = vpack.c.bf16 1.0, %v5210_v32  ;;  %v630_v19 = vld [vmem:[#allocation2 + $0x188] sm:$0xff] }
 0x363   : > { %v1202_v58 = vpack.c.bf16 1.0, %v5213_v30  ;;  %v947_v31 = vmax.f32 %v7418_v43, %v5222_v26 }
 0x364   : > { %1211 = vmatmul.bf16.vlgmr.msra.gmra.mxu3 %v1201_v59 }
 0x365   : > { %1225 = vmatmul.bf16.vlgmr.msrb.gmra.mxu1 %v1202_v58  ;;  %v949_v25 = vmax.f32 %v947_v31, %v5224_v0 }
 0x367   : > { %v880_v18 = vpop.f32.mrf.mxu3  ;;  %v951_v39 = vmax.f32 %v949_v25, %v5230_v9 }
 0x368   : > { %v5245_v5 = vadd.f32 %v880_v18, %v628_v27 }
 0x369   : > { %v953_v17 = vmax.f32 %v951_v39, %v5233_v41 }
 0x36b   : > { %v955_v42 = vmax.f32 %v953_v17, %v5236_v44 }
 0x36d   : > { %v957_v34 = vmax.f32 %v955_v42, %v5239_v38 }
 0x36f   : > { %v883_v55 = vpop.f32.mrf.mxu3  ;;  %v959_v4 = vmax.f32 %v957_v34, %v5242_v52 }
 0x370   : > { %v5248_v48 = vadd.f32 %v883_v55, %v630_v19  ;;  %v644_v55 = vld [vmem:[#allocation2 + $0x1f8] sm:$0xff] }
 0x371   : > { %v961_v16 = vmax.f32 %v959_v4, %v5245_v5 }
 0x372   : > { %v962_v18 = vmax.f32 %v960_v53, %v5248_v48 }
 0x377   : > { %v885_v3 = vpop.f32.mrf.mxu3 }
 0x378   : > { %v5250_v20 = vadd.f32 %v885_v3, %v632_v1 }
 0x37a   : > { %v963_v25 = vmax.f32 %v961_v16, %v5250_v20 }
 0x37f   : > { %v888_v6 = vpop.f32.mrf.mxu3 }
 0x380   : > { %v5253_v43 = vadd.f32 %v888_v6, %v634_v7 }
 0x382   : > { %v964_v3 = vmax.f32 %v962_v18, %v5253_v43 }
 0x387   : > { %v890_v12 = vpop.f32.mrf.mxu3 }
 0x388   : > { %v5255_v31 = vadd.f32 %v890_v12, %v636_v28 }
 0x38a   : > { %v965_v15 = vmax.f32 %v963_v25, %v5255_v31 }
 0x38f   : > { %v893_v46 = vpop.f32.mrf.mxu3 }
 0x390   : > { %v5259_v51 = vadd.f32 %v893_v46, %v638_v63 }
 0x392   : > { %v966_v12 = vmax.f32 %v964_v3, %v5259_v51 }
 0x397   : > { %v895_v40 = vpop.f32.mrf.mxu3 }
 0x398   : > { %v5261_v39 = vadd.f32 %v895_v40, %v640_v11 }
 0x39a   : > { %v967_v27 = vmax.f32 %v965_v15, %v5261_v39 }
 0x39f   : > { %v898_v60 = vpop.f32.mrf.mxu3 }
 0x3a0   : > { %v5265_v17 = vadd.f32 %v898_v60, %v642_v45 }
 0x3a2   : > { %v968_v53 = vmax.f32 %v966_v12, %v5265_v17 }
 0x3a7   : > { %v900_v6 = vpop.f32.mrf.mxu3 }
 0x3a8   : > { %v5269_v42 = vadd.f32 %v900_v6, %v644_v55 }
 0x3aa   : > { %v969_v46 = vmax.f32 %v967_v27, %v5269_v42 }
 0x3ac   : > { %v970_v40 = vmax.f32 %v968_v53, %v969_v46 }
 0x3ae   : > { %v971_v19 = vrot.slane %v970_v40, 4 }
 0x3b0   : > { %v972_v1 = vmax.f32 %v970_v40, %v971_v19 }
 0x3b2   : > { %v973_v34 = vrot.slane %v972_v1, 2 }
 0x3b4   : > { %v974_v7 = vmax.f32 %v972_v1, %v973_v34 }
 0x3b6   : > { %v975_v28 = vrot.slane %v974_v7, 1 }
 0x3b8   : > { %v5273_v4 = vmax.f32 %v974_v7, %v975_v28 }
 0x3ba   : > { %v986_v60 = vsub.f32 %v5014_v35, %v5273_v4  ;;  %v988_v63 = vsub.f32 %v5053_v57, %v5273_v4  ;;  %v990_v11 = vsub.f32 %v5027_v8, %v5273_v4  ;;  %v992_v16 = vsub.f32 %v5089_v33, %v5273_v4 }
 0x3bb   : > { %v994_v45 = vsub.f32 %v5122_v2, %v5273_v4  ;;  %v998_v18 = vsub.f32 %v5165_v13, %v5273_v4  ;;  %v1002_v25 = vsub.f32 %v5180_v21, %v5273_v4  ;;  %v1006_v35 = vsub.f32 %v5194_v54, %v5273_v4 }
 0x3bc   : > { %v1018_v57 = vsub.f32 %v5203_v50, %v5273_v4  ;;  %v1022_v8 = vsub.f32 %v5206_v56, %v5273_v4  ;;  %v1059_v55 = vmul.f32 1.442695, %v986_v60  ;;  %v996_v33 = vsub.f32 %v5222_v26, %v5273_v4 }
 0x3bd   : > { %v1063_v2 = vmul.f32 1.442695, %v988_v63  ;;  %v1067_v3 = vmul.f32 1.442695, %v990_v11  ;;  %v1000_v13 = vsub.f32 %v5224_v0, %v5273_v4  ;;  %v1071_v15 = vmul.f32 1.442695, %v992_v16 }
 0x3be   : > { %4016 = vpow2.f32 %v1059_v55  ;;  %v1075_v21 = vmul.f32 1.442695, %v994_v45  ;;  %v1004_v54 = vsub.f32 %v5230_v9, %v5273_v4  ;;  %v1079_v50 = vmul.f32 1.442695, %v996_v33 }
 0x3bf   : > { %4018 = vpow2.f32 %v1063_v2  ;;  %v1083_v6 = vmul.f32 1.442695, %v998_v18  ;;  %v1008_v56 = vsub.f32 %v5233_v41, %v5273_v4  ;;  %v1087_v26 = vmul.f32 1.442695, %v1000_v13 }
 0x3c0   : > { %4020 = vpow2.f32 %v1067_v3  ;;  %v1091_v12 = vmul.f32 1.442695, %v1002_v25  ;;  %v1095_v27 = vmul.f32 1.442695, %v1004_v54  ;;  %v1099_v53 = vmul.f32 1.442695, %v1006_v35 }
 0x3c1   : > { %4022 = vpow2.f32 %v1071_v15  ;;  %v1103_v9 = vmul.f32 1.442695, %v1008_v56  ;;  %v1020_v1 = vsub.f32 %v5242_v52, %v5273_v4  ;;  %v1024_v60 = vsub.f32 %v5245_v5, %v5273_v4 }
 0x3c2   : > { %4024 = vpow2.f32 %v1075_v21  ;;  %v1123_v11 = vmul.f32 1.442695, %v1018_v57  ;;  %v1131_v52 = vmul.f32 1.442695, %v1022_v8  ;;  %v1040_v3 = vsub.f32 %v5269_v42, %v5273_v4 }
 0x3c3   : > { %4026 = vpow2.f32 %v1079_v50  ;;  %v1127_v18 = vmul.f32 1.442695, %v1020_v1  ;;  %v1135_v33 = vmul.f32 1.442695, %v1024_v60  ;;  %v1038_v5 = vsub.f32 %v5265_v17, %v5273_v4 }
 0x3c4   : > { %v5303_v0 = vpop.eup %4016  ;;  %4028 = vpow2.f32 %v1083_v6  ;;  %v1034_v21 = vsub.f32 %v5259_v51, %v5273_v4  ;;  %v1167_v8 = vmul.f32 1.442695, %v1040_v3  ;;  %v1036_v54 = vsub.f32 %v5261_v39, %v5273_v4  ;;  %v1368_v3 = vpop.trf.xlu0 }
 0x3c5   : > { %v5305_v46 = vpop.eup %4018  ;;  %4030 = vpow2.f32 %v1087_v26  ;;  %v982_v42 = vsub.f32 %v5005_v10, %v5273_v4  ;;  %v1163_v6 = vmul.f32 1.442695, %v1038_v5  ;;  %v1030_v17 = vsub.f32 %v5253_v43, %v5273_v4 }
 0x3c6   : > { %v5307_v40 = vpop.eup %4020  ;;  %4032 = vpow2.f32 %v1091_v12  ;;  %v1174_v41 = vpack.c.bf16 %v5305_v46, %v5303_v0  ;;  %v1155_v26 = vmul.f32 1.442695, %v1034_v21  ;;  %v1032_v51 = vsub.f32 %v5255_v31, %v5273_v4 }
 0x3c7   : > { %v5311_v19 = vpop.eup %4022  ;;  %4034 = vpow2.f32 %v1095_v27  ;;  %v1159_v39 = vmul.f32 1.442695, %v1036_v54  ;;  %v984_v10 = vsub.f32 %v5032_v62, %v5273_v4  ;;  %v978_v43 = vsub.f32 %v5010_v61, %v5273_v4 }
 0x3c8   : > { %v5315_v34 = vpop.eup %4024  ;;  %4036 = vpow2.f32 %v1099_v53  ;;  %v1176_v7 = vpack.c.bf16 %v5311_v19, %v5307_v40  ;;  %v1026_v31 = vsub.f32 %v5248_v48, %v5273_v4  ;;  %v1151_v60 = vmul.f32 1.442695, %v1032_v51 }
 0x3c9   : > { %v4027_v28 = vpop.eup %4026  ;;  %4038 = vpow2.f32 %v1103_v9  ;;  %v1051_v9 = vmul.f32 1.442695, %v982_v42  ;;  %v980_v62 = vsub.f32 %v5046_v49, %v5273_v4  ;;  %v1055_v61 = vmul.f32 1.442695, %v984_v10 }
 0x3ca   : > { %v4029_v63 = vpop.eup %4028  ;;  %v1178_v16 = vpack.c.bf16 %v4027_v28, %v5315_v34  ;;  %4040 = vpow2.f32 %v1123_v11  ;;  %v1147_v34 = vmul.f32 1.442695, %v1030_v17  ;;  %v1028_v28 = vsub.f32 %v5250_v20, %v5273_v4 }
 0x3cb   : > { %v4031_v45 = vpop.eup %4030  ;;  %4042 = vpow2.f32 %v1127_v18  ;;  %v1043_v11 = vmul.f32 1.442695, %v978_v43  ;;  %v511_v5 = vadd.f32 %v4675_v22, %v4689_v29  ;;  %v1012_v22 = vsub.f32 %v5236_v44, %v5273_v4 }
 0x3cc   : > { %v4033_v25 = vpop.eup %4032  ;;  %v1180_v35 = vpack.c.bf16 %v4031_v45, %v4029_v63  ;;  %4044 = vpow2.f32 %v1131_v52  ;;  %v1139_v45 = vmul.f32 1.442695, %v1026_v31  ;;  %v1047_v52 = vmul.f32 1.442695, %v980_v62  ;;  %v5374_v46 = vpop.trf.xlu0 }
 0x3cd   : > { %v4035_v55 = vpop.eup %4034  ;;  %4046 = vpow2.f32 %v1135_v33  ;;  %v1291_v42 = vpack.c.bf16 %v511_v5, %v511_v5  ;;  %v5411_v31 = vpop.f32.mrf.mxu0 }
 0x3ce   : > { %v4037_v2 = vpop.eup %4036  ;;  %v1182_v13 = vpack.c.bf16 %v4035_v55, %v4033_v25  ;;  %4048 = vpow2.f32 %v1167_v8  ;;  %v1143_v25 = vmul.f32 1.442695, %v1028_v28  ;;  %7420 = vst [vmem:[#allocation28_spill] sm:$0xff] %v5411_v31 }
 0x3cf   : > { %v4039_v15 = vpop.eup %4038  ;;  %4050 = vpow2.f32 %v1163_v6 }
 0x3d0   : > { %v1184_v57 = vpack.c.bf16 %v4039_v15, %v4037_v2  ;;  %v5330_v50 = vpop.eup %4040  ;;  %4052 = vpow2.f32 %v1155_v26  ;;  %v550_v26 = vadd.f32 %v4677_v23, %v4689_v29 }
 0x3d1   : > { %v5334_v56 = vpop.eup %4042  ;;  %4054 = vpow2.f32 %v1159_v39 }
 0x3d2   : > { %1231 = vmatpush.bf16.msrb.mxu0 %v1184_v57  ;;  %v5338_v12 = vpop.eup %4044  ;;  %v1190_v27 = vpack.c.bf16 %v5334_v56, %v5330_v50  ;;  %4056 = vpow2.f32 %v1051_v9  ;;  %v1016_v57 = vsub.f32 %v5239_v38, %v5273_v4  ;;  %v1292_v9 = vpack.c.bf16 %v550_v26, %v550_v26 }
 0x3d3   : > { %v5344_v53 = vpop.eup %4046  ;;  %4058 = vpow2.f32 %v1147_v34 }
 0x3d4   : > { %v1192_v1 = vpack.c.bf16 %v5344_v53, %v5338_v12  ;;  %v4049_v63 = vpop.eup %4048  ;;  %4060 = vpow2.f32 %v1151_v60  ;;  %v1119_v6 = vmul.f32 1.442695, %v1016_v57  ;;  %v1370_v43 = vpop.trf.xlu0  ;;  %v1436_v32 = vsel %vm718_vm1, %v1292_v9, 0 }
 0x3d5   : > { %v4051_v18 = vpop.eup %4050  ;;  %4062 = vpow2.f32 %v1055_v61  ;;  %v5405_v53 = vpop.f32.mrf.mxu1 }
 0x3d6   : > { %1232 = vmatpush.bf16.msrb.mxu0 %v1182_v13  ;;  %v4053_v48 = vpop.eup %4052  ;;  %v1200_v20 = vpack.c.bf16 %v4049_v63, %v4051_v18  ;;  %4064 = vpow2.f32 %v1043_v11  ;;  %v1014_v13 = vsub.f32 %v5199_v14, %v5273_v4  ;;  %v1010_v14 = vsub.f32 %v5197_v37, %v5273_v4  ;;  %7419 = vst [vmem:[#allocation27_spill] sm:$0xff] %v5405_v53  ;;  %v5415_v60 = vpop.f32.mrf.mxu0 }
 0x3d7   : > { %v4055_v55 = vpop.eup %4054  ;;  %4066 = vpow2.f32 %v1139_v45  ;;  %v1433_v37 = vsel %vm718_vm1, %v1291_v42, 0  ;;  %7422 = vst [vmem:[#allocation30_spill] sm:$0xff] %v5415_v60 }
 0x3d8   : > { %1245 = vmatpush.bf16.msra.mxu1 %v1200_v20  ;;  %4068 = vpow2.f32 %v1143_v25  ;;  %v1198_v33 = vpack.c.bf16 %v4055_v55, %v4053_v48  ;;  %v1115_v54 = vmul.f32 1.442695, %v1014_v13  ;;  %v1107_v0 = vmul.f32 1.442695, %v1010_v14  ;;  %v1296_v14 = vld [vmem:[#allocation2 + $0x200] sm:$0xff] }
 0x3d9   : > { %4070 = vpow2.f32 %v1047_v52 }
 0x3da   : > { %1233 = vmatpush.bf16.msrb.mxu0 %v1180_v35  ;;  %v4057_v35 = vpop.eup %4056  ;;  %4072 = vpow2.f32 %v1115_v54  ;;  %v1304_v54 = vld [vmem:[#allocation2 + $0x240] sm:$0xff] }
 0x3db   : > { %v4059_v49 = vpop.eup %4058  ;;  %4074 = vpow2.f32 %v1119_v6 }
 0x3dc   : > { %v4061_v2 = vpop.eup %4060  ;;  %1246 = vmatpush.bf16.msra.mxu1 %v1198_v33  ;;  %4076 = vpow2.f32 %v1107_v0  ;;  %v1371_v23 = vpop.trf.xlu0 }
 0x3dd   : > { %v1196_v19 = vpack.c.bf16 %v4061_v2, %v4059_v49  ;;  %v5413_v34 = vpop.f32.mrf.mxu1 }
 0x3de   : > { %1234 = vmatpush.bf16.msrb.mxu0 %v1178_v16  ;;  %v4063_v16 = vpop.eup %4062  ;;  %7421 = vst [vmem:[#allocation29_spill] sm:$0xff] %v5413_v34  ;;  %v5423_v63 = vpop.f32.mrf.mxu0 }
 0x3df   : > { %v4065_v15 = vpop.eup %4064  ;;  %v1172_v21 = vpack.c.bf16 %v4063_v16, %v4057_v35  ;;  %7424 = vst [vmem:[#allocation32_spill] sm:$0xff] %v5423_v63 }
 0x3e0   : > { %v4067_v40 = vpop.eup %4066  ;;  %1247 = vmatpush.bf16.msra.mxu1 %v1196_v19 }
 0x3e2   : > { %1235 = vmatpush.bf16.msrb.mxu0 %v1176_v7  ;;  %v4069_v7 = vpop.eup %4068 }
 0x3e3   : > { %v4071_v8 = vpop.eup %4070  ;;  %v1194_v38 = vpack.c.bf16 %v4069_v7, %v4067_v40  ;;  %v1300_v7 = vld [vmem:[#allocation2 + $0x220] sm:$0xff] }
 0x3e4   : > { %v1170_v17 = vpack.c.bf16 %v4071_v8, %v4065_v15  ;;  %v4073_v44 = vpop.eup %4072  ;;  %v1372_v29 = vpop.trf.xlu0 }
 0x3e5   : > { %1248 = vmatpush.bf16.msra.mxu1 %v1194_v38  ;;  %v4075_v4 = vpop.eup %4074  ;;  %v5419_v62 = vpop.f32.mrf.mxu1 }
 0x3e6   : > { %1236 = vmatpush.bf16.msrb.mxu0 %v1174_v41  ;;  %v1111_v41 = vmul.f32 1.442695, %v1012_v22  ;;  %v4077_v51 = vpop.eup %4076  ;;  %v1188_v39 = vpack.c.bf16 %v4075_v4, %v4073_v44  ;;  %7423 = vst [vmem:[#allocation31_spill] sm:$0xff] %v5419_v62 }
 0x3e8   : > { %4078 = vpow2.f32 %v1111_v41  ;;  %v1302_v41 = vld [vmem:[#allocation2 + $0x230] sm:$0xff] }
 0x3e9   : > { %1249 = vmatpush.bf16.msra.mxu1 %v1192_v1 }
 0x3ea   : > { %1237 = vmatpush.bf16.msrb.mxu0 %v1172_v21 }
 0x3ed   : > { %1250 = vmatpush.bf16.msra.mxu1 %v1190_v27  ;;  %v5425_v11 = vpop.f32.mrf.mxu1 }
 0x3ee   : > { %1238 = vmatpush.bf16.msrb.mxu0 %v1170_v17  ;;  %v4079_v10 = vpop.eup %4078  ;;  %7425 = vst [vmem:[#allocation33_spill] sm:$0xff] %v5425_v11  ;;  %v1308_v17 = vld [vmem:[#allocation2 + $0x260] sm:$0xff] }
 0x3ef   : > { %v1186_v12 = vpack.c.bf16 %v4079_v10, %v4077_v51  ;;  %v1298_v51 = vld [vmem:[#allocation2 + $0x210] sm:$0xff] }
 0x3f1   : > { %1239 = vmatmul.bf16.vlgmr.msrb.gmra.mxu0 %v1201_v59  ;;  %1251 = vmatpush.bf16.msra.mxu1 %v1188_v39  ;;  %v5393_v59 = vpop.trf.xlu0  ;;  %v1306_v39 = vld [vmem:[#allocation2 + $0x250] sm:$0xff] }
 0x3f2   : > { %1445 = vmatpush.bf16.msra.mxu0 %v1433_v37 }
 0x3f5   : > { %1252 = vmatpush.bf16.msra.mxu1 %v1186_v12  ;;  %v5429_v25 = vpop.f32.mrf.mxu1 }
 0x3f6   : > { %7426 = vst [vmem:[#allocation34_spill] sm:$0xff] %v5429_v25  ;;  %v1314_v25 = vld [vmem:[#allocation2 + $0x290] sm:$0xff] }
 0x3f8   : > { %1253 = vmatmul.bf16.vlgmr.msra.gmra.mxu1 %v1202_v58 }
 0x3f9   : > { %1534 = vmatpush.bf16.msrb.mxu1 %v1436_v32  ;;  %v1374_v50 = vpop.trf.xlu0  ;;  %v1313_v32 = vld [vmem:[#allocation2 + $0x288] sm:$0xff] }
 0x401   : > { %3793 = vmatmul.msk.bf16.vlgmr.msra.gmra.mxu0 %vm669_vm2, %v1368_v3  ;;  %v5397_v56 = vpop.trf.xlu0 }
 0x408   : > { %3809 = vmatmul.msk.bf16.vlgmr.msrb.gmra.mxu1 %vm669_vm2, %v1368_v3 }
 0x409   : > { %v1376_v30 = vpop.trf.xlu0 }
 0x411   : > { %3794 = vmatmul.msk.bf16.gmra.mxu0 %vm669_vm2, %v1370_v43  ;;  %v5401_v58 = vpop.trf.xlu0 }
 0x418   : > { %3810 = vmatmul.msk.bf16.gmra.mxu1 %vm669_vm2, %v1370_v43 }
 0x419   : > { %v1378_v27 = vpop.trf.xlu0 }
 0x421   : > { %3795 = vmatmul.msk.bf16.gmra.mxu0 %vm669_vm2, %v1372_v29  ;;  %v5409_v1 = vpop.trf.xlu0 }
 0x428   : > { %3811 = vmatmul.msk.bf16.gmra.mxu1 %vm669_vm2, %v1372_v29 }
 0x429   : > { %v1380_v28 = vpop.trf.xlu0 }
 0x431   : > { %3796 = vmatmul.msk.bf16.gmra.mxu0 %vm669_vm2, %v1374_v50  ;;  %v5421_v61 = vpop.trf.xlu0 }
 0x438   : > { %3812 = vmatmul.msk.bf16.gmra.mxu1 %vm669_vm2, %v1374_v50  ;;  %v1310_v50 = vld [vmem:[#allocation2 + $0x270] sm:$0xff] }
 0x439   : > { %v1382_v18 = vpop.trf.xlu0 }
 0x441   : > { %3797 = vmatmul.msk.bf16.gmra.mxu0 %vm669_vm2, %v1376_v30 }
 0x448   : > { %3813 = vmatmul.msk.bf16.gmra.mxu1 %vm669_vm2, %v1376_v30 }
 0x451   : > { %3798 = vmatmul.msk.bf16.gmra.mxu0 %vm669_vm2, %v1378_v27 }
 0x458   : > { %3814 = vmatmul.msk.bf16.gmra.mxu1 %vm669_vm2, %v1378_v27  ;;  %v1301_v27 = vld [vmem:[#allocation2 + $0x228] sm:$0xff] }
 0x461   : > { %3799 = vmatmul.msk.bf16.gmra.mxu0 %vm669_vm2, %v1380_v28 }
 0x468   : > { %3815 = vmatmul.msk.bf16.gmra.mxu1 %vm669_vm2, %v1380_v28 }
 0x46e   : > { %v1240_v45 = vpop.f32.mrf.mxu0 }
 0x471   : > { %3800 = vmatmul.msk.bf16.gmra.mxu0 %vm669_vm2, %v1382_v18 }
 0x475   : > { %v1254_v52 = vpop.f32.mrf.mxu1 }
 0x476   : > { %v1242_v48 = vpop.f32.mrf.mxu0  ;;  %v5431_v20 = vadd.f32 %v1254_v52, %v1240_v45  ;;  %v1305_v52 = vld [vmem:[#allocation2 + $0x248] sm:$0xff] }
 0x478   : > { %3816 = vmatmul.msk.bf16.gmra.mxu1 %vm669_vm2, %v1382_v18 }
 0x47d   : > { %v1256_v35 = vpop.f32.mrf.mxu1 }
 0x47e   : > { %v1447_v55 = vpop.f32.mrf.mxu0  ;;  %v1257_v49 = vadd.f32 %v1256_v35, %v1242_v48  ;;  %v1297_v48 = vld [vmem:[#allocation2 + $0x208] sm:$0xff] }
 0x47f   : > { %v5446_v22 = vadd.f32 %v1447_v55, %v1296_v14  ;;  %v1303_v14 = vld [vmem:[#allocation2 + $0x238] sm:$0xff] }
 0x480   : > { %4080 = vrcp.f32 %v1257_v49  ;;  %v1284_v10 = vand.u32 2147483648, %v1257_v49  ;;  %vm1278_vm4 = vweird.f32 %v1257_v49  ;;  %v1282_v12 = vand.u32 2147483647, %v1257_v49 }
 0x481   : > { %3801 = vmatmul.msk.bf16.gmra.mxu0 %vm669_vm2, %v5374_v46  ;;  %7428 = vst [vmem:[#allocation36_spill] sm:$0xff] %v5446_v22 }
 0x482   : > { %v1285_v30 = vor.u32 1.1754944e-38, %v1284_v10  ;;  %vm1283_vm6 = vcmp.eq.f32.partialorder %v1282_v12, 8.507059e+37 }
 0x485   : > { %v1536_v2 = vpop.f32.mrf.mxu1 }
 0x486   : > { %v1449_v33 = vpop.f32.mrf.mxu0  ;;  %v4081_v57 = vpop.eup %4080 }
 0x487   : > { %v1274_v40 = vmul.f32 %v4081_v57, %v1257_v49  ;;  %vm1279_vm3 = vweird.f32 %v4081_v57 }
 0x488   : > { %3817 = vmatmul.msk.bf16.gmra.mxu1 %vm669_vm2, %v5374_v46  ;;  %vm5462_vm5 = vmor %vm1278_vm4, %vm1279_vm3 }
 0x489   : > { %v1275_v8 = vsub.f32 1.0, %v1274_v40 }
 0x48b   : > { %v1276_v38 = vmul.f32 %v4081_v57, %v1275_v8  ;;  %v1312_v8 = vld [vmem:[#allocation2 + $0x280] sm:$0xff] }
 0x48d   : > { %v5439_v16 = vpop.f32.mrf.mxu1  ;;  %v1277_v26 = vadd.f32 %v4081_v57, %v1276_v38 }
 0x48e   : > { %v1452_v3 = vpop.f32.mrf.mxu0 }
 0x48f   : > { %v5444_v42 = vadd.f32 %v1452_v3, %v1300_v7  ;;  %v1309_v7 = vld [vmem:[#allocation2 + $0x268] sm:$0xff] }
 0x491   : > { %3802 = vmatmul.msk.bf16.gmra.mxu0 %vm669_vm2, %v1371_v23  ;;  %7427 = vst [vmem:[#allocation35_spill] sm:$0xff] %v5444_v42  ;;  %v1616_v0 = vmax.f32 %v5446_v22, %v5444_v42  ;;  %v1328_v22 = vld [vmem:[#allocation2 + $0x300] sm:$0xff] }
 0x495   : > { %v1541_v15 = vpop.f32.mrf.mxu1 }
 0x496   : > { %v1454_v13 = vpop.f32.mrf.mxu0 }
 0x497   : > { %v5457_v43 = vadd.f32 %v1454_v13, %v1302_v41 }
 0x498   : > { %3818 = vmatmul.msk.bf16.gmra.mxu1 %vm669_vm2, %v1371_v23  ;;  %v5466_v23 = vadd.f32 %v1449_v33, %v1298_v51  ;;  %v5479_v33 = vadd.f32 %v1541_v15, %v1301_v27  ;;  %v1311_v51 = vld [vmem:[#allocation2 + $0x278] sm:$0xff] }
 0x499   : > { %7429 = vst [vmem:[#allocation37_spill] sm:$0xff] %v5457_v43 }
 0x49a   : > { %7432 = vst [vmem:[#allocation38_spill] sm:$0xff] %v5466_v23  ;;  %v1617_v28 = vmax.f32 %v5466_v23, %v5457_v43  ;;  %v1330_v43 = vld [vmem:[#allocation2 + $0x310] sm:$0xff] }
 0x49b   : > { %7433 = vst [vmem:[#allocation39_spill] sm:$0xff] %v5479_v33 }
 0x49d   : > { %v1543_v19 = vpop.f32.mrf.mxu1 }
 0x49e   : > { %v1457_v5 = vpop.f32.mrf.mxu0 }
 0x49f   : > { %v5448_v6 = vadd.f32 %v1457_v5, %v1304_v54  ;;  %v5483_v5 = vadd.f32 %v1536_v2, %v1297_v48  ;;  %v1307_v2 = vld [vmem:[#allocation2 + $0x258] sm:$0xff] }
 0x4a1   : > { %3803 = vmatmul.msk.bf16.gmra.mxu0 %vm669_vm2, %v5393_v59  ;;  %v1618_v44 = vmax.f32 %v1616_v0, %v5448_v6  ;;  %7434 = vst [vmem:[#allocation40_spill] sm:$0xff] %v5483_v5  ;;  %v1299_v0 = vld [vmem:[#allocation2 + $0x218] sm:$0xff] }
 0x4a5   : > { %v1546_v46 = vpop.f32.mrf.mxu1 }
 0x4a6   : > { %v1459_v21 = vpop.f32.mrf.mxu0 }
 0x4a7   : > { %v5468_v29 = vadd.f32 %v1459_v21, %v1306_v39  ;;  %v1653_v21 = vmax.f32 %v5483_v5, %v5479_v33  ;;  %v1322_v5 = vld [vmem:[#allocation2 + $0x2d0] sm:$0xff] }
 0x4a8   : > { %3819 = vmatmul.msk.bf16.gmra.mxu1 %vm669_vm2, %v5393_v59  ;;  %v1281_v59 = vsel %vm5462_vm5, %v4081_v57, %v1277_v26  ;;  %v5485_v57 = vadd.f32 %v1546_v46, %v1305_v52  ;;  %v5497_v46 = vadd.f32 %v1543_v19, %v1303_v14  ;;  %v1317_v52 = vld [vmem:[#allocation2 + $0x2a8] sm:$0xff]  ;;  %v1326_v33 = vld [vmem:[#allocation2 + $0x2f0] sm:$0xff] }
 0x4a9   : > { %v5475_v55 = vmax.f32 %v1617_v28, %v5468_v29  ;;  %v1286_v49 = vsel %vm1283_vm6, %v1285_v30, %v1281_v59 }
 0x4aa   : > { %v1288_v3 = vperm.slane %v1286_v49, 0  ;;  %v1655_v15 = vmax.f32 %v1653_v21, %v5485_v57  ;;  %7437 = vst [vmem:[#allocation43_spill] sm:$0xff] %v5497_v46  ;;  %v1320_v49 = vld [vmem:[#allocation2 + $0x2c0] sm:$0xff] }
 0x4ac   : > { %v5488_v40 = vmul.f32 %v1288_v3, %v5431_v20 }
 0x4ad   : > { %v1548_v45 = vpop.f32.mrf.mxu1 }
 0x4ae   : > { %v1462_v37 = vpop.f32.mrf.mxu0  ;;  %7435 = vst [vmem:[#allocation41_spill] sm:$0xff] %v5488_v40  ;;  %v5508_v26 = vadd.f32 %v1548_v45, %v1307_v2 }
 0x4af   : > { %v5453_v4 = vadd.f32 %v1462_v37, %v1308_v17 }
 0x4b0   : > { %7439 = vst [vmem:[#allocation45_spill] sm:$0xff] %v5508_v26 }
 0x4b1   : > { %v1620_v9 = vmax.f32 %v1618_v44, %v5453_v4  ;;  %3804 = vmatmul.msk.bf16.gmra.mxu0 %vm669_vm2, %v5397_v56  ;;  %v5506_v44 = vadd.f32 %v5439_v16, %v1299_v0  ;;  %v1316_v16 = vld [vmem:[#allocation2 + $0x2a0] sm:$0xff] }
 0x4b2   : > { %v1324_v0 = vld [vmem:[#allocation2 + $0x2e0] sm:$0xff] }
 0x4b3   : > { %7438 = vst [vmem:[#allocation44_spill] sm:$0xff] %v5506_v44  ;;  %v1654_v19 = vmax.f32 %v5506_v44, %v5497_v46 }
 0x4b5   : > { %v1551_v54 = vpop.f32.mrf.mxu1  ;;  %v5513_v10 = vmax.f32 %v1654_v19, %v5508_v26  ;;  %v1383_v19 = vpop.trf.xlu0 }
 0x4b6   : > { %v1464_v18 = vpop.f32.mrf.mxu0  ;;  %v5493_v38 = vadd.f32 %v1551_v54, %v1309_v7 }
 0x4b7   : > { %v5477_v35 = vadd.f32 %v1464_v18, %v1310_v50 }
 0x4b8   : > { %7436 = vst [vmem:[#allocation42_spill] sm:$0xff] %v5493_v38  ;;  %v1657_v20 = vmax.f32 %v1655_v15, %v5493_v38  ;;  %3820 = vmatmul.msk.bf16.gmra.mxu1 %vm669_vm2, %v5397_v56 }
 0x4b9   : > { %v7445_v31 = vmax.f32 %v5475_v55, %v5477_v35  ;;  %v1338_v55 = vld [vmem:[#allocation2 + $0x350] sm:$0xff] }
 0x4bd   : > { %v1553_v39 = vpop.f32.mrf.mxu1 }
 0x4be   : > { %v1467_v17 = vpop.f32.mrf.mxu0  ;;  %v5515_v12 = vadd.f32 %v1553_v39, %v1311_v51 }
 0x4bf   : > { %v5495_v41 = vadd.f32 %v1467_v17, %v1312_v8  ;;  %v1321_v17 = vld [vmem:[#allocation2 + $0x2c8] sm:$0xff] }
 0x4c1   : > { %v1622_v37 = vmax.f32 %v1620_v9, %v5495_v41  ;;  %3805 = vmatmul.msk.bf16.gmra.mxu0 %vm669_vm2, %v5401_v58 }
 0x4c5   : > { %v1556_v59 = vpop.f32.mrf.mxu1 }
 0x4c6   : > { %v5517_v56 = vpop.f32.mrf.mxu0  ;;  %v5521_v50 = vadd.f32 %v1556_v59, %v1313_v32  ;;  %v1325_v59 = vld [vmem:[#allocation2 + $0x2e8] sm:$0xff] }
 0x4c7   : > { %v5591_v44 = vadd.f32 %v5517_v56, %v1314_v25  ;;  %v1332_v25 = vld [vmem:[#allocation2 + $0x320] sm:$0xff]  ;;  %v1334_v56 = vld [vmem:[#allocation2 + $0x330] sm:$0xff] }
 0x4c8   : > { %7440 = vst [vmem:[#allocation46_spill] sm:$0xff] %v5521_v50  ;;  %v1659_v28 = vmax.f32 %v1657_v20, %v5521_v50  ;;  %3821 = vmatmul.msk.bf16.gmra.mxu1 %vm669_vm2, %v5401_v58 }
 0x4c9   : > { %7443 = vst [vmem:[#allocation49_spill] sm:$0xff] %v5591_v44  ;;  %v1623_v36 = vmax.f32 %v7445_v31, %v5591_v44  ;;  %v1336_v31 = vld [vmem:[#allocation2 + $0x340] sm:$0xff] }
 0x4cd   : > { %v5531_v18 = vpop.f32.mrf.mxu1 }
 0x4ce   : > { %v1472_v30 = vpop.f32.mrf.mxu0 }
 0x4cf   : > { %v5523_v27 = vadd.f32 %v1472_v30, %v1316_v16 }
 0x4d1   : > { %v1624_v45 = vmax.f32 %v1622_v37, %v5523_v27  ;;  %3806 = vmatmul.msk.bf16.gmra.mxu0 %vm669_vm2, %v5409_v1 }
 0x4d5   : > { %v1561_v3 = vpop.f32.mrf.mxu1 }
 0x4d6   : > { %v1474_v48 = vpop.f32.mrf.mxu0  ;;  %v5533_v7 = vadd.f32 %v1561_v3, %v1317_v52 }
 0x4d7   : > { %v5593_v46 = vadd.f32 %v1474_v48, %v1318_v24 }
 0x4d8   : > { %7441 = vst [vmem:[#allocation47_spill] sm:$0xff] %v5533_v7  ;;  %v1661_v14 = vmax.f32 %v1659_v28, %v5533_v7  ;;  %3822 = vmatmul.msk.bf16.gmra.mxu1 %vm669_vm2, %v5409_v1 }
 0x4d9   : > { %7444 = vst [vmem:[#allocation50_spill] sm:$0xff] %v5593_v46  ;;  %v1625_v42 = vmax.f32 %v1623_v36, %v5593_v46 }
 0x4dd   : > { %v5545_v54 = vpop.f32.mrf.mxu1 }
 0x4de   : > { %v1477_v21 = vpop.f32.mrf.mxu0 }
 0x4df   : > { %v5535_v8 = vadd.f32 %v1477_v21, %v1320_v49 }
 0x4e1   : > { %v5541_v58 = vmax.f32 %v1624_v45, %v5535_v8  ;;  %3807 = vmatmul.msk.bf16.gmra.mxu0 %vm669_vm2, %v5421_v61 }
 0x4e5   : > { %v1566_v2 = vpop.f32.mrf.mxu1 }
 0x4e6   : > { %v1479_v15 = vpop.f32.mrf.mxu0  ;;  %v5547_v20 = vadd.f32 %v1566_v2, %v1321_v17 }
 0x4e7   : > { %v5599_v23 = vadd.f32 %v1479_v15, %v1322_v5 }
 0x4e8   : > { %7442 = vst [vmem:[#allocation48_spill] sm:$0xff] %v5547_v20  ;;  %v5552_v1 = vmax.f32 %v1661_v14, %v5547_v20  ;;  %3823 = vmatmul.msk.bf16.gmra.mxu1 %vm669_vm2, %v5421_v61 }
 0x4e9   : > { %v1627_v48 = vmax.f32 %v1625_v42, %v5599_v23 }
 0x4ed   : > { %v5559_v32 = vpop.f32.mrf.mxu1 }
 0x4ee   : > { %v1482_v37 = vpop.f32.mrf.mxu0 }
 0x4ef   : > { %v5549_v51 = vadd.f32 %v1482_v37, %v1324_v0 }
 0x4f1   : > { %v1628_v39 = vmax.f32 %v5541_v58, %v5549_v51  ;;  %3808 = vmatmul.msk.bf16.gmra.mxu0 %vm669_vm2, %v1383_v19 }
 0x4f5   : > { %v1571_v30 = vpop.f32.mrf.mxu1 }
 0x4f6   : > { %v1484_v16 = vpop.f32.mrf.mxu0  ;;  %v5561_v28 = vadd.f32 %v1571_v30, %v1325_v59 }
 0x4f7   : > { %v5602_v20 = vadd.f32 %v1484_v16, %v1326_v33  ;;  %v1340_v33 = vld [vmem:[#allocation2 + $0x360] sm:$0xff]  ;;  %v1342_v16 = vld [vmem:[#allocation2 + $0x370] sm:$0xff] }
 0x4f8   : > { %3824 = vmatmul.msk.bf16.gmra.mxu1 %vm669_vm2, %v1383_v19 }
 0x4f9   : > { %v1629_v5 = vmax.f32 %v1627_v48, %v5602_v20 }
 0x4fd   : > { %v5566_v49 = vpop.f32.mrf.mxu1 }
 0x4fe   : > { %v1487_v45 = vpop.f32.mrf.mxu0 }
 0x4ff   : > { %v5607_v50 = vadd.f32 %v1487_v45, %v1328_v22  ;;  %v1344_v22 = vld [vmem:[#allocation2 + $0x380] sm:$0xff] }
 0x501   : > { %7446 = vst [vmem:[#allocation51_spill] sm:$0xff] %v5607_v50  ;;  %v1630_v46 = vmax.f32 %v1628_v39, %v5607_v50  ;;  %v1350_v39 = vld [vmem:[#allocation2 + $0x3b0] sm:$0xff]  ;;  %v1356_v50 = vld [vmem:[#allocation2 + $0x3e0] sm:$0xff] }
 0x505   : > { %v5568_v3 = vpop.f32.mrf.mxu1 }
 0x506   : > { %v1489_v61 = vpop.f32.mrf.mxu0 }
 0x507   : > { %v5609_v38 = vadd.f32 %v1489_v61, %v1330_v43  ;;  %v1346_v43 = vld [vmem:[#allocation2 + $0x390] sm:$0xff] }
 0x509   : > { %7447 = vst [vmem:[#allocation52_spill] sm:$0xff] %v5609_v38  ;;  %v1631_v44 = vmax.f32 %v1629_v5, %v5609_v38  ;;  %v1315_v5 = vld [vmem:[#allocation2 + $0x298] sm:$0xff] }
 0x50a   : > { %v5643_v38 = vadd.f32 %v5531_v18, %v1315_v5  ;;  %v7448_v5 = vmax.f32 %v5513_v10, %v5515_v12 }
 0x50d   : > { %v5570_v14 = vpop.f32.mrf.mxu1 }
 0x50e   : > { %v1492_v21 = vpop.f32.mrf.mxu0 }
 0x50f   : > { %v5612_v15 = vadd.f32 %v1492_v21, %v1332_v25 }
 0x511   : > { %v1632_v45 = vmax.f32 %v1630_v46, %v5612_v15  ;;  %v1352_v46 = vld [vmem:[#allocation2 + $0x3c0] sm:$0xff] }
 0x515   : > { %v5572_v17 = vpop.f32.mrf.mxu1 }
 0x516   : > { %v1494_v58 = vpop.f32.mrf.mxu0 }
 0x517   : > { %v5614_v36 = vadd.f32 %v1494_v58, %v1334_v56  ;;  %v1348_v56 = vld [vmem:[#allocation2 + $0x3a0] sm:$0xff] }
 0x519   : > { %v1633_v61 = vmax.f32 %v1631_v44, %v5614_v36  ;;  %v1354_v44 = vld [vmem:[#allocation2 + $0x3d0] sm:$0xff] }
 0x51d   : > { %v5574_v2 = vpop.f32.mrf.mxu1 }
 0x51e   : > { %v1497_v0 = vpop.f32.mrf.mxu0 }
 0x51f   : > { %v5618_v26 = vadd.f32 %v1497_v0, %v1336_v31 }
 0x521   : > { %v1634_v0 = vmax.f32 %v1632_v45, %v5618_v26  ;;  %v1319_v45 = vld [vmem:[#allocation2 + $0x2b8] sm:$0xff] }
 0x525   : > { %v5576_v59 = vpop.f32.mrf.mxu1 }
 0x526   : > { %v1499_v37 = vpop.f32.mrf.mxu0 }
 0x527   : > { %v5620_v42 = vadd.f32 %v1499_v37, %v1338_v55 }
 0x529   : > { %v1635_v37 = vmax.f32 %v1633_v61, %v5620_v42  ;;  %v1323_v61 = vld [vmem:[#allocation2 + $0x2d8] sm:$0xff] }
 0x52d   : > { %v5578_v52 = vpop.f32.mrf.mxu1 }
 0x52e   : > { %v1502_v30 = vpop.f32.mrf.mxu0 }
 0x52f   : > { %v5624_v21 = vadd.f32 %v1502_v30, %v1340_v33 }
 0x531   : > { %v1636_v30 = vmax.f32 %v1634_v0, %v5624_v21  ;;  %v1358_v0 = vld [vmem:[#allocation2 + $0x3f0] sm:$0xff] }
 0x535   : > { %v5580_v9 = vpop.f32.mrf.mxu1 }
 0x536   : > { %v1504_v19 = vpop.f32.mrf.mxu0 }
 0x537   : > { %v5626_v58 = vadd.f32 %v1504_v19, %v1342_v16 }
 0x539   : > { %v1637_v19 = vmax.f32 %v1635_v37, %v5626_v58  ;;  %v1327_v37 = vld [vmem:[#allocation2 + $0x2f8] sm:$0xff] }
 0x53d   : > { %v5582_v62 = vpop.f32.mrf.mxu1 }
 0x53e   : > { %v1507_v13 = vpop.f32.mrf.mxu0 }
 0x53f   : > { %v5632_v31 = vadd.f32 %v1507_v13, %v1344_v22 }
 0x541   : > { %v1638_v13 = vmax.f32 %v1636_v30, %v5632_v31 }
 0x545   : > { %v5584_v34 = vpop.f32.mrf.mxu1 }
 0x546   : > { %v1509_v63 = vpop.f32.mrf.mxu0 }
 0x547   : > { %v5634_v55 = vadd.f32 %v1509_v63, %v1346_v43 }
 0x549   : > { %v1639_v63 = vmax.f32 %v1637_v19, %v5634_v55  ;;  %v1331_v19 = vld [vmem:[#allocation2 + $0x318] sm:$0xff] }
 0x54d   : > { %v5586_v40 = vpop.f32.mrf.mxu1 }
 0x54e   : > { %v1512_v60 = vpop.f32.mrf.mxu0 }
 0x54f   : > { %v5638_v33 = vadd.f32 %v1512_v60, %v1348_v56  ;;  %v5652_v60 = vadd.f32 %v5545_v54, %v1319_v45  ;;  %v1329_v45 = vld [vmem:[#allocation2 + $0x308] sm:$0xff] }
 0x555   : > { %v5588_v53 = vpop.f32.mrf.mxu1 }
 0x556   : > { %v1514_v11 = vpop.f32.mrf.mxu0 }
 0x557   : > { %v5640_v16 = vadd.f32 %v1514_v11, %v1350_v39  ;;  %v1640_v11 = vmax.f32 %v1638_v13, %v5638_v33 }
 0x559   : > { %v1641_v18 = vmax.f32 %v1639_v63, %v5640_v16  ;;  %v1335_v63 = vld [vmem:[#allocation2 + $0x338] sm:$0xff] }
 0x55d   : > { %v5604_v7 = vpop.f32.mrf.mxu1 }
 0x55e   : > { %v1517_v47 = vpop.f32.mrf.mxu0 }
 0x55f   : > { %v5647_v22 = vadd.f32 %v1517_v47, %v1352_v46  ;;  %v1660_v47 = vmax.f32 %v7448_v5, %v5643_v38  ;;  %v5663_v46 = vadd.f32 %v5559_v32, %v1323_v61  ;;  %v5677_v61 = vadd.f32 %v5570_v14, %v1331_v19  ;;  %v1339_v5 = vld [vmem:[#allocation2 + $0x358] sm:$0xff] }
 0x560   : > { %v5691_v19 = vadd.f32 %v5578_v52, %v1339_v5  ;;  %v1351_v5 = vld [vmem:[#allocation2 + $0x3b8] sm:$0xff] }
 0x561   : > { %v1642_v54 = vmax.f32 %v1640_v11, %v5647_v22  ;;  %7449 = vst [vmem:[#allocation53_spill] sm:$0xff] %v5677_v61  ;;  %v1333_v11 = vld [vmem:[#allocation2 + $0x328] sm:$0xff] }
 0x565   : > { %v5628_v25 = vpop.f32.mrf.mxu1 }
 0x566   : > { %v1519_v24 = vpop.f32.mrf.mxu0 }
 0x567   : > { %v5649_v43 = vadd.f32 %v1519_v24, %v1354_v44 }
 0x569   : > { %v1643_v44 = vmax.f32 %v1641_v18, %v5649_v43  ;;  %v5680_v18 = vadd.f32 %v5568_v3, %v1329_v45  ;;  %v1341_v3 = vld [vmem:[#allocation2 + $0x368] sm:$0xff] }
 0x56b   : > { %7450 = vst [vmem:[#allocation54_spill] sm:$0xff] %v5680_v18 }
 0x56d   : > { %v1608_v56 = vpop.f32.mrf.mxu1 }
 0x56e   : > { %v1522_v48 = vpop.f32.mrf.mxu0 }
 0x56f   : > { %v5656_v39 = vadd.f32 %v1522_v48, %v1356_v50  ;;  %v1662_v50 = vmax.f32 %v1660_v47, %v5652_v60  ;;  %v5671_v48 = vadd.f32 %v5566_v49, %v1327_v37  ;;  %v5684_v47 = vadd.f32 %v5574_v2, %v1335_v63  ;;  %v1337_v37 = vld [vmem:[#allocation2 + $0x348] sm:$0xff]  ;;  %v1347_v63 = vld [vmem:[#allocation2 + $0x398] sm:$0xff] }
 0x571   : > { %v1644_v10 = vmax.f32 %v1642_v54, %v5656_v39  ;;  %v1664_v32 = vmax.f32 %v1662_v50, %v5663_v46  ;;  %v1343_v50 = vld [vmem:[#allocation2 + $0x378] sm:$0xff] }
 0x573   : > { %v1666_v49 = vmax.f32 %v1664_v32, %v5671_v48  ;;  %v5702_v32 = vadd.f32 %v5582_v62, %v1343_v50  ;;  %v1355_v50 = vld [vmem:[#allocation2 + $0x3d8] sm:$0xff] }
 0x575   : > { %v1668_v14 = vmax.f32 %v1666_v49, %v5677_v61 }
 0x576   : > { %v1524_v24 = vpop.f32.mrf.mxu0 }
 0x577   : > { %v5667_v30 = vadd.f32 %v1524_v24, %v1358_v0  ;;  %v1611_v24 = vpop.f32.mrf.mxu1 }
 0x579   : > { %v1645_v13 = vmax.f32 %v1643_v44, %v5667_v30  ;;  %v5687_v44 = vadd.f32 %v5572_v17, %v1333_v11  ;;  %v1670_v17 = vmax.f32 %v1668_v14, %v5684_v47  ;;  %v1345_v11 = vld [vmem:[#allocation2 + $0x388] sm:$0xff] }
 0x57a   : > { %v5714_v62 = vadd.f32 %v5584_v34, %v1345_v11 }
 0x57b   : > { %v1646_v0 = vmax.f32 %v1644_v10, %v1645_v13  ;;  %v7451_v10 = vmax.f32 %v5552_v1, %v5561_v28  ;;  %v5698_v13 = vadd.f32 %v5576_v59, %v1337_v37  ;;  %v1672_v1 = vmax.f32 %v1670_v17, %v5691_v19  ;;  %v1349_v59 = vld [vmem:[#allocation2 + $0x3a8] sm:$0xff] }
 0x57c   : > { %v5722_v17 = vadd.f32 %v5588_v53, %v1349_v59 }
 0x57d   : > { %v1647_v54 = vrot.slane %v1646_v0, 4  ;;  %v1667_v2 = vmax.f32 %v7451_v10, %v5680_v18  ;;  %v1674_v10 = vmax.f32 %v1672_v1, %v5702_v32  ;;  %v1357_v1 = vld [vmem:[#allocation2 + $0x3e8] sm:$0xff] }
 0x57f   : > { %v1648_v45 = vmax.f32 %v1646_v0, %v1647_v54  ;;  %v1669_v52 = vmax.f32 %v1667_v2, %v5687_v44  ;;  %v5706_v0 = vadd.f32 %v5580_v9, %v1341_v3  ;;  %v5710_v54 = vadd.f32 %v5586_v40, %v1347_v63  ;;  %v1353_v40 = vld [vmem:[#allocation2 + $0x3c8] sm:$0xff]  ;;  %v1359_v63 = vld [vmem:[#allocation2 + $0x3f8] sm:$0xff] }
 0x580   : > { %v5718_v2 = vadd.f32 %v5604_v7, %v1351_v5  ;;  %v5732_v5 = vadd.f32 %v5628_v25, %v1353_v40 }
 0x581   : > { %v1649_v49 = vrot.slane %v1648_v45, 2  ;;  %v1671_v14 = vmax.f32 %v1669_v52, %v5698_v13  ;;  %v5725_v52 = vadd.f32 %v1608_v56, %v1355_v50 }
 0x583   : > { %v1650_v37 = vmax.f32 %v1648_v45, %v1649_v49  ;;  %v1673_v3 = vmax.f32 %v1671_v14, %v5706_v0  ;;  %v1613_v45 = vpop.f32.mrf.mxu1  ;;  %v1676_v49 = vmax.f32 %v1674_v10, %v5710_v54  ;;  %v5744_v10 = vadd.f32 %v1611_v24, %v1357_v1 }
 0x584   : > { %v5734_v14 = vadd.f32 %v1613_v45, %v1359_v63 }
 0x585   : > { %v1651_v9 = vrot.slane %v1650_v37, 1  ;;  %v1675_v11 = vmax.f32 %v1673_v3, %v5714_v62  ;;  %v1678_v7 = vmax.f32 %v1676_v49, %v5718_v2 }
 0x587   : > { %v5727_v34 = vmax.f32 %v1650_v37, %v1651_v9  ;;  %v1677_v53 = vmax.f32 %v1675_v11, %v5722_v17  ;;  %v1680_v50 = vmax.f32 %v1678_v7, %v5725_v52 }
 0x589   : > { %v1698_v59 = vsub.f32 %v5448_v6, %v5727_v34  ;;  %v1700_v56 = vsub.f32 %v5468_v29, %v5727_v34  ;;  %v1702_v37 = vsub.f32 %v5453_v4, %v5727_v34  ;;  %v1704_v25 = vsub.f32 %v5477_v35, %v5727_v34  ;;  %v7453_v4 = vld [vmem:[#allocation42_spill] sm:$0xff] }
 0x58a   : > { %v1706_v9 = vsub.f32 %v5495_v41, %v5727_v34  ;;  %v1710_v3 = vsub.f32 %v5523_v27, %v5727_v34  ;;  %v1679_v29 = vmax.f32 %v1677_v53, %v5732_v5  ;;  %v1682_v24 = vmax.f32 %v1680_v50, %v5734_v14  ;;  %v7452_v50 = vld [vmem:[#allocation45_spill] sm:$0xff] }
 0x58b   : > { %v1778_v6 = vmul.f32 1.442695, %v1702_v37  ;;  %v1782_v61 = vmul.f32 1.442695, %v1704_v25  ;;  %v7458_v25 = vld [vmem:[#allocation50_spill] sm:$0xff] }
 0x58c   : > { %v1681_v40 = vmax.f32 %v1679_v29, %v5744_v10 }
 0x58e   : > { %v1683_v63 = vmax.f32 %v1681_v40, %v1682_v24  ;;  %v7454_v24 = vld [vmem:[#allocation46_spill] sm:$0xff] }
 0x590   : > { %v1684_v27 = vrot.slane %v1683_v63, 4 }
 0x592   : > { %v1685_v45 = vmax.f32 %v1683_v63, %v1684_v27  ;;  %v7455_v63 = vld [vmem:[#allocation47_spill] sm:$0xff] }
 0x594   : > { %v1686_v49 = vrot.slane %v1685_v45, 2 }
 0x596   : > { %v1687_v11 = vmax.f32 %v1685_v45, %v1686_v49  ;;  %v7456_v45 = vld [vmem:[#allocation48_spill] sm:$0xff] }
 0x598   : > { %v1688_v1 = vrot.slane %v1687_v11, 1 }
 0x59a   : > { %v5763_v7 = vmax.f32 %v1687_v11, %v1688_v1  ;;  %v1770_v11 = vmul.f32 1.442695, %v1698_v59  ;;  %v1794_v59 = vmul.f32 1.442695, %v1710_v3 }
 0x59c   : > { %v1699_v53 = vsub.f32 %v5485_v57, %v5763_v7  ;;  %v1701_v29 = vsub.f32 %v7452_v50, %v5763_v7  ;;  %v1703_v35 = vsub.f32 %v7453_v4, %v5763_v7  ;;  %v1705_v41 = vsub.f32 %v5515_v12, %v5763_v7  ;;  %v7457_v57 = vld [vmem:[#allocation49_spill] sm:$0xff] }
 0x59d   : > { %v1707_v40 = vsub.f32 %v7454_v24, %v5763_v7  ;;  %v1711_v27 = vsub.f32 %v7455_v63, %v5763_v7  ;;  %v1715_v49 = vsub.f32 %v7456_v45, %v5763_v7  ;;  %v1708_v1 = vsub.f32 %v7457_v57, %v5727_v34 }
 0x59e   : > { %v1719_v50 = vsub.f32 %v5561_v28, %v5763_v7  ;;  %v1774_v4 = vmul.f32 1.442695, %v1700_v56  ;;  %v1739_v12 = vsub.f32 %v5714_v62, %v5763_v7  ;;  %v1786_v63 = vmul.f32 1.442695, %v1706_v9 }
 0x59f   : > { %4082 = vpow2.f32 %v1770_v11  ;;  %v1790_v18 = vmul.f32 1.442695, %v1708_v1  ;;  %v1772_v45 = vmul.f32 1.442695, %v1699_v53  ;;  %v1709_v28 = vsub.f32 %v5643_v38, %v5763_v7 }
 0x5a0   : > { %4084 = vpow2.f32 %v1774_v4  ;;  %v1776_v56 = vmul.f32 1.442695, %v1701_v29  ;;  %v1780_v37 = vmul.f32 1.442695, %v1703_v35  ;;  %v1712_v24 = vsub.f32 %v7458_v25, %v5727_v34 }
 0x5a1   : > { %4086 = vpow2.f32 %v1778_v6  ;;  %v1784_v9 = vmul.f32 1.442695, %v1705_v41  ;;  %v1713_v3 = vsub.f32 %v5652_v60, %v5763_v7  ;;  %v1792_v38 = vmul.f32 1.442695, %v1709_v28 }
 0x5a2   : > { %4088 = vpow2.f32 %v1782_v61  ;;  %v1788_v61 = vmul.f32 1.442695, %v1707_v40  ;;  %v1716_v41 = vsub.f32 %v5599_v23, %v5727_v34  ;;  %v1798_v29 = vmul.f32 1.442695, %v1712_v24 }
 0x5a3   : > { %4090 = vpow2.f32 %v1786_v63  ;;  %v1717_v60 = vsub.f32 %v5663_v46, %v5763_v7  ;;  %v1800_v40 = vmul.f32 1.442695, %v1713_v3  ;;  %v7459_v63 = vsub.f32 %v5535_v8, %v5727_v34 }
 0x5a4   : > { %4092 = vpow2.f32 %v1790_v18  ;;  %v1796_v18 = vmul.f32 1.442695, %v1711_v27  ;;  %v1804_v23 = vmul.f32 1.442695, %v1715_v49  ;;  %v1806_v28 = vmul.f32 1.442695, %v1716_v41 }
 0x5a5   : > { %v5789_v57 = vpop.eup %4082  ;;  %4094 = vpow2.f32 %v1794_v59  ;;  %v1802_v27 = vmul.f32 1.442695, %v7459_v63  ;;  %v1808_v8 = vmul.f32 1.442695, %v1717_v60  ;;  %v7460_v25 = vsub.f32 %v5549_v51, %v5727_v34 }
 0x5a6   : > { %v5793_v11 = vpop.eup %4084  ;;  %4096 = vpow2.f32 %v1772_v45  ;;  %v1720_v45 = vsub.f32 %v5602_v20, %v5727_v34  ;;  %v1812_v20 = vmul.f32 1.442695, %v1719_v50  ;;  %v1752_v62 = vsub.f32 %v5667_v30, %v5727_v34 }
 0x5a7   : > { %v5797_v6 = vpop.eup %4086  ;;  %4098 = vpow2.f32 %v1776_v56  ;;  %v1721_v56 = vsub.f32 %v5671_v48, %v5763_v7  ;;  %v1810_v49 = vmul.f32 1.442695, %v7460_v25 }
 0x5a8   : > { %v5799_v35 = vpop.eup %4088  ;;  %4100 = vpow2.f32 %v1780_v37 }
 0x5a9   : > { %v5801_v53 = vpop.eup %4090  ;;  %4102 = vpow2.f32 %v1784_v9  ;;  %v1816_v48 = vmul.f32 1.442695, %v1721_v56  ;;  %v1888_v25 = vpack.c.bf16 %v5799_v35, %v5797_v6  ;;  %v7462_v35 = vld [vmem:[#allocation37_spill] sm:$0xff] }
 0x5aa   : > { %v5805_v1 = vpop.eup %4092  ;;  %4104 = vpow2.f32 %v1788_v61  ;;  %v1814_v61 = vmul.f32 1.442695, %v1720_v45 }
 0x5ab   : > { %v5809_v4 = vpop.eup %4094  ;;  %4106 = vpow2.f32 %v1792_v38 }
 0x5ac   : > { %v5814_v59 = vpop.eup %4096  ;;  %4108 = vpow2.f32 %v1796_v18 }
 0x5ad   : > { %v5816_v24 = vpop.eup %4098  ;;  %4110 = vpow2.f32 %v1798_v29 }
 0x5ae   : > { %v5820_v46 = vpop.eup %4100  ;;  %4112 = vpow2.f32 %v1800_v40 }
 0x5af   : > { %v5824_v37 = vpop.eup %4102  ;;  %4114 = vpow2.f32 %v1802_v27 }
 0x5b0   : > { %v5829_v9 = vpop.eup %4104  ;;  %4116 = vpow2.f32 %v1804_v23  ;;  %v1889_v6 = vpack.c.bf16 %v5824_v37, %v5820_v46  ;;  %v7477_v46 = vld [vmem:[#allocation5_spill] sm:$0xff] }
 0x5b1   : > { %v5831_v3 = vpop.eup %4106  ;;  %4118 = vpow2.f32 %v1806_v28  ;;  %v1890_v28 = vpack.c.bf16 %v5805_v1, %v5801_v53 }
 0x5b2   : > { %v5833_v38 = vpop.eup %4108  ;;  %4120 = vpow2.f32 %v1808_v8  ;;  %v1891_v1 = vpack.c.bf16 %v5831_v3, %v5829_v9 }
 0x5b3   : > { %v4111_v18 = vpop.eup %4110  ;;  %4122 = vpow2.f32 %v1810_v49  ;;  %v1886_v49 = vpack.c.bf16 %v5793_v11, %v5789_v57 }
 0x5b4   : > { %v5835_v41 = vpop.eup %4112  ;;  %4124 = vpow2.f32 %v1812_v20  ;;  %v1892_v45 = vpack.c.bf16 %v4111_v18, %v5809_v4  ;;  %v1696_v18 = vsub.f32 %v7462_v35, %v5727_v34 }
 0x5b5   : > { %v4115_v51 = vpop.eup %4114  ;;  %4126 = vpow2.f32 %v1814_v61  ;;  %v7461_v61 = vld [vmem:[#allocation35_spill] sm:$0xff]  ;;  %v1893_v53 = vpack.c.bf16 %v5835_v41, %v5833_v38 }
 0x5b6   : > { %v5837_v29 = vpop.eup %4116  ;;  %4128 = vpow2.f32 %v1816_v48  ;;  %v1694_v48 = vsub.f32 %v7461_v61, %v5727_v34  ;;  %v7465_v61 = vld [vmem:[#allocation36_spill] sm:$0xff] }
 0x5b7   : > { %v4119_v60 = vpop.eup %4118  ;;  %v1690_v57 = vsub.f32 %v7465_v61, %v5727_v34 }
 0x5b8   : > { %v5839_v50 = vpop.eup %4120  ;;  %v1894_v23 = vpack.c.bf16 %v4119_v60, %v4115_v51  ;;  %v1762_v11 = vmul.f32 1.442695, %v1694_v48  ;;  %v7463_v51 = vsub.f32 %v5632_v31, %v5727_v34  ;;  %v7467_v31 = vld [vmem:[#allocation38_spill] sm:$0xff] }
 0x5b9   : > { %v4123_v40 = vpop.eup %4122  ;;  %v1895_v4 = vpack.c.bf16 %v5839_v50, %v5837_v29  ;;  %v1692_v35 = vsub.f32 %v7467_v31, %v5727_v34  ;;  %v7473_v29 = vld [vmem:[#allocation44_spill] sm:$0xff] }
 0x5ba   : > { %v5841_v63 = vpop.eup %4124  ;;  %v1850_v60 = vmul.f32 1.442695, %v7463_v51  ;;  %4130 = vpow2.f32 %v1762_v11  ;;  %v1766_v51 = vmul.f32 1.442695, %v1696_v18  ;;  %v1878_v18 = vmul.f32 1.442695, %v1752_v62 }
 0x5bb   : > { %v4127_v27 = vpop.eup %4126  ;;  %v1758_v11 = vmul.f32 1.442695, %v1692_v35  ;;  %v1693_v50 = vsub.f32 %v7473_v29, %v5763_v7 }
 0x5bc   : > { %v5846_v56 = vpop.eup %4128  ;;  %v1896_v8 = vpack.c.bf16 %v4127_v27, %v4123_v40  ;;  %v1852_v40 = vmul.f32 1.442695, %v1739_v12  ;;  %v7464_v27 = vsub.f32 %v5634_v55, %v5727_v34  ;;  %4132 = vpow2.f32 %v1850_v60 }
 0x5bd   : > { %v1897_v20 = vpack.c.bf16 %v5846_v56, %v5841_v63  ;;  %v1754_v55 = vmul.f32 1.442695, %v1690_v57  ;;  %v1750_v12 = vsub.f32 %v5656_v39, %v5727_v34  ;;  %v1748_v60 = vsub.f32 %v5649_v43, %v5727_v34  ;;  %v7471_v56 = vld [vmem:[#allocation43_spill] sm:$0xff] }
 0x5be   : > { %1916 = vmatpush.bf16.msrb.mxu2 %v1896_v8  ;;  %v1854_v8 = vmul.f32 1.442695, %v7464_v27  ;;  %4134 = vpow2.f32 %v1852_v40  ;;  %v1742_v40 = vsub.f32 %v5638_v33, %v5727_v34  ;;  %v1744_v43 = vsub.f32 %v5640_v16, %v5727_v34 }
 0x5bf   : > { %v1874_v57 = vmul.f32 1.442695, %v1750_v12  ;;  %v7469_v12 = vld [vmem:[#allocation28_spill] sm:$0xff]  ;;  %v1734_v16 = vsub.f32 %v5624_v21, %v5727_v34  ;;  %v1730_v21 = vsub.f32 %v5618_v26, %v5727_v34  ;;  %v1726_v26 = vsub.f32 %v5612_v15, %v5727_v34  ;;  %v7474_v15 = vld [vmem:[#allocation51_spill] sm:$0xff] }
 0x5c0   : > { %4136 = vpow2.f32 %v1854_v8  ;;  %v1858_v31 = vmul.f32 1.442695, %v1742_v40  ;;  %v1760_v38 = vmul.f32 1.442695, %v1693_v50 }
 0x5c2   : > { %1917 = vmatpush.bf16.msrb.mxu2 %v1894_v23  ;;  %v7466_v23 = vsub.f32 %v5710_v54, %v5763_v7  ;;  %v4131_v54 = vpop.eup %4130 }
 0x5c3   : > { %v5890_v27 = vpop.eup %4132 }
 0x5c4   : > { %v1856_v48 = vmul.f32 1.442695, %v7466_v23  ;;  %v5894_v30 = vpop.eup %4134  ;;  %v1870_v23 = vmul.f32 1.442695, %v1748_v60 }
 0x5c6   : > { %1918 = vmatpush.bf16.msrb.mxu2 %v1892_v45  ;;  %4138 = vpow2.f32 %v1856_v48  ;;  %v1746_v45 = vsub.f32 %v5647_v22, %v5727_v34 }
 0x5c7   : > { %4140 = vpow2.f32 %v1766_v51  ;;  %v1862_v51 = vmul.f32 1.442695, %v1744_v43 }
 0x5c8   : > { %4142 = vpow2.f32 %v1754_v55  ;;  %v1866_v22 = vmul.f32 1.442695, %v1746_v45  ;;  %v7468_v55 = vld [vmem:[#allocation9_spill] sm:$0xff] }
 0x5c9   : > { %4144 = vpow2.f32 %v1758_v11  ;;  %v5910_v11 = vadd.f32 %v7469_v12, %v7468_v55 }
 0x5ca   : > { %1919 = vmatpush.bf16.msrb.mxu2 %v1890_v28  ;;  %v5896_v28 = vpop.eup %4136  ;;  %4146 = vpow2.f32 %v1878_v18  ;;  %v1736_v18 = vsub.f32 %v5626_v58, %v5727_v34  ;;  %v1732_v58 = vsub.f32 %v5620_v42, %v5727_v34  ;;  %v1834_v42 = vmul.f32 1.442695, %v1730_v21 }
 0x5cb   : > { %v1906_v8 = vpack.c.bf16 %v5896_v28, %v5890_v27  ;;  %4148 = vpow2.f32 %v1874_v57  ;;  %v1914_v40 = vpack.c.bf16 1.0, %v5910_v11 }
 0x5cc   : > { %v5898_v39 = vpop.eup %4138  ;;  %4150 = vpow2.f32 %v1866_v22  ;;  %v1753_v22 = vsub.f32 %v5734_v14, %v5763_v7  ;;  %v1846_v43 = vmul.f32 1.442695, %v1736_v18  ;;  %v7475_v18 = vld [vmem:[#allocation52_spill] sm:$0xff] }
 0x5cd   : > { %v4141_v61 = vpop.eup %4140  ;;  %4152 = vpow2.f32 %v1870_v23 }
 0x5ce   : > { %1920 = vmatpush.bf16.msrb.mxu2 %v1888_v25  ;;  %v1907_v25 = vpack.c.bf16 %v5898_v39, %v5894_v30  ;;  %v4143_v48 = vpop.eup %4142  ;;  %v1884_v35 = vpack.c.bf16 %v4141_v61, %v4131_v54  ;;  %4154 = vpow2.f32 %v1858_v31  ;;  %v1842_v61 = vmul.f32 1.442695, %v1734_v16 }
 0x5cf   : > { %v4145_v33 = vpop.eup %4144  ;;  %4156 = vpow2.f32 %v1862_v51  ;;  %v1880_v63 = vmul.f32 1.442695, %v1753_v22  ;;  %v1838_v51 = vmul.f32 1.442695, %v1732_v58  ;;  %v1751_v22 = vsub.f32 %v5744_v10, %v5763_v7 }
 0x5d0   : > { %v4147_v62 = vpop.eup %4146  ;;  %v1882_v45 = vpack.c.bf16 %v4145_v33, %v4143_v48  ;;  %v7470_v48 = vld [vmem:[#allocation39_spill] sm:$0xff]  ;;  %4158 = vpow2.f32 %v1842_v61  ;;  %v1728_v33 = vsub.f32 %v5614_v36, %v5727_v34  ;;  %v1826_v36 = vmul.f32 1.442695, %v1726_v26 }
 0x5d1   : > { %v1695_v14 = vsub.f32 %v7470_v48, %v5763_v7  ;;  %4160 = vpow2.f32 %v1846_v43  ;;  %v1749_v43 = vsub.f32 %v5725_v52, %v5763_v7  ;;  %v1745_v52 = vsub.f32 %v5718_v2, %v5763_v7 }
 0x5d2   : > { %1921 = vmatpush.bf16.msrb.mxu2 %v1886_v49  ;;  %v4149_v49 = vpop.eup %4148  ;;  %4162 = vpow2.f32 %v1880_v63 }
 0x5d3   : > { %v4151_v54 = vpop.eup %4150  ;;  %v1912_v60 = vpack.c.bf16 %v4147_v62, %v4149_v49  ;;  %v7472_v62 = vld [vmem:[#allocation40_spill] sm:$0xff]  ;;  %v1764_v16 = vmul.f32 1.442695, %v1695_v14  ;;  %v1722_v49 = vsub.f32 %v7474_v15, %v5727_v34  ;;  %4164 = vpow2.f32 %v1834_v42 }
 0x5d4   : > { %v4153_v57 = vpop.eup %4152  ;;  %v1691_v12 = vsub.f32 %v7472_v62, %v5763_v7  ;;  %4166 = vpow2.f32 %v1838_v51  ;;  %v1872_v48 = vmul.f32 1.442695, %v1749_v43  ;;  %v1864_v42 = vmul.f32 1.442695, %v1745_v52 }
 0x5d5   : > { %1930 = vmatpush.bf16.msrb.mxu3 %v1912_v60  ;;  %v4155_v23 = vpop.eup %4154  ;;  %v1910_v31 = vpack.c.bf16 %v4153_v57, %v4151_v54  ;;  %v1724_v54 = vsub.f32 %v7475_v18, %v5727_v34  ;;  %v1830_v60 = vmul.f32 1.442695, %v1728_v33  ;;  %4168 = vpow2.f32 %v1764_v16 }
 0x5d6   : > { %1922 = vmatpush.bf16.msrb.mxu2 %v1884_v35  ;;  %v4157_v35 = vpop.eup %4156  ;;  %v1756_v21 = vmul.f32 1.442695, %v1691_v12  ;;  %v1818_v41 = vmul.f32 1.442695, %v1722_v49  ;;  %v7479_v12 = vld [vmem:[#allocation27_spill] sm:$0xff] }
 0x5d7   : > { %v4159_v57 = vpop.eup %4158  ;;  %v1822_v10 = vmul.f32 1.442695, %v1724_v54  ;;  %v5976_v16 = vadd.f32 %v7479_v12, %v7468_v55 }
 0x5d8   : > { %v4161_v61 = vpop.eup %4160 }
 0x5d9   : > { %1931 = vmatpush.bf16.msrb.mxu3 %v1910_v31  ;;  %v4163_v34 = vpop.eup %4162  ;;  %v1904_v9 = vpack.c.bf16 %v4161_v61, %v4159_v57  ;;  %v1915_v55 = vpack.c.bf16 1.0, %v5976_v16 }
 0x5da   : > { %1923 = vmatpush.bf16.msrb.mxu2 %v1882_v45  ;;  %v1908_v45 = vpack.c.bf16 %v4157_v35, %v4155_v23  ;;  %v4165_v58 = vpop.eup %4164  ;;  %v1876_v23 = vmul.f32 1.442695, %v1751_v22  ;;  %v7476_v35 = vld [vmem:[#allocation10_spill] sm:$0xff]  ;;  %v1727_v22 = vsub.f32 %v5687_v44, %v5763_v7 }
 0x5db   : > { %v4167_v3 = vpop.eup %4166  ;;  %v514_v37 = vadd.f32 %v7477_v46, %v7476_v35  ;;  %v7487_v46 = vld [vmem:[#allocation19_spill] sm:$0xff] }
 0x5dc   : > { %v1902_v14 = vpack.c.bf16 %v4167_v3, %v4165_v58  ;;  %v7482_v3 = vld [vmem:[#allocation11_spill] sm:$0xff] }
 0x5dd   : > { %1924 = vmatmul.bf16.vlgmr.msrb.gmra.mxu2 %v1914_v40  ;;  %1932 = vmatpush.bf16.msrb.mxu3 %v1908_v45  ;;  %v2004_v51 = vpack.c.bf16 %v514_v37, %v514_v37  ;;  %v1737_v45 = vsub.f32 %v5702_v32, %v5763_v7  ;;  %v1733_v32 = vsub.f32 %v5691_v19, %v5763_v7  ;;  %v7488_v37 = vld [vmem:[#allocation21_spill] sm:$0xff] }
 0x5de   : > { %1944 = vmatpush.bf16.msra.mxu2 %v1897_v20  ;;  %v1697_v20 = vsub.f32 %v7471_v56, %v5763_v7 }
 0x5df   : > { %v1848_v18 = vmul.f32 1.442695, %v1737_v45  ;;  %v1840_v61 = vmul.f32 1.442695, %v1733_v32 }
 0x5e1   : > { %1933 = vmatpush.bf16.msrb.mxu3 %v1906_v8 }
 0x5e2   : > { %1945 = vmatpush.bf16.msra.mxu2 %v1895_v4  ;;  %v1768_v4 = vmul.f32 1.442695, %v1697_v20 }
 0x5e4   : > { %4170 = vpow2.f32 %v1768_v4  ;;  %v2146_v4 = vsel %vm718_vm1, %v2004_v51, 0  ;;  %v7491_v51 = vld [vmem:[#allocation12_spill] sm:$0xff] }
 0x5e5   : > { %4172 = vpow2.f32 %v1826_v36  ;;  %1934 = vmatpush.bf16.msrb.mxu3 %v1904_v9 }
 0x5e6   : > { %1946 = vmatpush.bf16.msra.mxu2 %v1893_v53  ;;  %v1747_v53 = vsub.f32 %v5732_v5, %v5763_v7  ;;  %4174 = vpow2.f32 %v1830_v60  ;;  %v1743_v5 = vsub.f32 %v5722_v17, %v5763_v7 }
 0x5e7   : > { %4176 = vpow2.f32 %v1756_v21 }
 0x5e8   : > { %4178 = vpow2.f32 %v1760_v38  ;;  %v1868_v28 = vmul.f32 1.442695, %v1747_v53  ;;  %v1860_v56 = vmul.f32 1.442695, %v1743_v5  ;;  %v7480_v38 = vld [vmem:[#allocation54_spill] sm:$0xff] }
 0x5e9   : > { %4180 = vpow2.f32 %v1818_v41  ;;  %1935 = vmatpush.bf16.msrb.mxu3 %v1902_v14  ;;  %v1723_v11 = vsub.f32 %v7480_v38, %v5763_v7  ;;  %v7481_v41 = vld [vmem:[#allocation53_spill] sm:$0xff]  ;;  %v7483_v5 = vld [vmem:[#allocation6_spill] sm:$0xff] }
 0x5ea   : > { %1947 = vmatpush.bf16.msra.mxu2 %v1891_v1  ;;  %v4169_v1 = vpop.eup %4168  ;;  %4182 = vpow2.f32 %v1822_v10  ;;  %v7484_v14 = vld [vmem:[#allocation13_spill] sm:$0xff] }
 0x5eb   : > { %v4171_v27 = vpop.eup %4170  ;;  %4184 = vpow2.f32 %v1876_v23  ;;  %v1820_v58 = vmul.f32 1.442695, %v1723_v11 }
 0x5ec   : > { %v4173_v8 = vpop.eup %4172  ;;  %4186 = vpow2.f32 %v1868_v28  ;;  %v1885_v20 = vpack.c.bf16 %v4171_v27, %v4169_v1  ;;  %v553_v28 = vadd.f32 %v7483_v5, %v7476_v35  ;;  %v7486_v35 = vld [vmem:[#allocation17_spill] sm:$0xff] }
 0x5ed   : > { %v4175_v31 = vpop.eup %4174  ;;  %4188 = vpow2.f32 %v1872_v48 }
 0x5ee   : > { %1948 = vmatpush.bf16.msra.mxu2 %v1889_v6  ;;  %v7478_v6 = vpack.c.bf16 %v5816_v24, %v5814_v59  ;;  %v4177_v63 = vpop.eup %4176  ;;  %v1900_v2 = vpack.c.bf16 %v4175_v31, %v4173_v8  ;;  %v1735_v59 = vsub.f32 %v5706_v0, %v5763_v7  ;;  %4190 = vpow2.f32 %v1860_v56  ;;  %v7485_v31 = vld [vmem:[#allocation15_spill] sm:$0xff] }
 0x5ef   : > { %v4179_v17 = vpop.eup %4178  ;;  %4192 = vpow2.f32 %v1864_v42  ;;  %v1731_v0 = vsub.f32 %v5698_v13, %v5763_v7  ;;  %v1729_v13 = vsub.f32 %v5684_v47, %v5763_v7  ;;  %v2005_v8 = vpack.c.bf16 %v553_v28, %v553_v28 }
 0x5f0   : > { %v4181_v26 = vpop.eup %4180  ;;  %1936 = vmatpush.bf16.msrb.mxu3 %v1900_v2  ;;  %v1883_v24 = vpack.c.bf16 %v4179_v17, %v4177_v63  ;;  %v1844_v36 = vmul.f32 1.442695, %v1735_v59  ;;  %v6030_v17 = vpop.f32.mrf.mxu3  ;;  %v7492_v59 = vld [vmem:[#allocation34_spill] sm:$0xff] }
 0x5f1   : > { %v4183_v33 = vpop.eup %4182  ;;  %v1836_v21 = vmul.f32 1.442695, %v1731_v0  ;;  %v1832_v53 = vmul.f32 1.442695, %v1729_v13  ;;  %v2149_v48 = vsel %vm718_vm1, %v2005_v8, 0 }
 0x5f2   : > { %1949 = vmatpush.bf16.msra.mxu2 %v7478_v6  ;;  %v4185_v62 = vpop.eup %4184  ;;  %v1898_v29 = vpack.c.bf16 %v4183_v33, %v4181_v26  ;;  %4194 = vpow2.f32 %v1844_v36  ;;  %v7489_v6 = vld [vmem:[#allocation23_spill] sm:$0xff] }
 0x5f3   : > { %v4187_v50 = vpop.eup %4186  ;;  %v1913_v15 = vpack.c.bf16 %v4163_v34, %v4185_v62  ;;  %4196 = vpow2.f32 %v1848_v18  ;;  %v1725_v34 = vsub.f32 %v7481_v41, %v5763_v7 }
 0x5f4   : > { %v4189_v49 = vpop.eup %4188  ;;  %1937 = vmatpush.bf16.msrb.mxu3 %v1898_v29  ;;  %4198 = vpow2.f32 %v1836_v21 }
 0x5f5   : > { %v4191_v54 = vpop.eup %4190  ;;  %v1911_v60 = vpack.c.bf16 %v4189_v49, %v4187_v50  ;;  %4200 = vpow2.f32 %v1840_v61  ;;  %v1824_v47 = vmul.f32 1.442695, %v1725_v34  ;;  %v7493_v50 = vld [vmem:[#allocation14_spill] sm:$0xff] }
 0x5f6   : > { %1950 = vmatpush.bf16.msra.mxu2 %v1885_v20  ;;  %v4193_v57 = vpop.eup %4192  ;;  %v7490_v20 = vld [vmem:[#allocation25_spill] sm:$0xff] }
 0x5f7   : > { %1938 = vmatmul.bf16.vlgmr.msrb.gmra.mxu3 %v1915_v55  ;;  %v1909_v19 = vpack.c.bf16 %v4193_v57, %v4191_v54 }
 0x5f8   : > { %1958 = vmatpush.bf16.msra.mxu3 %v1913_v15  ;;  %v4195_v44 = vpop.eup %4194  ;;  %v1214_v26 = vpop.f32.mrf.mxu3 }
 0x5f9   : > { %v4197_v10 = vpop.eup %4196 }
 0x5fa   : > { %1951 = vmatpush.bf16.msra.mxu2 %v1883_v24  ;;  %v4199_v43 = vpop.eup %4198  ;;  %v1905_v23 = vpack.c.bf16 %v4197_v10, %v4195_v44  ;;  %v1229_v24 = vadd.f32 %v7492_v59, %v1214_v26  ;;  %v7498_v26 = vld [vmem:[#allocation18_spill] sm:$0xff] }
 0x5fb   : > { %v4201_v9 = vpop.eup %4200 }
 0x5fc   : > { %1959 = vmatpush.bf16.msra.mxu3 %v1911_v60  ;;  %v1903_v1 = vpack.c.bf16 %v4201_v9, %v4199_v43  ;;  %vm1264_vm7 = vweird.f32 %v1229_v24  ;;  %v1270_v13 = vand.u32 2147483648, %v1229_v24 }
 0x5fd   : > { %1952 = vmatmul.bf16.vlgmr.msra.gmra.mxu2 %v1914_v40  ;;  %v1828_v40 = vmul.f32 1.442695, %v1727_v22 }
 0x5fe   : > { %2158 = vmatpush.bf16.msrb.mxu2 %v2146_v4 }
 0x5ff   : > { %4202 = vpow2.f32 %v1828_v40  ;;  %v1268_v40 = vand.u32 2147483647, %v1229_v24 }
 0x600   : > { %1960 = vmatpush.bf16.msra.mxu3 %v1909_v19  ;;  %4204 = vpow2.f32 %v1832_v53  ;;  %v7494_v19 = vld [vmem:[#allocation16_spill] sm:$0xff] }
 0x601   : > { %4206 = vpow2.f32 %v1820_v58  ;;  %vm1269_vm13 = vcmp.eq.f32.partialorder %v1268_v40, 8.507059e+37 }
 0x602   : > { %4208 = vpow2.f32 %v1824_v47  ;;  %v1271_v47 = vor.u32 1.1754944e-38, %v1270_v13  ;;  %v2014_v13 = vld [vmem:[#allocation2 + $0x428] sm:$0xff] }
 0x604   : > { %1961 = vmatpush.bf16.msra.mxu3 %v1907_v25 }
 0x605   : > { %v4203_v7 = vpop.eup %4202 }
 0x606   : > { %v4205_v27 = vpop.eup %4204 }
 0x607   : > { %v4207_v30 = vpop.eup %4206  ;;  %v1901_v39 = vpack.c.bf16 %v4205_v27, %v4203_v7 }
 0x608   : > { %1962 = vmatpush.bf16.msra.mxu3 %v1905_v23  ;;  %v4209_v25 = vpop.eup %4208 }
 0x609   : > { %v1899_v52 = vpack.c.bf16 %v4209_v25, %v4207_v30  ;;  %v7497_v25 = vld [vmem:[#allocation33_spill] sm:$0xff] }
 0x60a   : > { %v1227_v8 = vadd.f32 %v7497_v25, %v6030_v17 }
 0x60c   : > { %1963 = vmatpush.bf16.msra.mxu3 %v1903_v1 }
 0x60d   : > { %3825 = vmatmul.msk.bf16.vlgmr.msrb.gmra.mxu2 %vm669_vm2, %v7482_v3 }
 0x610   : > { %1964 = vmatpush.bf16.msra.mxu3 %v1901_v39 }
 0x614   : > { %1965 = vmatpush.bf16.msra.mxu3 %v1899_v52 }
 0x617   : > { %1966 = vmatmul.bf16.vlgmr.msra.gmra.mxu3 %v1915_v55 }
 0x618   : > { %2247 = vmatpush.bf16.msrb.mxu3 %v2149_v48 }
 0x61d   : > { %3826 = vmatmul.msk.bf16.gmra.mxu2 %vm669_vm2, %v7484_v14 }
 0x627   : > { %3841 = vmatmul.msk.bf16.vlgmr.msrb.gmra.mxu3 %vm669_vm2, %v7482_v3 }
 0x62d   : > { %3827 = vmatmul.msk.bf16.gmra.mxu2 %vm669_vm2, %v7485_v31 }
 0x637   : > { %3842 = vmatmul.msk.bf16.gmra.mxu3 %vm669_vm2, %v7484_v14 }
 0x63d   : > { %3828 = vmatmul.msk.bf16.gmra.mxu2 %vm669_vm2, %v7486_v35 }
 0x647   : > { %3843 = vmatmul.msk.bf16.gmra.mxu3 %vm669_vm2, %v7485_v31 }
 0x64d   : > { %3829 = vmatmul.msk.bf16.gmra.mxu2 %vm669_vm2, %v7487_v46 }
 0x657   : > { %3844 = vmatmul.msk.bf16.gmra.mxu3 %vm669_vm2, %v7486_v35 }
 0x65d   : > { %3830 = vmatmul.msk.bf16.gmra.mxu2 %vm669_vm2, %v7488_v37 }
 0x660   : > { %v6028_v63 = vpop.f32.mrf.mxu2 }
 0x667   : > { %3845 = vmatmul.msk.bf16.gmra.mxu3 %vm669_vm2, %v7487_v46 }
 0x668   : > { %v1927_v56 = vpop.f32.mrf.mxu2 }
 0x66d   : > { %3831 = vmatmul.msk.bf16.gmra.mxu2 %vm669_vm2, %v7489_v6 }
 0x677   : > { %3846 = vmatmul.msk.bf16.gmra.mxu3 %vm669_vm2, %v7488_v37 }
 0x67a   : > { %v6038_v2 = vpop.f32.mrf.mxu3 }
 0x67b   : > { %v1940_v48 = vadd.f32 %v6038_v2, %v6028_v63  ;;  %v7499_v2 = vld [vmem:[#allocation41_spill] sm:$0xff] }
 0x67d   : > { %3832 = vmatmul.msk.bf16.gmra.mxu2 %vm669_vm2, %v7490_v20 }
 0x680   : > { %v6036_v42 = vpop.f32.mrf.mxu2 }
 0x682   : > { %v1941_v62 = vpop.f32.mrf.mxu3 }
 0x683   : > { %v1942_v16 = vadd.f32 %v1941_v62, %v1927_v56 }
 0x685   : > { %4210 = vrcp.f32 %v1942_v16  ;;  %v1983_v61 = vand.u32 2147483648, %v1942_v16  ;;  %vm1977_vm11 = vweird.f32 %v1942_v16  ;;  %v1981_v41 = vand.u32 2147483647, %v1942_v16 }
 0x686   : > { %4212 = vrcp.f32 %v1229_v24 }
 0x687   : > { %3847 = vmatmul.msk.bf16.gmra.mxu3 %vm669_vm2, %v7489_v6  ;;  %v1984_v43 = vor.u32 1.1754944e-38, %v1983_v61  ;;  %vm1982_vm14 = vcmp.eq.f32.partialorder %v1981_v41, 8.507059e+37 }
 0x688   : > { %v1955_v33 = vpop.f32.mrf.mxu2 }
 0x68b   : > { %v4211_v29 = vpop.eup %4210 }
 0x68c   : > { %v4213_v15 = vpop.eup %4212  ;;  %v1973_v49 = vmul.f32 %v4211_v29, %v1942_v16  ;;  %vm1978_vm9 = vweird.f32 %v4211_v29  ;;  %v2013_v16 = vld [vmem:[#allocation2 + $0x420] sm:$0xff] }
 0x68d   : > { %3833 = vmatmul.msk.bf16.gmra.mxu2 %vm669_vm2, %v7491_v51  ;;  %v1260_v0 = vmul.f32 %v4213_v15, %v1229_v24  ;;  %vm1265_vm8 = vweird.f32 %v4213_v15  ;;  %vm1979_vm12 = vmor %vm1977_vm11, %vm1978_vm9  ;;  %v2009_v24 = vld [vmem:[#allocation2 + $0x400] sm:$0xff] }
 0x68e   : > { %v1974_v36 = vsub.f32 1.0, %v1973_v49  ;;  %vm6061_vm10 = vmor %vm1264_vm7, %vm1265_vm8 }
 0x68f   : > { %v1261_v32 = vsub.f32 1.0, %v1260_v0 }
 0x690   : > { %v6044_v12 = vpop.f32.mrf.mxu2  ;;  %v1975_v60 = vmul.f32 %v4211_v29, %v1974_v36 }
 0x691   : > { %v1262_v22 = vmul.f32 %v4213_v15, %v1261_v32  ;;  %v7503_v32 = vld [vmem:[#allocation20_spill] sm:$0xff] }
 0x692   : > { %v1976_v21 = vadd.f32 %v4211_v29, %v1975_v60 }
 0x693   : > { %v1263_v38 = vadd.f32 %v4213_v15, %v1262_v22 }
 0x694   : > { %v1980_v44 = vsel %vm1979_vm12, %v4211_v29, %v1976_v21 }
 0x695   : > { %v1267_v23 = vsel %vm6061_vm10, %v4213_v15, %v1263_v38  ;;  %v1985_v7 = vsel %vm1982_vm14, %v1984_v43, %v1980_v44  ;;  %v6089_v15 = vadd.f32 %v6044_v12, %v2009_v24  ;;  %v2018_v38 = vld [vmem:[#allocation2 + $0x448] sm:$0xff] }
 0x696   : > { %v1272_v5 = vsel %vm1269_vm13, %v1271_v47, %v1267_v23  ;;  %v2000_v39 = vperm.slane %v1985_v7, 0  ;;  %v2022_v44 = vld [vmem:[#allocation2 + $0x468] sm:$0xff]  ;;  %v2016_v47 = vld [vmem:[#allocation2 + $0x438] sm:$0xff]  ;;  %v2029_v23 = vld [vmem:[#allocation2 + $0x4a0] sm:$0xff] }
 0x697   : > { %3848 = vmatmul.msk.bf16.gmra.mxu3 %vm669_vm2, %v7490_v20  ;;  %v1287_v31 = vperm.slane %v1272_v5, 0  ;;  %7501 = vst [vmem:[#allocation42_spill] sm:$0xff] %v6089_v15  ;;  %v2020_v7 = vld [vmem:[#allocation2 + $0x458] sm:$0xff]  ;;  %v7510_v24 = vld [vmem:[#allocation26_spill] sm:$0xff] }
 0x698   : > { %v6047_v45 = vpop.f32.mrf.mxu2  ;;  %v2002_v56 = vmul.f32 %v2000_v39, %v1940_v48 }
 0x699   : > { %v1289_v20 = vmul.f32 %v1287_v31, %v1227_v8 }
 0x69a   : > { %v1967_v4 = vpop.f32.mrf.mxu3 }
 0x69b   : > { %v1968_v37 = vadd.f32 %v1967_v4, %v6036_v42  ;;  %v3430_v63 = vpack.c.bf16 %v2002_v56, %v1289_v20  ;;  %v2017_v42 = vld [vmem:[#allocation2 + $0x440] sm:$0xff]  ;;  %v7509_v56 = vld [vmem:[#allocation24_spill] sm:$0xff] }
 0x69d   : > { %3834 = vmatmul.msk.bf16.gmra.mxu2 %vm669_vm2, %v7493_v50 }
 0x6a0   : > { %v6053_v55 = vpop.f32.mrf.mxu2 }
 0x6a1   : > { %v6086_v4 = vadd.f32 %v6053_v55, %v2013_v16  ;;  %v2025_v55 = vld [vmem:[#allocation2 + $0x480] sm:$0xff] }
 0x6a2   : > { %v1969_v18 = vpop.f32.mrf.mxu3 }
 0x6a3   : > { %v1970_v54 = vadd.f32 %v1969_v18, %v1955_v33  ;;  %7500 = vst [vmem:[#allocation45_spill] sm:$0xff] %v6086_v4  ;;  %v2329_v0 = vmax.f32 %v6089_v15, %v6086_v4 }
 0x6a5   : > { %4214 = vrcp.f32 %v1970_v54  ;;  %v1997_v3 = vand.u32 2147483648, %v1970_v54  ;;  %v1995_v27 = vand.u32 2147483647, %v1970_v54  ;;  %vm1991_vm3 = vweird.f32 %v1970_v54 }
 0x6a7   : > { %3849 = vmatmul.msk.bf16.gmra.mxu3 %vm669_vm2, %v7491_v51  ;;  %v1998_v52 = vor.u32 1.1754944e-38, %v1997_v3  ;;  %vm1996_vm5 = vcmp.eq.f32.partialorder %v1995_v27, 8.507059e+37 }
 0x6a8   : > { %v6055_v57 = vpop.f32.mrf.mxu2 }
 0x6aa   : > { %v6065_v34 = vpop.f32.mrf.mxu3 }
 0x6ab   : > { %v4215_v53 = vpop.eup %4214 }
 0x6ac   : > { %v1987_v10 = vmul.f32 %v4215_v53, %v1970_v54  ;;  %vm1992_vm15 = vweird.f32 %v4215_v53 }
 0x6ad   : > { %3835 = vmatmul.msk.bf16.gmra.mxu2 %vm669_vm2, %v7494_v19  ;;  %vm1993_vm4 = vmor %vm1991_vm3, %vm1992_vm15 }
 0x6ae   : > { %v1988_v9 = vsub.f32 1.0, %v1987_v10 }
 0x6b0   : > { %v2170_v58 = vpop.f32.mrf.mxu2  ;;  %v1989_v1 = vmul.f32 %v4215_v53, %v1988_v9 }
 0x6b1   : > { %v6093_v49 = vadd.f32 %v2170_v58, %v2017_v42  ;;  %v7506_v58 = vld [vmem:[#allocation22_spill] sm:$0xff] }
 0x6b2   : > { %v1990_v28 = vadd.f32 %v4215_v53, %v1989_v1  ;;  %v6069_v30 = vpop.f32.mrf.mxu3 }
 0x6b3   : > { %7502 = vst [vmem:[#allocation46_spill] sm:$0xff] %v6093_v49  ;;  %v2331_v54 = vmax.f32 %v2329_v0, %v6093_v49 }
 0x6b4   : > { %v1994_v14 = vsel %vm1993_vm4, %v4215_v53, %v1990_v28 }
 0x6b5   : > { %v1999_v46 = vsel %vm1996_vm5, %v1998_v52, %v1994_v14  ;;  %v2024_v52 = vld [vmem:[#allocation2 + $0x478] sm:$0xff] }
 0x6b6   : > { %v2001_v6 = vperm.slane %v1999_v46, 0 }
 0x6b7   : > { %3850 = vmatmul.msk.bf16.gmra.mxu3 %vm669_vm2, %v7493_v50  ;;  %v2021_v50 = vld [vmem:[#allocation2 + $0x460] sm:$0xff] }
 0x6b8   : > { %v6075_v35 = vpop.f32.mrf.mxu2  ;;  %v2003_v17 = vmul.f32 %v2001_v6, %v1968_v37 }
 0x6ba   : > { %v2254_v33 = vpop.f32.mrf.mxu3  ;;  %v3431_v51 = vpack.c.bf16 %v2003_v17, %v7499_v2  ;;  %v2033_v17 = vld [vmem:[#allocation2 + $0x4c0] sm:$0xff] }
 0x6bb   : > { %v6108_v40 = vadd.f32 %v2254_v33, %v2014_v13  ;;  %v2028_v13 = vld [vmem:[#allocation2 + $0x498] sm:$0xff] }
 0x6bc   : > { %3442 = vxpose.binary.xlu0.c.b16.start [1/4] (short) %v3431_v51, %v3430_v63, 128 }
 0x6bd   : > { %3836 = vmatmul.msk.bf16.gmra.mxu2 %vm669_vm2, %v7498_v26  ;;  %7504 = vst [vmem:[#allocation47_spill] sm:$0xff] %v6108_v40 }
 0x6c0   : > { %v2175_v62 = vpop.f32.mrf.mxu2 }
 0x6c1   : > { %v6097_v36 = vadd.f32 %v2175_v62, %v2021_v50  ;;  %v2037_v50 = vld [vmem:[#allocation2 + $0x4e0] sm:$0xff] }
 0x6c2   : > { %v2256_v59 = vpop.f32.mrf.mxu3 }
 0x6c3   : > { %v2333_v12 = vmax.f32 %v2331_v54, %v6097_v36  ;;  %v6124_v27 = vadd.f32 %v2256_v59, %v2016_v47  ;;  %v2030_v59 = vld [vmem:[#allocation2 + $0x4a8] sm:$0xff] }
 0x6c5   : > { %7507 = vst [vmem:[#allocation49_spill] sm:$0xff] %v6124_v27 }
 0x6c7   : > { %3851 = vmatmul.msk.bf16.gmra.mxu3 %vm669_vm2, %v7494_v19  ;;  %v2010_v19 = vld [vmem:[#allocation2 + $0x408] sm:$0xff] }
 0x6c8   : > { %v6083_v29 = vpop.f32.mrf.mxu2  ;;  %v6111_v41 = vadd.f32 %v6065_v34, %v2010_v19  ;;  %v2012_v34 = vld [vmem:[#allocation2 + $0x418] sm:$0xff] }
 0x6c9   : > { %v6130_v39 = vadd.f32 %v6069_v30, %v2012_v34  ;;  %v2026_v30 = vld [vmem:[#allocation2 + $0x488] sm:$0xff] }
 0x6ca   : > { %v2259_v18 = vpop.f32.mrf.mxu3  ;;  %7505 = vst [vmem:[#allocation48_spill] sm:$0xff] %v6111_v41  ;;  %v2366_v10 = vmax.f32 %v6111_v41, %v6108_v40 }
 0x6cb   : > { %v6113_v53 = vadd.f32 %v2259_v18, %v2018_v38  ;;  %7508 = vst [vmem:[#allocation50_spill] sm:$0xff] %v6130_v39  ;;  %v2367_v48 = vmax.f32 %v6130_v39, %v6124_v27  ;;  %v2032_v38 = vld [vmem:[#allocation2 + $0x4b8] sm:$0xff]  ;;  %v2031_v27 = vld [vmem:[#allocation2 + $0x4b0] sm:$0xff] }
 0x6cd   : > { %3837 = vmatmul.msk.bf16.gmra.mxu2 %vm669_vm2, %v7503_v32  ;;  %v2368_v9 = vmax.f32 %v2366_v10, %v6113_v53 }
 0x6d0   : > { %v2180_v60 = vpop.f32.mrf.mxu2 }
 0x6d1   : > { %v6103_v22 = vadd.f32 %v2180_v60, %v2025_v55 }
 0x6d2   : > { %v2261_v61 = vpop.f32.mrf.mxu3 }
 0x6d3   : > { %v2335_v21 = vmax.f32 %v2333_v12, %v6103_v22  ;;  %v6132_v25 = vadd.f32 %v2261_v61, %v2020_v7 }
 0x6d5   : > { %v2369_v31 = vmax.f32 %v2367_v48, %v6132_v25 }
 0x6d7   : > { %3852 = vmatmul.msk.bf16.gmra.mxu3 %vm669_vm2, %v7498_v26 }
 0x6d8   : > { %v6106_v11 = vpop.f32.mrf.mxu2 }
 0x6da   : > { %v2264_v43 = vpop.f32.mrf.mxu3 }
 0x6db   : > { %v6122_v3 = vadd.f32 %v2264_v43, %v2022_v44  ;;  %v2036_v43 = vld [vmem:[#allocation2 + $0x4d8] sm:$0xff] }
 0x6dd   : > { %3838 = vmatmul.msk.bf16.gmra.mxu2 %vm669_vm2, %v7506_v58  ;;  %v2370_v5 = vmax.f32 %v2368_v9, %v6122_v3 }
 0x6e0   : > { %v2185_v1 = vpop.f32.mrf.mxu2 }
 0x6e1   : > { %v6127_v28 = vadd.f32 %v2185_v1, %v2029_v23 }
 0x6e2   : > { %v2266_v14 = vpop.f32.mrf.mxu3 }
 0x6e3   : > { %v2337_v8 = vmax.f32 %v2335_v21, %v6127_v28  ;;  %v6138_v46 = vadd.f32 %v2266_v14, %v2024_v52  ;;  %v2034_v21 = vld [vmem:[#allocation2 + $0x4c8] sm:$0xff] }
 0x6e5   : > { %v2371_v6 = vmax.f32 %v2369_v31, %v6138_v46  ;;  %v2027_v31 = vld [vmem:[#allocation2 + $0x490] sm:$0xff] }
 0x6e7   : > { %3853 = vmatmul.msk.bf16.gmra.mxu3 %vm669_vm2, %v7503_v32 }
 0x6e8   : > { %v6140_v37 = vpop.f32.mrf.mxu2 }
 0x6ea   : > { %v2269_v20 = vpop.f32.mrf.mxu3 }
 0x6eb   : > { %v6147_v26 = vadd.f32 %v2269_v20, %v2026_v30 }
 0x6ed   : > { %3839 = vmatmul.msk.bf16.gmra.mxu2 %vm669_vm2, %v7509_v56  ;;  %v2372_v63 = vmax.f32 %v2370_v5, %v6147_v26 }
 0x6f0   : > { %v2190_v33 = vpop.f32.mrf.mxu2 }
 0x6f1   : > { %v6150_v2 = vadd.f32 %v2190_v33, %v2033_v17 }
 0x6f2   : > { %v2271_v62 = vpop.f32.mrf.mxu3 }
 0x6f3   : > { %v6153_v51 = vmax.f32 %v2337_v8, %v6150_v2  ;;  %v6176_v10 = vadd.f32 %v2271_v62, %v2028_v13  ;;  %v2038_v8 = vld [vmem:[#allocation2 + $0x4e8] sm:$0xff] }
 0x6f5   : > { %7511 = vst [vmem:[#allocation35_spill] sm:$0xff] %v6176_v10  ;;  %v2373_v23 = vmax.f32 %v2371_v6, %v6176_v10  ;;  %v2040_v6 = vld [vmem:[#allocation2 + $0x4f8] sm:$0xff]  ;;  %v2059_v10 = vld [vmem:[#allocation2 + $0x590] sm:$0xff] }
 0x6f7   : > { %3854 = vmatmul.msk.bf16.gmra.mxu3 %vm669_vm2, %v7506_v58 }
 0x6f8   : > { %v6155_v16 = vpop.f32.mrf.mxu2 }
 0x6fa   : > { %v2274_v42 = vpop.f32.mrf.mxu3 }
 0x6fb   : > { %v6161_v0 = vadd.f32 %v2274_v42, %v2030_v59 }
 0x6fd   : > { %3840 = vmatmul.msk.bf16.gmra.mxu2 %vm669_vm2, %v7510_v24  ;;  %v2374_v18 = vmax.f32 %v2372_v63, %v6161_v0 }
 0x700   : > { %v2195_v32 = vpop.f32.mrf.mxu2 }
 0x701   : > { %v6164_v55 = vadd.f32 %v2195_v32, %v2037_v50 }
 0x702   : > { %v2276_v60 = vpop.f32.mrf.mxu3 }
 0x703   : > { %v6181_v47 = vadd.f32 %v2276_v60, %v2032_v38 }
 0x705   : > { %7512 = vst [vmem:[#allocation37_spill] sm:$0xff] %v6181_v47  ;;  %v2375_v34 = vmax.f32 %v2373_v23, %v6181_v47  ;;  %v2015_v23 = vld [vmem:[#allocation2 + $0x430] sm:$0xff]  ;;  %v7520_v47 = vmax.f32 %v6153_v51, %v6164_v55  ;;  %v2061_v51 = vld [vmem:[#allocation2 + $0x5a0] sm:$0xff] }
 0x707   : > { %3855 = vmatmul.msk.bf16.gmra.mxu3 %vm669_vm2, %v7509_v56 }
 0x708   : > { %v6168_v12 = vpop.f32.mrf.mxu2 }
 0x70a   : > { %v2279_v61 = vpop.f32.mrf.mxu3 }
 0x70b   : > { %v6172_v19 = vadd.f32 %v2279_v61, %v2034_v21 }
 0x70d   : > { %v6179_v58 = vmax.f32 %v2374_v18, %v6172_v19 }
 0x710   : > { %v6174_v44 = vpop.f32.mrf.mxu2 }
 0x712   : > { %v2281_v9 = vpop.f32.mrf.mxu3 }
 0x713   : > { %v6185_v7 = vadd.f32 %v2281_v9, %v2036_v43 }
 0x715   : > { %v6188_v5 = vmax.f32 %v2375_v34, %v6185_v7  ;;  %v2011_v34 = vld [vmem:[#allocation2 + $0x410] sm:$0xff] }
 0x717   : > { %3856 = vmatmul.msk.bf16.gmra.mxu3 %vm669_vm2, %v7510_v24 }
 0x718   : > { %v2202_v1 = vpop.f32.mrf.mxu2 }
 0x71a   : > { %v2284_v52 = vpop.f32.mrf.mxu3 }
 0x71b   : > { %v6192_v48 = vadd.f32 %v2284_v52, %v2038_v8  ;;  %v2019_v8 = vld [vmem:[#allocation2 + $0x450] sm:$0xff]  ;;  %v6219_v52 = vadd.f32 %v6055_v57, %v2015_v23  ;;  %v6236_v23 = vadd.f32 %v6106_v11, %v2027_v31  ;;  %v2045_v31 = vld [vmem:[#allocation2 + $0x520] sm:$0xff] }
 0x71c   : > { %v6225_v17 = vadd.f32 %v6075_v35, %v2019_v8  ;;  %v2039_v8 = vld [vmem:[#allocation2 + $0x4f0] sm:$0xff] }
 0x71d   : > { %7513 = vst [vmem:[#allocation36_spill] sm:$0xff] %v6219_v52  ;;  %v6250_v11 = vadd.f32 %v6168_v12, %v2039_v8  ;;  %v2053_v12 = vld [vmem:[#allocation2 + $0x560] sm:$0xff]  ;;  %v2055_v8 = vld [vmem:[#allocation2 + $0x570] sm:$0xff] }
 0x71e   : > { %7515 = vst [vmem:[#allocation9_spill] sm:$0xff] %v6225_v17 }
 0x720   : > { %v2205_v14 = vpop.f32.mrf.mxu2 }
 0x721   : > { %v6259_v49 = vadd.f32 %v2205_v14, %v2045_v31 }
 0x722   : > { %v2286_v30 = vpop.f32.mrf.mxu3 }
 0x723   : > { %v6196_v56 = vadd.f32 %v2286_v30, %v2040_v6  ;;  %v2023_v6 = vld [vmem:[#allocation2 + $0x470] sm:$0xff]  ;;  %v6222_v30 = vadd.f32 %v6047_v45, %v2011_v34  ;;  %v6240_v34 = vadd.f32 %v6140_v37, %v2031_v27  ;;  %7518 = vst [vmem:[#allocation43_spill] sm:$0xff] %v6259_v49 }
 0x724   : > { %v6232_v41 = vadd.f32 %v6083_v29, %v2023_v6  ;;  %v2035_v45 = vld [vmem:[#allocation2 + $0x4d0] sm:$0xff]  ;;  %v2041_v29 = vld [vmem:[#allocation2 + $0x500] sm:$0xff] }
 0x725   : > { %7514 = vst [vmem:[#allocation38_spill] sm:$0xff] %v6222_v30  ;;  %v2330_v39 = vmax.f32 %v6222_v30, %v6219_v52  ;;  %v6244_v30 = vadd.f32 %v6155_v16, %v2035_v45  ;;  %v2043_v6 = vld [vmem:[#allocation2 + $0x510] sm:$0xff]  ;;  %v6254_v37 = vadd.f32 %v6174_v44, %v2041_v29  ;;  %v2049_v16 = vld [vmem:[#allocation2 + $0x540] sm:$0xff] }
 0x726   : > { %v2051_v45 = vld [vmem:[#allocation2 + $0x550] sm:$0xff] }
 0x727   : > { %v2332_v57 = vmax.f32 %v2330_v39, %v6225_v17  ;;  %7516 = vst [vmem:[#allocation28_spill] sm:$0xff] %v6254_v37 }
 0x728   : > { %v2207_v20 = vpop.f32.mrf.mxu2 }
 0x729   : > { %v2334_v35 = vmax.f32 %v2332_v57, %v6232_v41  ;;  %v2047_v57 = vld [vmem:[#allocation2 + $0x530] sm:$0xff] }
 0x72a   : > { %v6200_v33 = vpop.f32.mrf.mxu3 }
 0x72b   : > { %v2336_v15 = vmax.f32 %v2334_v35, %v6236_v23  ;;  %v6256_v35 = vadd.f32 %v2202_v1, %v2043_v6  ;;  %v2057_v6 = vld [vmem:[#allocation2 + $0x580] sm:$0xff] }
 0x72d   : > { %v2338_v39 = vmax.f32 %v2336_v15, %v6240_v34  ;;  %7517 = vst [vmem:[#allocation39_spill] sm:$0xff] %v6256_v35  ;;  %v6261_v15 = vadd.f32 %v2207_v20, %v2047_v57 }
 0x72f   : > { %v2340_v27 = vmax.f32 %v2338_v39, %v6244_v30  ;;  %7519 = vst [vmem:[#allocation40_spill] sm:$0xff] %v6261_v15  ;;  %v2343_v39 = vmax.f32 %v7520_v47, %v6254_v37  ;;  %v2063_v47 = vld [vmem:[#allocation2 + $0x5b0] sm:$0xff] }
 0x730   : > { %v2210_v63 = vpop.f32.mrf.mxu2 }
 0x731   : > { %v2342_v17 = vmax.f32 %v2340_v27, %v6250_v11  ;;  %v6268_v29 = vadd.f32 %v2210_v63, %v2049_v16  ;;  %v2345_v14 = vmax.f32 %v2343_v39, %v6259_v49 }
 0x732   : > { %v6202_v62 = vpop.f32.mrf.mxu3 }
 0x733   : > { %v2344_v44 = vmax.f32 %v2342_v17, %v6256_v35  ;;  %v2347_v17 = vmax.f32 %v2345_v14, %v6268_v29  ;;  %v2067_v35 = vld [vmem:[#allocation2 + $0x5d0] sm:$0xff] }
 0x735   : > { %v2346_v20 = vmax.f32 %v2344_v44, %v6261_v15 }
 0x738   : > { %v2212_v59 = vpop.f32.mrf.mxu2 }
 0x739   : > { %v6270_v1 = vadd.f32 %v2212_v59, %v2051_v45  ;;  %v2065_v45 = vld [vmem:[#allocation2 + $0x5c0] sm:$0xff] }
 0x73a   : > { %v6204_v24 = vpop.f32.mrf.mxu3 }
 0x73b   : > { %v2348_v63 = vmax.f32 %v2346_v20, %v6270_v1 }
 0x740   : > { %v2215_v42 = vpop.f32.mrf.mxu2 }
 0x741   : > { %v6276_v31 = vadd.f32 %v2215_v42, %v2053_v12 }
 0x742   : > { %v6206_v50 = vpop.f32.mrf.mxu3 }
 0x743   : > { %v2349_v39 = vmax.f32 %v2347_v17, %v6276_v31 }
 0x748   : > { %v2217_v32 = vpop.f32.mrf.mxu2 }
 0x749   : > { %v6278_v57 = vadd.f32 %v2217_v32, %v2055_v8  ;;  %v2069_v8 = vld [vmem:[#allocation2 + $0x5e0] sm:$0xff] }
 0x74a   : > { %v6208_v18 = vpop.f32.mrf.mxu3 }
 0x74b   : > { %v2350_v42 = vmax.f32 %v2348_v63, %v6278_v57 }
 0x750   : > { %v2220_v60 = vpop.f32.mrf.mxu2 }
 0x751   : > { %v6282_v59 = vadd.f32 %v2220_v60, %v2057_v6  ;;  %v2071_v6 = vld [vmem:[#allocation2 + $0x5f0] sm:$0xff] }
 0x752   : > { %v6210_v21 = vpop.f32.mrf.mxu3 }
 0x753   : > { %v2351_v44 = vmax.f32 %v2349_v39, %v6282_v59 }
 0x758   : > { %v2222_v13 = vpop.f32.mrf.mxu2 }
 0x759   : > { %v6284_v16 = vadd.f32 %v2222_v13, %v2059_v10 }
 0x75a   : > { %v6212_v61 = vpop.f32.mrf.mxu3 }
 0x75b   : > { %v2352_v14 = vmax.f32 %v2350_v42, %v6284_v16 }
 0x760   : > { %v6214_v38 = vpop.f32.mrf.mxu2 }
 0x761   : > { %v6289_v32 = vadd.f32 %v6214_v38, %v2061_v51 }
 0x762   : > { %v6216_v43 = vpop.f32.mrf.mxu3 }
 0x763   : > { %v2353_v20 = vmax.f32 %v2351_v44, %v6289_v32  ;;  %v2042_v44 = vld [vmem:[#allocation2 + $0x508] sm:$0xff] }
 0x764   : > { %v6310_v49 = vadd.f32 %v6200_v33, %v2042_v44  ;;  %v7523_v33 = vmax.f32 %v6179_v58, %v6192_v48  ;;  %v2060_v58 = vld [vmem:[#allocation2 + $0x598] sm:$0xff] }
 0x766   : > { %7521 = vst [vmem:[#allocation44_spill] sm:$0xff] %v6310_v49 }
 0x768   : > { %v2227_v9 = vpop.f32.mrf.mxu2 }
 0x769   : > { %v6291_v12 = vadd.f32 %v2227_v9, %v2063_v47 }
 0x76a   : > { %v6227_v54 = vpop.f32.mrf.mxu3 }
 0x76b   : > { %v2354_v17 = vmax.f32 %v2352_v14, %v6291_v12  ;;  %v2044_v14 = vld [vmem:[#allocation2 + $0x518] sm:$0xff] }
 0x770   : > { %v2230_v40 = vpop.f32.mrf.mxu2 }
 0x771   : > { %v6295_v60 = vadd.f32 %v2230_v40, %v2065_v45 }
 0x772   : > { %v6246_v52 = vpop.f32.mrf.mxu3 }
 0x773   : > { %v2355_v9 = vmax.f32 %v2353_v20, %v6295_v60  ;;  %v2048_v20 = vld [vmem:[#allocation2 + $0x538] sm:$0xff] }
 0x778   : > { %v2232_v4 = vpop.f32.mrf.mxu2 }
 0x779   : > { %v6297_v10 = vadd.f32 %v2232_v4, %v2067_v35 }
 0x77a   : > { %v6272_v27 = vpop.f32.mrf.mxu3 }
 0x77b   : > { %v2356_v51 = vmax.f32 %v2354_v17, %v6297_v10 }
 0x780   : > { %v2235_v37 = vpop.f32.mrf.mxu2 }
 0x781   : > { %v6301_v63 = vadd.f32 %v2235_v37, %v2069_v8  ;;  %v2046_v37 = vld [vmem:[#allocation2 + $0x528] sm:$0xff] }
 0x782   : > { %v2316_v13 = vpop.f32.mrf.mxu3 }
 0x783   : > { %v2357_v40 = vmax.f32 %v2355_v9, %v6301_v63 }
 0x788   : > { %v2237_v38 = vpop.f32.mrf.mxu2 }
 0x789   : > { %v6305_v47 = vadd.f32 %v2237_v38, %v2071_v6  ;;  %v6313_v6 = vadd.f32 %v6202_v62, %v2044_v14  ;;  %v2050_v38 = vld [vmem:[#allocation2 + $0x548] sm:$0xff] }
 0x78a   : > { %v2319_v45 = vpop.f32.mrf.mxu3  ;;  %v6328_v62 = vadd.f32 %v6208_v18, %v2050_v38  ;;  %v2058_v14 = vld [vmem:[#allocation2 + $0x588] sm:$0xff] }
 0x78b   : > { %v2358_v4 = vmax.f32 %v2356_v51, %v6305_v47  ;;  %7522 = vst [vmem:[#allocation51_spill] sm:$0xff] %v6313_v6  ;;  %v6316_v51 = vadd.f32 %v6204_v24, %v2046_v37  ;;  %v7524_v24 = vmax.f32 %v6188_v5, %v6196_v56 }
 0x78d   : > { %v2359_v35 = vmax.f32 %v2357_v40, %v2358_v4  ;;  %v2052_v40 = vld [vmem:[#allocation2 + $0x558] sm:$0xff]  ;;  %v6319_v4 = vadd.f32 %v6206_v50, %v2048_v20  ;;  %v2381_v44 = vmax.f32 %v7524_v24, %v6313_v6 }
 0x78e   : > { %v6335_v50 = vadd.f32 %v6210_v21, %v2052_v40  ;;  %v2062_v40 = vld [vmem:[#allocation2 + $0x5a8] sm:$0xff]  ;;  %v2068_v24 = vld [vmem:[#allocation2 + $0x5d8] sm:$0xff] }
 0x78f   : > { %v2360_v39 = vrot.slane %v2359_v35, 4  ;;  %v2383_v20 = vmax.f32 %v2381_v44, %v6319_v4 }
 0x791   : > { %v2361_v42 = vmax.f32 %v2359_v35, %v2360_v39  ;;  %v2054_v35 = vld [vmem:[#allocation2 + $0x568] sm:$0xff] }
 0x792   : > { %v2321_v17 = vpop.f32.mrf.mxu3 }
 0x793   : > { %v2362_v15 = vrot.slane %v2361_v42, 2 }
 0x795   : > { %v2363_v8 = vmax.f32 %v2361_v42, %v2362_v15  ;;  %v2380_v15 = vmax.f32 %v7523_v33, %v6310_v49  ;;  %v2056_v42 = vld [vmem:[#allocation2 + $0x578] sm:$0xff] }
 0x796   : > { %v6345_v38 = vadd.f32 %v6216_v43, %v2056_v42  ;;  %v2066_v42 = vld [vmem:[#allocation2 + $0x5c8] sm:$0xff] }
 0x797   : > { %v2364_v9 = vrot.slane %v2363_v8, 1  ;;  %v2382_v37 = vmax.f32 %v2380_v15, %v6316_v51  ;;  %v2385_v15 = vmax.f32 %v2383_v20, %v6335_v50  ;;  %v6378_v20 = vadd.f32 %v2321_v17, %v2068_v24 }
 0x799   : > { %v6321_v39 = vmax.f32 %v2363_v8, %v2364_v9  ;;  %v6339_v8 = vadd.f32 %v6212_v61, %v2054_v35  ;;  %v2384_v9 = vmax.f32 %v2382_v37, %v6328_v62  ;;  %v6353_v61 = vadd.f32 %v6227_v54, %v2058_v14  ;;  %v2064_v35 = vld [vmem:[#allocation2 + $0x5b8] sm:$0xff]  ;;  %v2070_v37 = vld [vmem:[#allocation2 + $0x5e8] sm:$0xff] }
 0x79a   : > { %v2324_v33 = vpop.f32.mrf.mxu3  ;;  %v2387_v44 = vmax.f32 %v2385_v15, %v6345_v38  ;;  %v6368_v14 = vadd.f32 %v6272_v27, %v2062_v40  ;;  %v2072_v15 = vld [vmem:[#allocation2 + $0x5f8] sm:$0xff] }
 0x79b   : > { %v2415_v18 = vsub.f32 %v6097_v36, %v6321_v39  ;;  %v2417_v5 = vsub.f32 %v6232_v41, %v6321_v39  ;;  %v2419_v21 = vsub.f32 %v6103_v22, %v6321_v39  ;;  %v2423_v36 = vsub.f32 %v6127_v28, %v6321_v39 }
 0x79c   : > { %v2427_v43 = vsub.f32 %v6150_v2, %v6321_v39  ;;  %v6361_v41 = vadd.f32 %v6246_v52, %v2060_v58  ;;  %v2431_v22 = vsub.f32 %v6164_v55, %v6321_v39  ;;  %v2386_v54 = vmax.f32 %v2384_v9, %v6339_v8 }
 0x79d   : > { %v6370_v28 = vadd.f32 %v2316_v13, %v2064_v35  ;;  %v6376_v55 = vadd.f32 %v2319_v45, %v2066_v42  ;;  %v6384_v40 = vadd.f32 %v2324_v33, %v2070_v37  ;;  %v2421_v33 = vsub.f32 %v6236_v23, %v6321_v39 }
 0x79e   : > { %v2388_v2 = vmax.f32 %v2386_v54, %v6353_v61  ;;  %v2389_v58 = vmax.f32 %v2387_v44, %v6361_v41  ;;  %v2425_v37 = vsub.f32 %v6240_v34, %v6321_v39 }
 0x7a0   : > { %v2390_v27 = vmax.f32 %v2388_v2, %v6368_v14  ;;  %v2391_v13 = vmax.f32 %v2389_v58, %v6370_v28 }
 0x7a2   : > { %v2326_v35 = vpop.f32.mrf.mxu3  ;;  %v2392_v54 = vmax.f32 %v2390_v27, %v6376_v55  ;;  %v2393_v52 = vmax.f32 %v2391_v13, %v6378_v20 }
 0x7a3   : > { %v6388_v44 = vadd.f32 %v2326_v35, %v2072_v15  ;;  %v2491_v15 = vmul.f32 1.442695, %v2415_v18  ;;  %v2499_v18 = vmul.f32 1.442695, %v2419_v21  ;;  %v2511_v21 = vmul.f32 1.442695, %v2425_v37 }
 0x7a4   : > { %v2394_v45 = vmax.f32 %v2392_v54, %v6384_v40 }
 0x7a5   : > { %v2395_v17 = vmax.f32 %v2393_v52, %v6388_v44  ;;  %4216 = vpow2.f32 %v2491_v15 }
 0x7a7   : > { %v2396_v42 = vmax.f32 %v2394_v45, %v2395_v17 }
 0x7a9   : > { %v2397_v24 = vrot.slane %v2396_v42, 4 }
 0x7ab   : > { %v2398_v9 = vmax.f32 %v2396_v42, %v2397_v24 }
 0x7ad   : > { %v2399_v6 = vrot.slane %v2398_v9, 2 }
 0x7af   : > { %v2400_v2 = vmax.f32 %v2398_v9, %v2399_v6  ;;  %v2495_v6 = vmul.f32 1.442695, %v2417_v5  ;;  %v2503_v5 = vmul.f32 1.442695, %v2421_v33  ;;  %v2507_v9 = vmul.f32 1.442695, %v2423_v36  ;;  %v6426_v36 = vpop.eup %4216 }
 0x7b1   : > { %v2401_v49 = vrot.slane %v2400_v2, 1  ;;  %4218 = vpow2.f32 %v2495_v6 }
 0x7b2   : > { %4220 = vpow2.f32 %v2499_v18 }
 0x7b3   : > { %v6392_v58 = vmax.f32 %v2400_v2, %v2401_v49  ;;  %v2429_v49 = vsub.f32 %v6244_v30, %v6321_v39  ;;  %4222 = vpow2.f32 %v2503_v5 }
 0x7b4   : > { %4224 = vpow2.f32 %v2507_v9 }
 0x7b5   : > { %v2412_v27 = vsub.f32 %v6113_v53, %v6392_v58  ;;  %v2414_v52 = vsub.f32 %v6132_v25, %v6392_v58  ;;  %v2416_v13 = vsub.f32 %v6122_v3, %v6392_v58  ;;  %v2418_v23 = vsub.f32 %v6138_v46, %v6392_v58 }
 0x7b6   : > { %v2420_v34 = vsub.f32 %v6147_v26, %v6392_v58  ;;  %v2424_v53 = vsub.f32 %v6161_v0, %v6392_v58  ;;  %v2428_v25 = vsub.f32 %v6172_v19, %v6392_v58  ;;  %v2430_v3 = vsub.f32 %v6185_v7, %v6392_v58 }
 0x7b7   : > { %v2432_v30 = vsub.f32 %v6192_v48, %v6392_v58  ;;  %v2434_v46 = vsub.f32 %v6196_v56, %v6392_v58  ;;  %v2433_v26 = vsub.f32 %v6250_v11, %v6321_v39  ;;  %v2515_v0 = vmul.f32 1.442695, %v2427_v43  ;;  %v6428_v11 = vpop.eup %4218  ;;  %v7525_v43 = vld [vmem:[#allocation35_spill] sm:$0xff] }
 0x7b8   : > { %v2456_v19 = vsub.f32 %v6368_v14, %v6392_v58  ;;  %v2458_v7 = vsub.f32 %v6370_v28, %v6392_v58  ;;  %v2519_v35 = vmul.f32 1.442695, %v2429_v49  ;;  %v2523_v48 = vmul.f32 1.442695, %v2431_v22  ;;  %v6432_v42 = vpop.eup %4220  ;;  %v7526_v22 = vld [vmem:[#allocation37_spill] sm:$0xff] }
 0x7b9   : > { %v2527_v56 = vmul.f32 1.442695, %v2433_v26  ;;  %4226 = vpow2.f32 %v2511_v21  ;;  %v2485_v54 = vmul.f32 1.442695, %v2412_v27  ;;  %v2422_v45 = vsub.f32 %v7525_v43, %v6392_v58  ;;  %v6434_v2 = vpop.eup %4222 }
 0x7ba   : > { %4228 = vpow2.f32 %v2515_v0  ;;  %v2489_v17 = vmul.f32 1.442695, %v2414_v52  ;;  %v2493_v24 = vmul.f32 1.442695, %v2416_v13  ;;  %v2426_v33 = vsub.f32 %v7526_v22, %v6392_v58  ;;  %v4225_v15 = vpop.eup %4224 }
 0x7bb   : > { %4230 = vpow2.f32 %v2519_v35  ;;  %v2497_v37 = vmul.f32 1.442695, %v2418_v23  ;;  %v2501_v27 = vmul.f32 1.442695, %v2420_v34  ;;  %v2505_v49 = vmul.f32 1.442695, %v2422_v45 }
 0x7bc   : > { %4232 = vpow2.f32 %v2523_v48  ;;  %v2509_v52 = vmul.f32 1.442695, %v2424_v53  ;;  %v2513_v13 = vmul.f32 1.442695, %v2426_v33  ;;  %v2517_v26 = vmul.f32 1.442695, %v2428_v25 }
 0x7bd   : > { %4234 = vpow2.f32 %v2527_v56  ;;  %v2521_v0 = vmul.f32 1.442695, %v2430_v3  ;;  %v2525_v35 = vmul.f32 1.442695, %v2432_v30  ;;  %v2529_v48 = vmul.f32 1.442695, %v2434_v46 }
 0x7be   : > { %4236 = vpow2.f32 %v2485_v54  ;;  %v7527_v46 = vld [vmem:[#allocation46_spill] sm:$0xff] }
 0x7bf   : > { %v4227_v6 = vpop.eup %4226  ;;  %4238 = vpow2.f32 %v2489_v17  ;;  %v2411_v45 = vsub.f32 %v7527_v46, %v6321_v39 }
 0x7c0   : > { %v4229_v18 = vpop.eup %4228  ;;  %4240 = vpow2.f32 %v2493_v24  ;;  %v7528_v24 = vld [vmem:[#allocation9_spill] sm:$0xff] }
 0x7c1   : > { %v4231_v5 = vpop.eup %4230  ;;  %4242 = vpow2.f32 %v2497_v37  ;;  %v2413_v22 = vsub.f32 %v7528_v24, %v6321_v39 }
 0x7c2   : > { %v4233_v9 = vpop.eup %4232  ;;  %4244 = vpow2.f32 %v2501_v27  ;;  %v2607_v37 = vpack.c.bf16 %v4231_v5, %v4229_v18  ;;  %v2605_v27 = vpack.c.bf16 %v4227_v6, %v4225_v15  ;;  %v7531_v5 = vld [vmem:[#allocation42_spill] sm:$0xff] }
 0x7c3   : > { %v4235_v21 = vpop.eup %4234  ;;  %4246 = vpow2.f32 %v2505_v49  ;;  %v2603_v49 = vpack.c.bf16 %v6434_v2, %v6432_v42  ;;  %v2487_v2 = vmul.f32 1.442695, %v2413_v22 }
 0x7c4   : > { %v6438_v23 = vpop.eup %4236  ;;  %4248 = vpow2.f32 %v2509_v52  ;;  %v2609_v53 = vpack.c.bf16 %v4235_v21, %v4233_v9 }
 0x7c5   : > { %v6440_v34 = vpop.eup %4238  ;;  %4250 = vpow2.f32 %v2513_v13  ;;  %v7529_v13 = vld [vmem:[#allocation45_spill] sm:$0xff] }
 0x7c6   : > { %v6442_v56 = vpop.eup %4240  ;;  %4252 = vpow2.f32 %v2517_v26  ;;  %2629 = vmatpush.bf16.msrb.mxu0 %v2609_v53  ;;  %v2407_v9 = vsub.f32 %v7529_v13, %v6321_v39  ;;  %v2601_v26 = vpack.c.bf16 %v6428_v11, %v6426_v36  ;;  %v2403_v53 = vsub.f32 %v7531_v5, %v6321_v39 }
 0x7c7   : > { %v6444_v54 = vpop.eup %4242  ;;  %4254 = vpow2.f32 %v2521_v0  ;;  %v7530_v0 = vld [vmem:[#allocation36_spill] sm:$0xff] }
 0x7c8   : > { %v6446_v43 = vpop.eup %4244  ;;  %4256 = vpow2.f32 %v2525_v35  ;;  %v2409_v35 = vsub.f32 %v7530_v0, %v6321_v39  ;;  %v2602_v11 = vpack.c.bf16 %v6444_v54, %v6442_v56  ;;  %v2475_v46 = vmul.f32 1.442695, %v2407_v9 }
 0x7c9   : > { %v6448_v25 = vpop.eup %4246  ;;  %4258 = vpow2.f32 %v2529_v48  ;;  %v2483_v48 = vmul.f32 1.442695, %v2411_v45  ;;  %v7532_v45 = vld [vmem:[#allocation38_spill] sm:$0xff]  ;;  %v2465_v9 = vsub.f32 %v6305_v47, %v6321_v39  ;;  %v2459_v47 = vsub.f32 %v6295_v60, %v6321_v39 }
 0x7ca   : > { %v6450_v3 = vpop.eup %4248  ;;  %2630 = vmatpush.bf16.msrb.mxu0 %v2607_v37  ;;  %v2604_v36 = vpack.c.bf16 %v6448_v25, %v6446_v43  ;;  %v2405_v24 = vsub.f32 %v7532_v45, %v6321_v39  ;;  %v2479_v22 = vmul.f32 1.442695, %v2409_v35  ;;  %v2467_v37 = vmul.f32 1.442695, %v2403_v53 }
 0x7cb   : > { %v6452_v30 = vpop.eup %4250  ;;  %4260 = vpow2.f32 %v2483_v48  ;;  %v7534_v35 = vsub.f32 %v6291_v12, %v6321_v39  ;;  %v2591_v12 = vmul.f32 1.442695, %v2465_v9  ;;  %v2464_v43 = vsub.f32 %v6384_v40, %v6392_v58 }
 0x7cc   : > { %v6456_v17 = vpop.eup %4252  ;;  %v2606_v42 = vpack.c.bf16 %v6452_v30, %v6450_v3  ;;  %4262 = vpow2.f32 %v2487_v2  ;;  %v2463_v2 = vsub.f32 %v6301_v63, %v6321_v39  ;;  %v2462_v54 = vsub.f32 %v6378_v20, %v6392_v58 }
 0x7cd   : > { %v6460_v33 = vpop.eup %4254  ;;  %4264 = vpow2.f32 %v2475_v46  ;;  %v2575_v48 = vmul.f32 1.442695, %v7534_v35  ;;  %v2579_v46 = vmul.f32 1.442695, %v2459_v47 }
 0x7ce   : > { %v6464_v52 = vpop.eup %4256  ;;  %v2608_v15 = vpack.c.bf16 %v6460_v33, %v6456_v17  ;;  %2631 = vmatpush.bf16.msrb.mxu0 %v2605_v27  ;;  %4266 = vpow2.f32 %v2479_v22  ;;  %v2573_v27 = vmul.f32 1.442695, %v2456_v19  ;;  %v2587_v5 = vmul.f32 1.442695, %v2463_v2 }
 0x7cf   : > { %v6470_v21 = vpop.eup %4258  ;;  %4268 = vpow2.f32 %v2467_v37 }
 0x7d0   : > { %v2610_v6 = vpack.c.bf16 %v6470_v21, %v6464_v52  ;;  %v2471_v52 = vmul.f32 1.442695, %v2405_v24  ;;  %v7533_v21 = vsub.f32 %v6289_v32, %v6321_v39  ;;  %v2577_v32 = vmul.f32 1.442695, %v2458_v7  ;;  %v6510_v7 = vpop.permute.xlu0 %394  ;;  %v7535_v24 = vld [vmem:[#allocation30_spill] sm:$0xff] }
 0x7d1   : > { %v4261_v13 = vpop.eup %4260 }
 0x7d2   : > { %2632 = vmatpush.bf16.msrb.mxu0 %v2603_v49  ;;  %v2571_v0 = vmul.f32 1.442695, %v7533_v21  ;;  %v4263_v18 = vpop.eup %4262  ;;  %4270 = vpow2.f32 %v2471_v52 }
 0x7d3   : > { %v4265_v49 = vpop.eup %4264  ;;  %v2599_v14 = vpack.c.bf16 %v4263_v18, %v4261_v13  ;;  %v2451_v13 = vsub.f32 %v6282_v59, %v6321_v39 }
 0x7d4   : > { %4272 = vpow2.f32 %v2571_v0  ;;  %v4267_v19 = vpop.eup %4266  ;;  %v2453_v0 = vsub.f32 %v6284_v16, %v6321_v39  ;;  %v2449_v16 = vsub.f32 %v6278_v57, %v6321_v39  ;;  %v2445_v57 = vsub.f32 %v6270_v1, %v6321_v39 }
 0x7d5   : > { %4274 = vpow2.f32 %v2573_v27  ;;  %v4269_v28 = vpop.eup %4268  ;;  %v2597_v53 = vpack.c.bf16 %v4267_v19, %v4265_v49 }
 0x7d6   : > { %2633 = vmatpush.bf16.msrb.mxu0 %v2601_v26  ;;  %v2461_v26 = vsub.f32 %v6297_v10, %v6321_v39  ;;  %4276 = vpow2.f32 %v2575_v48  ;;  %v6518_v10 = vadd.f32 %v7535_v24, %v6510_v7  ;;  %v2447_v48 = vsub.f32 %v6276_v31, %v6321_v39  ;;  %v7537_v31 = vld [vmem:[#allocation49_spill] sm:$0xff] }
 0x7d7   : > { %4278 = vpow2.f32 %v2577_v32  ;;  %v2563_v32 = vmul.f32 1.442695, %v2451_v13  ;;  %v2567_v49 = vmul.f32 1.442695, %v2453_v0  ;;  %v2551_v13 = vmul.f32 1.442695, %v2445_v57 }
 0x7d8   : > { %v4271_v63 = vpop.eup %4270  ;;  %4280 = vpow2.f32 %v2591_v12  ;;  %v2583_v45 = vmul.f32 1.442695, %v2461_v26  ;;  %v2627_v9 = vpack.c.bf16 1.0, %v6518_v10  ;;  %v2410_v12 = vsub.f32 %v7537_v31, %v6392_v58 }
 0x7d9   : > { %4282 = vpow2.f32 %v2587_v5  ;;  %v2595_v37 = vpack.c.bf16 %v4271_v63, %v4269_v28  ;;  %v2443_v26 = vsub.f32 %v6268_v29, %v6321_v39  ;;  %v2555_v28 = vmul.f32 1.442695, %v2447_v48  ;;  %v7542_v48 = vld [vmem:[#allocation28_spill] sm:$0xff] }
 0x7da   : > { %2634 = vmatpush.bf16.msrb.mxu0 %v2599_v14  ;;  %v6512_v18 = vpop.eup %4272  ;;  %4284 = vpow2.f32 %v2579_v46  ;;  %v7536_v14 = vld [vmem:[#allocation47_spill] sm:$0xff]  ;;  %v2559_v5 = vmul.f32 1.442695, %v2449_v16  ;;  %v2481_v46 = vmul.f32 1.442695, %v2410_v12 }
 0x7db   : > { %v6514_v60 = vpop.eup %4274  ;;  %4286 = vpow2.f32 %v2583_v45  ;;  %v2408_v19 = vsub.f32 %v7536_v14, %v6392_v58  ;;  %v7540_v45 = vld [vmem:[#allocation43_spill] sm:$0xff]  ;;  %v2547_v24 = vmul.f32 1.442695, %v2443_v26 }
 0x7dc   : > { %v4277_v22 = vpop.eup %4276  ;;  %4288 = vpow2.f32 %v2563_v32  ;;  %v2439_v1 = vsub.f32 %v7540_v45, %v6321_v39  ;;  %v2435_v32 = vsub.f32 %v7542_v48, %v6321_v39  ;;  %v7543_v16 = vld [vmem:[#allocation39_spill] sm:$0xff] }
 0x7dd   : > { %v6520_v52 = vpop.eup %4278  ;;  %v2621_v21 = vpack.c.bf16 %v4277_v22, %v6512_v18  ;;  %4290 = vpow2.f32 %v2567_v49  ;;  %v2477_v17 = vmul.f32 1.442695, %v2408_v19  ;;  %v6554_v18 = vpop.permute.xlu1 %359  ;;  %v7541_v22 = vld [vmem:[#allocation40_spill] sm:$0xff]  ;;  %v2437_v49 = vsub.f32 %v7543_v16, %v6321_v39  ;;  %v7544_v12 = vld [vmem:[#allocation7_spill] sm:$0xff] }
 0x7de   : > { %2635 = vmatpush.bf16.msrb.mxu0 %v2597_v53  ;;  %v2622_v27 = vpack.c.bf16 %v6520_v52, %v6514_v60  ;;  %v4281_v35 = vpop.eup %4280  ;;  %v7538_v53 = vld [vmem:[#allocation48_spill] sm:$0xff]  ;;  %4292 = vpow2.f32 %v2555_v28  ;;  %v516_v56 = vadd.f32 %v7544_v12, %v6554_v18  ;;  %v7545_v28 = vpack.c.bf16 %v6440_v34, %v6438_v23 }
 0x7df   : > { %v4283_v59 = vpop.eup %4282  ;;  %v2404_v63 = vsub.f32 %v7538_v53, %v6392_v58  ;;  %4294 = vpow2.f32 %v2559_v5  ;;  %v2535_v40 = vmul.f32 1.442695, %v2437_v49  ;;  %v2452_v34 = vsub.f32 %v6353_v61, %v6392_v58 }
 0x7e0   : > { %v4285_v2 = vpop.eup %4284  ;;  %v2625_v47 = vpack.c.bf16 %v4281_v35, %v4283_v59  ;;  %4296 = vpow2.f32 %v2477_v17  ;;  %v2539_v59 = vmul.f32 1.442695, %v2439_v1  ;;  %v2448_v61 = vsub.f32 %v6339_v8, %v6392_v58 }
 0x7e1   : > { %v2469_v3 = vmul.f32 1.442695, %v2404_v63  ;;  %4298 = vpow2.f32 %v2481_v46  ;;  %v2446_v8 = vsub.f32 %v6335_v50, %v6392_v58  ;;  %v7547_v50 = vld [vmem:[#allocation44_spill] sm:$0xff] }
 0x7e2   : > { %2636 = vmatpush.bf16.msrb.mxu0 %v2595_v37  ;;  %2643 = vmatpush.bf16.msra.mxu1 %v2625_v47  ;;  %v2441_v37 = vsub.f32 %v7541_v22, %v6321_v39  ;;  %4300 = vpow2.f32 %v2547_v24  ;;  %v2531_v47 = vmul.f32 1.442695, %v2435_v32  ;;  %v2454_v24 = vsub.f32 %v6361_v41, %v6392_v58 }
 0x7e3   : > { %4302 = vpow2.f32 %v2551_v13  ;;  %v2450_v41 = vsub.f32 %v6345_v38, %v6392_v58 }
 0x7e4   : > { %4304 = vpow2.f32 %v2469_v3  ;;  %v7546_v3 = vld [vmem:[#allocation29_spill] sm:$0xff] }
 0x7e5   : > { %2637 = vmatmul.bf16.vlgmr.msrb.gmra.mxu0 %v2627_v9  ;;  %v2561_v10 = vmul.f32 1.442695, %v2450_v41 }
 0x7e6   : > { %2657 = vmatpush.bf16.msra.mxu0 %v2610_v6  ;;  %v4287_v6 = vpop.eup %4286 }
 0x7e7   : > { %v2623_v33 = vpack.c.bf16 %v4287_v6, %v4285_v2  ;;  %v4289_v0 = vpop.eup %4288  ;;  %v2543_v2 = vmul.f32 1.442695, %v2441_v37  ;;  %v2460_v6 = vsub.f32 %v6376_v55, %v6392_v58 }
 0x7e8   : > { %v4291_v30 = vpop.eup %4290 }
 0x7e9   : > { %2644 = vmatpush.bf16.msra.mxu1 %v2623_v33  ;;  %v4293_v14 = vpop.eup %4292  ;;  %v2619_v25 = vpack.c.bf16 %v4291_v30, %v4289_v0  ;;  %v2581_v63 = vmul.f32 1.442695, %v2460_v6  ;;  %v2717_v33 = vpack.c.bf16 %v516_v56, %v516_v56  ;;  %v6594_v30 = vadd.f32 %v7546_v3, %v6510_v7 }
 0x7ea   : > { %2658 = vmatpush.bf16.msra.mxu0 %v2608_v15  ;;  %v7539_v15 = vld [vmem:[#allocation50_spill] sm:$0xff]  ;;  %v2444_v7 = vsub.f32 %v6328_v62, %v6392_v58  ;;  %v2442_v62 = vsub.f32 %v6319_v4, %v6392_v58 }
 0x7eb   : > { %v2406_v29 = vsub.f32 %v7539_v15, %v6392_v58  ;;  %v2585_v15 = vmul.f32 1.442695, %v2462_v54  ;;  %v2859_v37 = vsel %vm718_vm1, %v2717_v33, 0  ;;  %v2628_v49 = vpack.c.bf16 1.0, %v6594_v30 }
 0x7ec   : > { %v2545_v6 = vmul.f32 1.442695, %v2442_v62 }
 0x7ed   : > { %v2473_v35 = vmul.f32 1.442695, %v2406_v29  ;;  %2645 = vmatpush.bf16.msra.mxu1 %v2621_v21  ;;  %v6574_v21 = vpop.trf.xlu1 }
 0x7ee   : > { %2659 = vmatpush.bf16.msra.mxu0 %v2606_v42  ;;  %v2466_v42 = vsub.f32 %v6388_v44, %v6392_v58  ;;  %v4295_v44 = vpop.eup %4294 }
 0x7ef   : > { %4306 = vpow2.f32 %v2473_v35  ;;  %v4297_v19 = vpop.eup %4296  ;;  %v2617_v26 = vpack.c.bf16 %v4295_v44, %v4293_v14  ;;  %v2569_v35 = vmul.f32 1.442695, %v2454_v24  ;;  %v2440_v14 = vsub.f32 %v6316_v51, %v6392_v58  ;;  %v7548_v51 = vld [vmem:[#allocation51_spill] sm:$0xff] }
 0x7f0   : > { %4308 = vpow2.f32 %v2539_v59  ;;  %v4299_v39 = vpop.eup %4298 }
 0x7f1   : > { %2646 = vmatpush.bf16.msra.mxu1 %v2619_v25  ;;  %4310 = vpow2.f32 %v2543_v2  ;;  %v4301_v31 = vpop.eup %4300  ;;  %v2598_v55 = vpack.c.bf16 %v4299_v39, %v4297_v19  ;;  %v2557_v2 = vmul.f32 1.442695, %v2448_v61  ;;  %v2553_v25 = vmul.f32 1.442695, %v2446_v8 }
 0x7f2   : > { %2660 = vmatpush.bf16.msra.mxu0 %v2604_v36  ;;  %v2593_v36 = vmul.f32 1.442695, %v2466_v42  ;;  %v4303_v57 = vpop.eup %4302  ;;  %v2565_v42 = vmul.f32 1.442695, %v2452_v34  ;;  %v2436_v19 = vsub.f32 %v7547_v50, %v6392_v58  ;;  %v2438_v39 = vsub.f32 %v7548_v51, %v6392_v58 }
 0x7f3   : > { %v4305_v5 = vpop.eup %4304  ;;  %v2615_v20 = vpack.c.bf16 %v4303_v57, %v4301_v31 }
 0x7f4   : > { %4312 = vpow2.f32 %v2593_v36  ;;  %v2533_v12 = vmul.f32 1.442695, %v2436_v19  ;;  %v2537_v54 = vmul.f32 1.442695, %v2438_v39 }
 0x7f5   : > { %4314 = vpow2.f32 %v2531_v47  ;;  %2647 = vmatpush.bf16.msra.mxu1 %v2617_v26  ;;  %v4307_v53 = vpop.eup %4306  ;;  %v6587_v1 = vpop.trf.xlu1  ;;  %v2541_v47 = vmul.f32 1.442695, %v2440_v14 }
 0x7f6   : > { %2661 = vmatpush.bf16.msra.mxu0 %v2602_v11  ;;  %v2589_v11 = vmul.f32 1.442695, %v2464_v43  ;;  %4316 = vpow2.f32 %v2535_v40  ;;  %v4309_v17 = vpop.eup %4308  ;;  %v2596_v46 = vpack.c.bf16 %v4307_v53, %v4305_v5  ;;  %v2549_v43 = vmul.f32 1.442695, %v2444_v7 }
 0x7f7   : > { %v4311_v29 = vpop.eup %4310 }
 0x7f8   : > { %4318 = vpow2.f32 %v2589_v11  ;;  %v2613_v22 = vpack.c.bf16 %v4311_v29, %v4309_v17 }
 0x7f9   : > { %2648 = vmatpush.bf16.msra.mxu1 %v2615_v20  ;;  %4320 = vpow2.f32 %v2581_v63 }
 0x7fa   : > { %2662 = vmatpush.bf16.msra.mxu0 %v7545_v28  ;;  %v4313_v23 = vpop.eup %4312  ;;  %4322 = vpow2.f32 %v2585_v15  ;;  %v7549_v28 = vld [vmem:[#allocation8_spill] sm:$0xff] }
 0x7fb   : > { %v4315_v45 = vpop.eup %4314  ;;  %4324 = vpow2.f32 %v2565_v42  ;;  %v555_v57 = vadd.f32 %v7549_v28, %v6554_v18 }
 0x7fc   : > { %v4317_v13 = vpop.eup %4316  ;;  %4326 = vpow2.f32 %v2569_v35 }
 0x7fd   : > { %2649 = vmatpush.bf16.msra.mxu1 %v2613_v22  ;;  %v2611_v48 = vpack.c.bf16 %v4317_v13, %v4315_v45  ;;  %4328 = vpow2.f32 %v2557_v2  ;;  %v2718_v17 = vpack.c.bf16 %v555_v57, %v555_v57 }
 0x7fe   : > { %2663 = vmatpush.bf16.msra.mxu0 %v2598_v55  ;;  %v4319_v0 = vpop.eup %4318  ;;  %4330 = vpow2.f32 %v2561_v10 }
 0x7ff   : > { %v4321_v32 = vpop.eup %4320  ;;  %v2626_v59 = vpack.c.bf16 %v4313_v23, %v4319_v0  ;;  %4332 = vpow2.f32 %v2549_v43  ;;  %v2862_v15 = vsel %vm718_vm1, %v2718_v17, 0 }
 0x800   : > { %v4323_v16 = vpop.eup %4322  ;;  %4334 = vpow2.f32 %v2553_v25 }
 0x801   : > { %2650 = vmatpush.bf16.msra.mxu1 %v2611_v48  ;;  %v2624_v38 = vpack.c.bf16 %v4323_v16, %v4321_v32  ;;  %v4325_v44 = vpop.eup %4324  ;;  %4336 = vpow2.f32 %v2541_v47 }
 0x802   : > { %2664 = vmatpush.bf16.msra.mxu0 %v2596_v46  ;;  %v4327_v36 = vpop.eup %4326  ;;  %4338 = vpow2.f32 %v2545_v6 }
 0x803   : > { %v4329_v40 = vpop.eup %4328  ;;  %v2620_v4 = vpack.c.bf16 %v4327_v36, %v4325_v44  ;;  %4340 = vpow2.f32 %v2533_v12 }
 0x804   : > { %2651 = vmatmul.bf16.vlgmr.msra.gmra.mxu1 %v2628_v49  ;;  %v4331_v31 = vpop.eup %4330  ;;  %4342 = vpow2.f32 %v2537_v54 }
 0x805   : > { %2665 = vmatmul.bf16.vlgmr.msra.gmra.mxu0 %v2627_v9  ;;  %2671 = vmatpush.bf16.msrb.mxu1 %v2626_v59  ;;  %v2796_v9 = vpop.trf.xlu1  ;;  %v4333_v60 = vpop.eup %4332  ;;  %v2618_v52 = vpack.c.bf16 %v4331_v31, %v4329_v40 }
 0x806   : > { %2871 = vmatpush.bf16.msrb.mxu0 %v2859_v37 }
 0x809   : > { %2672 = vmatpush.bf16.msrb.mxu1 %v2624_v38 }
 0x80d   : > { %2673 = vmatpush.bf16.msrb.mxu1 %v2622_v27  ;;  %v6620_v56 = vpop.trf.xlu1  ;;  %v4335_v27 = vpop.eup %4334 }
 0x80e   : > { %v4337_v58 = vpop.eup %4336  ;;  %v2616_v11 = vpack.c.bf16 %v4335_v27, %v4333_v60 }
 0x80f   : > { %v4339_v26 = vpop.eup %4338 }
 0x810   : > { %v4341_v5 = vpop.eup %4340  ;;  %v2614_v55 = vpack.c.bf16 %v4339_v26, %v4337_v58 }
 0x811   : > { %2674 = vmatpush.bf16.msrb.mxu1 %v2620_v4  ;;  %v4343_v53 = vpop.eup %4342 }
 0x812   : > { %v2612_v33 = vpack.c.bf16 %v4343_v53, %v4341_v5  ;;  %v2726_v5 = vld [vmem:[#allocation2 + $0x620] sm:$0xff] }
 0x813   : > { %v2722_v53 = vld [vmem:[#allocation2 + $0x600] sm:$0xff] }
 0x815   : > { %3857 = vmatmul.msk.bf16.vlgmr.msrb.gmra.mxu0 %vm669_vm2, %v6574_v21  ;;  %2675 = vmatpush.bf16.msrb.mxu1 %v2618_v52  ;;  %v2798_v63 = vpop.trf.xlu1 }
 0x819   : > { %2676 = vmatpush.bf16.msrb.mxu1 %v2616_v11 }
 0x81d   : > { %2677 = vmatpush.bf16.msrb.mxu1 %v2614_v55  ;;  %v6626_v20 = vpop.trf.xlu1 }
 0x821   : > { %2678 = vmatpush.bf16.msrb.mxu1 %v2612_v33 }
 0x824   : > { %2679 = vmatmul.bf16.vlgmr.msrb.gmra.mxu1 %v2628_v49 }
 0x825   : > { %3858 = vmatmul.msk.bf16.gmra.mxu0 %vm669_vm2, %v2796_v9  ;;  %2960 = vmatpush.bf16.msra.mxu1 %v2862_v15  ;;  %v2800_v29 = vpop.trf.xlu1  ;;  %v2734_v15 = vld [vmem:[#allocation2 + $0x660] sm:$0xff] }
 0x82d   : > { %v6631_v18 = vpop.trf.xlu1 }
 0x834   : > { %3873 = vmatmul.msk.bf16.vlgmr.msra.gmra.mxu1 %vm669_vm2, %v6574_v21 }
 0x835   : > { %3859 = vmatmul.msk.bf16.gmra.mxu0 %vm669_vm2, %v2798_v63  ;;  %v2802_v46 = vpop.trf.xlu1 }
 0x83d   : > { %v6635_v23 = vpop.trf.xlu1 }
 0x844   : > { %3874 = vmatmul.msk.bf16.gmra.mxu1 %vm669_vm2, %v2796_v9 }
 0x845   : > { %3860 = vmatmul.msk.bf16.gmra.mxu0 %vm669_vm2, %v2800_v29  ;;  %v2804_v34 = vpop.trf.xlu1 }
 0x84d   : > { %v6640_v45 = vpop.trf.xlu1 }
 0x854   : > { %3875 = vmatmul.msk.bf16.gmra.mxu1 %vm669_vm2, %v2798_v63  ;;  %v2730_v63 = vld [vmem:[#allocation2 + $0x640] sm:$0xff] }
 0x855   : > { %3861 = vmatmul.msk.bf16.gmra.mxu0 %vm669_vm2, %v2802_v46  ;;  %v2806_v21 = vpop.trf.xlu1 }
 0x85d   : > { %v6645_v22 = vpop.trf.xlu1 }
 0x862   : > { %v2638_v24 = vpop.f32.mrf.mxu0 }
 0x864   : > { %3876 = vmatmul.msk.bf16.gmra.mxu1 %vm669_vm2, %v2800_v29 }
 0x865   : > { %3862 = vmatmul.msk.bf16.gmra.mxu0 %vm669_vm2, %v2804_v34  ;;  %v2808_v13 = vpop.trf.xlu1 }
 0x86a   : > { %v2640_v37 = vpop.f32.mrf.mxu0 }
 0x874   : > { %3877 = vmatmul.msk.bf16.gmra.mxu1 %vm669_vm2, %v2802_v46 }
 0x875   : > { %3863 = vmatmul.msk.bf16.gmra.mxu0 %vm669_vm2, %v2806_v21 }
 0x881   : > { %v2652_v3 = vpop.f32.mrf.mxu1 }
 0x882   : > { %v2666_v0 = vpop.f32.mrf.mxu0  ;;  %v2653_v30 = vadd.f32 %v2652_v3, %v2638_v24  ;;  %v2728_v24 = vld [vmem:[#allocation2 + $0x630] sm:$0xff] }
 0x883   : > { %v2732_v3 = vld [vmem:[#allocation2 + $0x650] sm:$0xff] }
 0x884   : > { %3878 = vmatmul.msk.bf16.gmra.mxu1 %vm669_vm2, %v2804_v34 }
 0x885   : > { %3864 = vmatmul.msk.bf16.gmra.mxu0 %vm669_vm2, %v2808_v13 }
 0x889   : > { %v2654_v42 = vpop.f32.mrf.mxu1 }
 0x88a   : > { %v2668_v61 = vpop.f32.mrf.mxu0  ;;  %v2655_v41 = vadd.f32 %v2654_v42, %v2640_v37  ;;  %v2738_v37 = vld [vmem:[#allocation2 + $0x680] sm:$0xff] }
 0x88c   : > { %4344 = vrcp.f32 %v2655_v41  ;;  %v2696_v16 = vand.u32 2147483648, %v2655_v41  ;;  %v2694_v7 = vand.u32 2147483647, %v2655_v41  ;;  %vm2690_vm6 = vweird.f32 %v2655_v41 }
 0x88e   : > { %v2697_v10 = vor.u32 1.1754944e-38, %v2696_v16  ;;  %vm2695_vm8 = vcmp.eq.f32.partialorder %v2694_v7, 8.507059e+37  ;;  %v2740_v7 = vld [vmem:[#allocation2 + $0x690] sm:$0xff] }
 0x892   : > { %v2873_v35 = vpop.f32.mrf.mxu0  ;;  %v4345_v48 = vpop.eup %4344 }
 0x893   : > { %v2686_v32 = vmul.f32 %v4345_v48, %v2655_v41  ;;  %vm2691_vm1 = vweird.f32 %v4345_v48  ;;  %v6675_v29 = vadd.f32 %v2873_v35, %v2722_v53  ;;  %v2736_v35 = vld [vmem:[#allocation2 + $0x670] sm:$0xff] }
 0x894   : > { %3879 = vmatmul.msk.bf16.gmra.mxu1 %vm669_vm2, %v2806_v21  ;;  %vm2692_vm7 = vmor %vm2690_vm6, %vm2691_vm1  ;;  %v2744_v53 = vld [vmem:[#allocation2 + $0x6b0] sm:$0xff] }
 0x895   : > { %3865 = vmatmul.msk.bf16.gmra.mxu0 %vm669_vm2, %v6587_v1  ;;  %v2687_v59 = vsub.f32 1.0, %v2686_v32  ;;  %7553 = vst [vmem:[#allocation27_spill] sm:$0xff] %v6675_v29 }
 0x897   : > { %v2688_v49 = vmul.f32 %v4345_v48, %v2687_v59 }
 0x899   : > { %v2689_v8 = vadd.f32 %v4345_v48, %v2688_v49 }
 0x89a   : > { %v6652_v2 = vpop.f32.mrf.mxu0 }
 0x89b   : > { %v2693_v38 = vsel %vm2692_vm7, %v4345_v48, %v2689_v8  ;;  %v2727_v8 = vld [vmem:[#allocation2 + $0x628] sm:$0xff] }
 0x89c   : > { %v2698_v9 = vsel %vm2695_vm8, %v2697_v10, %v2693_v38 }
 0x89d   : > { %v2713_v14 = vperm.slane %v2698_v9, 0 }
 0x89f   : > { %v6656_v62 = vmul.f32 %v2713_v14, %v2653_v30  ;;  %v2731_v14 = vld [vmem:[#allocation2 + $0x648] sm:$0xff] }
 0x8a1   : > { %v2680_v43 = vpop.f32.mrf.mxu1  ;;  %7550 = vst [vmem:[#allocation52_spill] sm:$0xff] %v6656_v62 }
 0x8a2   : > { %v2681_v25 = vadd.f32 %v2680_v43, %v2666_v0  ;;  %v2878_v44 = vpop.f32.mrf.mxu0  ;;  %v2724_v0 = vld [vmem:[#allocation2 + $0x610] sm:$0xff] }
 0x8a3   : > { %v6673_v33 = vadd.f32 %v2878_v44, %v2726_v5  ;;  %v6694_v48 = vadd.f32 %v6652_v2, %v2724_v0 }
 0x8a4   : > { %3880 = vmatmul.msk.bf16.gmra.mxu1 %vm669_vm2, %v2808_v13 }
 0x8a5   : > { %3866 = vmatmul.msk.bf16.gmra.mxu0 %vm669_vm2, %v6620_v56  ;;  %7552 = vst [vmem:[#allocation5_spill] sm:$0xff] %v6673_v33  ;;  %v3042_v34 = vmax.f32 %v6675_v29, %v6673_v33  ;;  %v2768_v33 = vld [vmem:[#allocation2 + $0x770] sm:$0xff] }
 0x8a6   : > { %7556 = vst [vmem:[#allocation11_spill] sm:$0xff] %v6694_v48 }
 0x8a9   : > { %v2682_v36 = vpop.f32.mrf.mxu1 }
 0x8aa   : > { %v2683_v50 = vadd.f32 %v2682_v36, %v2668_v61  ;;  %v2880_v19 = vpop.f32.mrf.mxu0 }
 0x8ab   : > { %v6686_v61 = vadd.f32 %v2880_v19, %v2728_v24  ;;  %v2735_v19 = vld [vmem:[#allocation2 + $0x668] sm:$0xff] }
 0x8ac   : > { %4346 = vrcp.f32 %v2683_v50  ;;  %v2710_v4 = vand.u32 2147483648, %v2683_v50  ;;  %v2708_v12 = vand.u32 2147483647, %v2683_v50  ;;  %vm2704_vm10 = vweird.f32 %v2683_v50  ;;  %v2739_v24 = vld [vmem:[#allocation2 + $0x688] sm:$0xff] }
 0x8ad   : > { %7555 = vst [vmem:[#allocation53_spill] sm:$0xff] %v6686_v61  ;;  %v3043_v16 = vmax.f32 %v6694_v48, %v6686_v61  ;;  %v2766_v61 = vld [vmem:[#allocation2 + $0x760] sm:$0xff] }
 0x8ae   : > { %v2711_v52 = vor.u32 1.1754944e-38, %v2710_v4  ;;  %vm2709_vm12 = vcmp.eq.f32.partialorder %v2708_v12, 8.507059e+37 }
 0x8b1   : > { %v6659_v47 = vpop.f32.mrf.mxu1 }
 0x8b2   : > { %v4347_v51 = vpop.eup %4346  ;;  %v2883_v39 = vpop.f32.mrf.mxu0 }
 0x8b3   : > { %v2700_v6 = vmul.f32 %v4347_v51, %v2683_v50  ;;  %vm2705_vm9 = vweird.f32 %v4347_v51  ;;  %v6677_v46 = vadd.f32 %v2883_v39, %v2730_v63  ;;  %v2742_v39 = vld [vmem:[#allocation2 + $0x6a0] sm:$0xff] }
 0x8b4   : > { %3881 = vmatmul.msk.bf16.gmra.mxu1 %vm669_vm2, %v6587_v1  ;;  %vm2706_vm11 = vmor %vm2704_vm10, %vm2705_vm9 }
 0x8b5   : > { %3867 = vmatmul.msk.bf16.gmra.mxu0 %vm669_vm2, %v6626_v20  ;;  %v2701_v40 = vsub.f32 1.0, %v2700_v6  ;;  %7554 = vst [vmem:[#allocation54_spill] sm:$0xff] %v6677_v46  ;;  %v2729_v6 = vld [vmem:[#allocation2 + $0x638] sm:$0xff] }
 0x8b7   : > { %v2702_v31 = vmul.f32 %v4347_v51, %v2701_v40 }
 0x8b9   : > { %v2703_v54 = vadd.f32 %v4347_v51, %v2702_v31  ;;  %v6665_v60 = vpop.f32.mrf.mxu1 }
 0x8ba   : > { %v2885_v27 = vpop.f32.mrf.mxu0 }
 0x8bb   : > { %v2707_v58 = vsel %vm2706_vm11, %v4347_v51, %v2703_v54  ;;  %v6696_v32 = vadd.f32 %v2885_v27, %v2732_v3  ;;  %v2725_v54 = vld [vmem:[#allocation2 + $0x618] sm:$0xff] }
 0x8bc   : > { %v2712_v11 = vsel %vm2709_vm12, %v2711_v52, %v2707_v58 }
 0x8bd   : > { %v2714_v26 = vperm.slane %v2712_v11, 0  ;;  %7557 = vst [vmem:[#allocation6_spill] sm:$0xff] %v6696_v32  ;;  %v3045_v10 = vmax.f32 %v3043_v16, %v6696_v32 }
 0x8bf   : > { %v6667_v28 = vmul.f32 %v2714_v26, %v2681_v25  ;;  %v6731_v26 = vadd.f32 %v6665_v60, %v2725_v54 }
 0x8c1   : > { %7551 = vst [vmem:[#allocation10_spill] sm:$0xff] %v6667_v28  ;;  %v2967_v57 = vpop.f32.mrf.mxu1  ;;  %v2760_v28 = vld [vmem:[#allocation2 + $0x730] sm:$0xff] }
 0x8c2   : > { %v2888_v1 = vpop.f32.mrf.mxu0  ;;  %v6707_v25 = vadd.f32 %v2967_v57, %v2727_v8  ;;  %7561 = vst [vmem:[#allocation19_spill] sm:$0xff] %v6731_v26 }
 0x8c3   : > { %v6681_v21 = vadd.f32 %v2888_v1, %v2734_v15  ;;  %v2737_v1 = vld [vmem:[#allocation2 + $0x678] sm:$0xff] }
 0x8c4   : > { %3882 = vmatmul.msk.bf16.gmra.mxu1 %vm669_vm2, %v6620_v56  ;;  %v3044_v56 = vmax.f32 %v3042_v34, %v6677_v46  ;;  %7558 = vst [vmem:[#allocation13_spill] sm:$0xff] %v6707_v25 }
 0x8c5   : > { %3868 = vmatmul.msk.bf16.gmra.mxu0 %vm669_vm2, %v6631_v18 }
 0x8c6   : > { %v3046_v42 = vmax.f32 %v3044_v56, %v6681_v21 }
 0x8c9   : > { %v2969_v55 = vpop.f32.mrf.mxu1 }
 0x8ca   : > { %v2890_v17 = vpop.f32.mrf.mxu0  ;;  %v6724_v27 = vadd.f32 %v2969_v55, %v2729_v6  ;;  %v2758_v6 = vld [vmem:[#allocation2 + $0x720] sm:$0xff] }
 0x8cb   : > { %v6701_v49 = vadd.f32 %v2890_v17, %v2736_v35  ;;  %v2741_v35 = vld [vmem:[#allocation2 + $0x698] sm:$0xff] }
 0x8cc   : > { %7560 = vst [vmem:[#allocation17_spill] sm:$0xff] %v6724_v27  ;;  %v3080_v5 = vmax.f32 %v6731_v26, %v6724_v27  ;;  %v2762_v27 = vld [vmem:[#allocation2 + $0x740] sm:$0xff] }
 0x8cd   : > { %v3047_v2 = vmax.f32 %v3045_v10, %v6701_v49 }
 0x8d1   : > { %v2972_v13 = vpop.f32.mrf.mxu1 }
 0x8d2   : > { %v2893_v30 = vpop.f32.mrf.mxu0  ;;  %v6713_v50 = vadd.f32 %v2972_v13, %v2731_v14  ;;  %v2809_v14 = vpop.trf.xlu1 }
 0x8d3   : > { %v6689_v41 = vadd.f32 %v2893_v30, %v2738_v37  ;;  %v2746_v37 = vld [vmem:[#allocation2 + $0x6c0] sm:$0xff] }
 0x8d4   : > { %3883 = vmatmul.msk.bf16.gmra.mxu1 %vm669_vm2, %v6626_v20  ;;  %v2723_v20 = vld [vmem:[#allocation2 + $0x608] sm:$0xff] }
 0x8d5   : > { %3869 = vmatmul.msk.bf16.gmra.mxu0 %vm669_vm2, %v6635_v23  ;;  %v3048_v59 = vmax.f32 %v3046_v42, %v6689_v41  ;;  %v6711_v36 = vadd.f32 %v6659_v47, %v2723_v20  ;;  %v2733_v47 = vld [vmem:[#allocation2 + $0x658] sm:$0xff]  ;;  %v2743_v20 = vld [vmem:[#allocation2 + $0x6a8] sm:$0xff] }
 0x8d7   : > { %7559 = vst [vmem:[#allocation15_spill] sm:$0xff] %v6711_v36  ;;  %v3079_v51 = vmax.f32 %v6711_v36, %v6707_v25  ;;  %v2764_v25 = vld [vmem:[#allocation2 + $0x750] sm:$0xff] }
 0x8d9   : > { %v2974_v38 = vpop.f32.mrf.mxu1  ;;  %v3081_v4 = vmax.f32 %v3079_v51, %v6713_v50 }
 0x8da   : > { %v2895_v9 = vpop.f32.mrf.mxu0  ;;  %v6733_v57 = vadd.f32 %v2974_v38, %v2733_v47 }
 0x8db   : > { %v6705_v43 = vadd.f32 %v2895_v9, %v2740_v7 }
 0x8dc   : > { %v3082_v55 = vmax.f32 %v3080_v5, %v6733_v57  ;;  %v2747_v5 = vld [vmem:[#allocation2 + $0x6c8] sm:$0xff] }
 0x8dd   : > { %v3049_v44 = vmax.f32 %v3047_v2, %v6705_v43  ;;  %v2750_v2 = vld [vmem:[#allocation2 + $0x6e0] sm:$0xff] }
 0x8e1   : > { %v2977_v40 = vpop.f32.mrf.mxu1 }
 0x8e2   : > { %v6720_v31 = vadd.f32 %v2977_v40, %v2735_v19  ;;  %v2898_v12 = vpop.f32.mrf.mxu0  ;;  %v2745_v40 = vld [vmem:[#allocation2 + $0x6b8] sm:$0xff] }
 0x8e3   : > { %v6722_v52 = vadd.f32 %v2898_v12, %v2742_v39 }
 0x8e4   : > { %v3083_v58 = vmax.f32 %v3081_v4, %v6720_v31  ;;  %3884 = vmatmul.msk.bf16.gmra.mxu1 %vm669_vm2, %v6631_v18  ;;  %v2752_v4 = vld [vmem:[#allocation2 + $0x6f0] sm:$0xff] }
 0x8e5   : > { %3870 = vmatmul.msk.bf16.gmra.mxu0 %vm669_vm2, %v6640_v45  ;;  %v3050_v11 = vmax.f32 %v3048_v59, %v6722_v52  ;;  %v2748_v59 = vld [vmem:[#allocation2 + $0x6d0] sm:$0xff] }
 0x8e9   : > { %v2979_v63 = vpop.f32.mrf.mxu1 }
 0x8ea   : > { %v6738_v17 = vadd.f32 %v2979_v63, %v2737_v1  ;;  %v2900_v15 = vpop.f32.mrf.mxu0 }
 0x8eb   : > { %v6740_v34 = vadd.f32 %v2900_v15, %v2744_v53  ;;  %v2749_v15 = vld [vmem:[#allocation2 + $0x6d8] sm:$0xff] }
 0x8ec   : > { %v3084_v18 = vmax.f32 %v3082_v55, %v6738_v17 }
 0x8ed   : > { %v3051_v60 = vmax.f32 %v3049_v44, %v6740_v34 }
 0x8f1   : > { %v2982_v56 = vpop.f32.mrf.mxu1 }
 0x8f2   : > { %v6746_v13 = vadd.f32 %v2982_v56, %v2739_v24  ;;  %v2903_v0 = vpop.f32.mrf.mxu0  ;;  %v2751_v56 = vld [vmem:[#allocation2 + $0x6e8] sm:$0xff] }
 0x8f3   : > { %v6748_v3 = vadd.f32 %v2903_v0, %v2746_v37 }
 0x8f4   : > { %v3085_v30 = vmax.f32 %v3083_v58, %v6746_v13  ;;  %3885 = vmatmul.msk.bf16.gmra.mxu1 %vm669_vm2, %v6635_v23 }
 0x8f5   : > { %3871 = vmatmul.msk.bf16.gmra.mxu0 %vm669_vm2, %v6645_v22  ;;  %v6754_v42 = vmax.f32 %v3050_v11, %v6748_v3 }
 0x8f9   : > { %v2984_v16 = vpop.f32.mrf.mxu1 }
 0x8fa   : > { %v6756_v7 = vadd.f32 %v2984_v16, %v2741_v35  ;;  %v2905_v8 = vpop.f32.mrf.mxu0  ;;  %v2753_v16 = vld [vmem:[#allocation2 + $0x6f8] sm:$0xff] }
 0x8fb   : > { %v6758_v10 = vadd.f32 %v2905_v8, %v2748_v59 }
 0x8fc   : > { %v3086_v38 = vmax.f32 %v3084_v18, %v6756_v7 }
 0x8fd   : > { %v6762_v9 = vmax.f32 %v3051_v60, %v6758_v10 }
 0x901   : > { %v2987_v23 = vpop.f32.mrf.mxu1 }
 0x902   : > { %v6765_v44 = vadd.f32 %v2987_v23, %v2743_v20  ;;  %v2908_v19 = vpop.f32.mrf.mxu0 }
 0x903   : > { %v6767_v51 = vadd.f32 %v2908_v19, %v2750_v2 }
 0x904   : > { %v3087_v39 = vmax.f32 %v3085_v30, %v6765_v44  ;;  %3886 = vmatmul.msk.bf16.gmra.mxu1 %vm669_vm2, %v6640_v45 }
 0x905   : > { %3872 = vmatmul.msk.bf16.gmra.mxu0 %vm669_vm2, %v2809_v14  ;;  %v7568_v32 = vmax.f32 %v6754_v42, %v6767_v51  ;;  %v2774_v42 = vld [vmem:[#allocation2 + $0x7a0] sm:$0xff] }
 0x909   : > { %v2989_v12 = vpop.f32.mrf.mxu1 }
 0x90a   : > { %v6774_v54 = vadd.f32 %v2989_v12, %v2745_v40  ;;  %v2910_v47 = vpop.f32.mrf.mxu0 }
 0x90b   : > { %v6776_v58 = vadd.f32 %v2910_v47, %v2752_v4 }
 0x90c   : > { %v3088_v11 = vmax.f32 %v3086_v38, %v6774_v54 }
 0x90d   : > { %v3055_v1 = vmax.f32 %v6762_v9, %v6776_v58  ;;  %v2756_v9 = vld [vmem:[#allocation2 + $0x710] sm:$0xff] }
 0x911   : > { %v2992_v53 = vpop.f32.mrf.mxu1 }
 0x912   : > { %v6781_v63 = vadd.f32 %v2992_v53, %v2747_v5  ;;  %v2913_v45 = vpop.f32.mrf.mxu0 }
 0x914   : > { %7562 = vst [vmem:[#allocation21_spill] sm:$0xff] %v6781_v63  ;;  %v6784_v55 = vmax.f32 %v3087_v39, %v6781_v63  ;;  %3887 = vmatmul.msk.bf16.gmra.mxu1 %vm669_vm2, %v6645_v22 }
 0x919   : > { %v2994_v18 = vpop.f32.mrf.mxu1 }
 0x91a   : > { %v6788_v60 = vadd.f32 %v2994_v18, %v2749_v15  ;;  %v2915_v24 = vpop.f32.mrf.mxu0 }
 0x91b   : > { %v6824_v36 = vadd.f32 %v2915_v24, %v2756_v9  ;;  %v2770_v24 = vld [vmem:[#allocation2 + $0x780] sm:$0xff]  ;;  %v2772_v9 = vld [vmem:[#allocation2 + $0x790] sm:$0xff] }
 0x91c   : > { %7563 = vst [vmem:[#allocation23_spill] sm:$0xff] %v6788_v60  ;;  %v6791_v37 = vmax.f32 %v3088_v11, %v6788_v60 }
 0x91d   : > { %7565 = vst [vmem:[#allocation12_spill] sm:$0xff] %v6824_v36  ;;  %v3057_v60 = vmax.f32 %v3055_v1, %v6824_v36 }
 0x921   : > { %v2997_v0 = vpop.f32.mrf.mxu1 }
 0x922   : > { %v6793_v30 = vadd.f32 %v2997_v0, %v2751_v56  ;;  %v2918_v35 = vpop.f32.mrf.mxu0 }
 0x923   : > { %v6826_v48 = vadd.f32 %v2918_v35, %v2758_v6 }
 0x924   : > { %3888 = vmatmul.msk.bf16.gmra.mxu1 %vm669_vm2, %v2809_v14 }
 0x925   : > { %7566 = vst [vmem:[#allocation34_spill] sm:$0xff] %v6826_v48 }
 0x929   : > { %v2999_v22 = vpop.f32.mrf.mxu1 }
 0x92a   : > { %v6798_v8 = vadd.f32 %v2999_v22, %v2753_v16  ;;  %v2920_v38 = vpop.f32.mrf.mxu0  ;;  %v2754_v22 = vld [vmem:[#allocation2 + $0x700] sm:$0xff] }
 0x92b   : > { %v6822_v26 = vadd.f32 %v2913_v45, %v2754_v22  ;;  %v6828_v29 = vadd.f32 %v2920_v38, %v2760_v28 }
 0x92d   : > { %7564 = vst [vmem:[#allocation25_spill] sm:$0xff] %v6822_v26  ;;  %v3056_v46 = vmax.f32 %v7568_v32, %v6822_v26  ;;  %v3059_v28 = vmax.f32 %v3057_v60, %v6828_v29  ;;  %v2776_v32 = vld [vmem:[#allocation2 + $0x7b0] sm:$0xff] }
 0x92e   : > { %7567 = vst [vmem:[#allocation14_spill] sm:$0xff] %v6828_v29 }
 0x92f   : > { %v3058_v6 = vmax.f32 %v3056_v46, %v6826_v48  ;;  %v2778_v46 = vld [vmem:[#allocation2 + $0x7c0] sm:$0xff] }
 0x931   : > { %v6802_v20 = vpop.f32.mrf.mxu1 }
 0x932   : > { %v2923_v2 = vpop.f32.mrf.mxu0 }
 0x933   : > { %v6835_v63 = vadd.f32 %v2923_v2, %v2762_v27 }
 0x935   : > { %v3060_v27 = vmax.f32 %v3058_v6, %v6835_v63 }
 0x939   : > { %v6804_v23 = vpop.f32.mrf.mxu1 }
 0x93a   : > { %v2925_v19 = vpop.f32.mrf.mxu0 }
 0x93b   : > { %v6837_v45 = vadd.f32 %v2925_v19, %v2764_v25  ;;  %v2780_v19 = vld [vmem:[#allocation2 + $0x7d0] sm:$0xff] }
 0x93d   : > { %v3061_v25 = vmax.f32 %v3059_v28, %v6837_v45 }
 0x941   : > { %v6806_v39 = vpop.f32.mrf.mxu1 }
 0x942   : > { %v2928_v40 = vpop.f32.mrf.mxu0 }
 0x943   : > { %v6841_v35 = vadd.f32 %v2928_v40, %v2766_v61 }
 0x945   : > { %v3062_v61 = vmax.f32 %v3060_v27, %v6841_v35 }
 0x949   : > { %v6808_v4 = vpop.f32.mrf.mxu1 }
 0x94a   : > { %v2930_v14 = vpop.f32.mrf.mxu0 }
 0x94b   : > { %v6843_v38 = vadd.f32 %v2930_v14, %v2768_v33  ;;  %v2782_v14 = vld [vmem:[#allocation2 + $0x7e0] sm:$0xff] }
 0x94d   : > { %v3063_v33 = vmax.f32 %v3061_v25, %v6843_v38 }
 0x951   : > { %v6810_v12 = vpop.f32.mrf.mxu1 }
 0x952   : > { %v2933_v47 = vpop.f32.mrf.mxu0 }
 0x953   : > { %v6849_v1 = vadd.f32 %v2933_v47, %v2770_v24 }
 0x955   : > { %v3064_v36 = vmax.f32 %v3062_v61, %v6849_v1 }
 0x959   : > { %v6812_v11 = vpop.f32.mrf.mxu1 }
 0x95a   : > { %v2935_v5 = vpop.f32.mrf.mxu0 }
 0x95b   : > { %v6851_v2 = vadd.f32 %v2935_v5, %v2772_v9  ;;  %v2784_v5 = vld [vmem:[#allocation2 + $0x7f0] sm:$0xff] }
 0x95d   : > { %v3065_v6 = vmax.f32 %v3063_v33, %v6851_v2  ;;  %v2755_v33 = vld [vmem:[#allocation2 + $0x708] sm:$0xff] }
 0x961   : > { %v6814_v53 = vpop.f32.mrf.mxu1 }
 0x962   : > { %v2938_v15 = vpop.f32.mrf.mxu0 }
 0x963   : > { %v6855_v60 = vadd.f32 %v2938_v15, %v2774_v42 }
 0x965   : > { %v3066_v24 = vmax.f32 %v3064_v36, %v6855_v60 }
 0x969   : > { %v6816_v18 = vpop.f32.mrf.mxu1 }
 0x96a   : > { %v2940_v56 = vpop.f32.mrf.mxu0 }
 0x96b   : > { %v6857_v40 = vadd.f32 %v2940_v56, %v2776_v32 }
 0x96d   : > { %v3067_v9 = vmax.f32 %v3065_v6, %v6857_v40  ;;  %v2757_v6 = vld [vmem:[#allocation2 + $0x718] sm:$0xff] }
 0x971   : > { %v6818_v0 = vpop.f32.mrf.mxu1 }
 0x972   : > { %v2943_v16 = vpop.f32.mrf.mxu0 }
 0x973   : > { %v6861_v28 = vadd.f32 %v2943_v16, %v2778_v46 }
 0x975   : > { %v3068_v56 = vmax.f32 %v3066_v24, %v6861_v28  ;;  %v2761_v24 = vld [vmem:[#allocation2 + $0x738] sm:$0xff] }
 0x979   : > { %v6820_v59 = vpop.f32.mrf.mxu1 }
 0x97a   : > { %v2945_v62 = vpop.f32.mrf.mxu0 }
 0x97b   : > { %v6863_v47 = vadd.f32 %v2945_v62, %v2780_v19 }
 0x97d   : > { %v3069_v42 = vmax.f32 %v3067_v9, %v6863_v47 }
 0x981   : > { %v6845_v22 = vpop.f32.mrf.mxu1 }
 0x982   : > { %v2948_v26 = vpop.f32.mrf.mxu0 }
 0x983   : > { %v6867_v25 = vadd.f32 %v2948_v26, %v2782_v14  ;;  %v2759_v26 = vld [vmem:[#allocation2 + $0x728] sm:$0xff]  ;;  %v6876_v14 = vadd.f32 %v6802_v20, %v2755_v33 }
 0x984   : > { %v6882_v9 = vadd.f32 %v6806_v39, %v2759_v26 }
 0x985   : > { %v3070_v16 = vmax.f32 %v3068_v56, %v6867_v25  ;;  %7569 = vst [vmem:[#allocation16_spill] sm:$0xff] %v6876_v14 }
 0x989   : > { %v3029_v27 = vpop.f32.mrf.mxu1 }
 0x98a   : > { %v2950_v15 = vpop.f32.mrf.mxu0 }
 0x98b   : > { %v6871_v32 = vadd.f32 %v2950_v15, %v2784_v5  ;;  %v6879_v5 = vadd.f32 %v6804_v23, %v2757_v6  ;;  %v7572_v23 = vmax.f32 %v6791_v37, %v6798_v8 }
 0x98d   : > { %v3071_v62 = vmax.f32 %v3069_v42, %v6871_v32  ;;  %7570 = vst [vmem:[#allocation33_spill] sm:$0xff] %v6879_v5  ;;  %v6885_v42 = vadd.f32 %v6808_v4, %v2761_v24  ;;  %v3094_v39 = vmax.f32 %v7572_v23, %v6879_v5  ;;  %v2771_v24 = vld [vmem:[#allocation2 + $0x788] sm:$0xff] }
 0x98f   : > { %v3072_v46 = vmax.f32 %v3070_v16, %v3071_v62  ;;  %v2763_v16 = vld [vmem:[#allocation2 + $0x748] sm:$0xff]  ;;  %v7571_v62 = vmax.f32 %v6784_v55, %v6793_v30  ;;  %v3096_v6 = vmax.f32 %v3094_v39, %v6885_v42 }
 0x990   : > { %v6899_v4 = vadd.f32 %v6810_v12, %v2763_v16  ;;  %v2779_v39 = vld [vmem:[#allocation2 + $0x7c8] sm:$0xff] }
 0x991   : > { %v3032_v19 = vpop.f32.mrf.mxu1  ;;  %v3073_v61 = vrot.slane %v3072_v46, 4  ;;  %v3093_v20 = vmax.f32 %v7571_v62, %v6876_v14 }
 0x993   : > { %v3074_v36 = vmax.f32 %v3072_v46, %v3073_v61  ;;  %v2765_v46 = vld [vmem:[#allocation2 + $0x758] sm:$0xff]  ;;  %v2767_v61 = vld [vmem:[#allocation2 + $0x768] sm:$0xff]  ;;  %v3095_v33 = vmax.f32 %v3093_v20, %v6882_v9 }
 0x994   : > { %v6903_v55 = vadd.f32 %v6812_v11, %v2765_v46  ;;  %v6906_v26 = vadd.f32 %v6814_v53, %v2767_v61  ;;  %v2775_v20 = vld [vmem:[#allocation2 + $0x7a8] sm:$0xff]  ;;  %v2777_v46 = vld [vmem:[#allocation2 + $0x7b8] sm:$0xff] }
 0x995   : > { %v3075_v29 = vrot.slane %v3074_v36, 2  ;;  %v6942_v62 = vadd.f32 %v6845_v22, %v2775_v20 }
 0x996   : > { %v3098_v61 = vmax.f32 %v3096_v6, %v6903_v55  ;;  %v2783_v6 = vld [vmem:[#allocation2 + $0x7e8] sm:$0xff] }
 0x997   : > { %v3076_v48 = vmax.f32 %v3074_v36, %v3075_v29  ;;  %v2769_v36 = vld [vmem:[#allocation2 + $0x778] sm:$0xff] }
 0x998   : > { %v6911_v37 = vadd.f32 %v6816_v18, %v2769_v36  ;;  %v2781_v36 = vld [vmem:[#allocation2 + $0x7d8] sm:$0xff] }
 0x999   : > { %v3034_v15 = vpop.f32.mrf.mxu1  ;;  %v3077_v56 = vrot.slane %v3076_v48, 1 }
 0x99b   : > { %v6891_v29 = vmax.f32 %v3076_v48, %v3077_v56  ;;  %v2773_v56 = vld [vmem:[#allocation2 + $0x798] sm:$0xff] }
 0x99d   : > { %v3128_v48 = vsub.f32 %v6681_v21, %v6891_v29  ;;  %v3130_v12 = vsub.f32 %v6701_v49, %v6891_v29  ;;  %v3132_v16 = vsub.f32 %v6689_v41, %v6891_v29  ;;  %v3134_v11 = vsub.f32 %v6705_v43, %v6891_v29 }
 0x99e   : > { %v3136_v53 = vsub.f32 %v6722_v52, %v6891_v29  ;;  %v3138_v21 = vsub.f32 %v6740_v34, %v6891_v29  ;;  %v3140_v18 = vsub.f32 %v6748_v3, %v6891_v29  ;;  %v3097_v49 = vmax.f32 %v3095_v33, %v6899_v4 }
 0x99f   : > { %v3144_v43 = vsub.f32 %v6767_v51, %v6891_v29  ;;  %v3146_v52 = vsub.f32 %v6776_v58, %v6891_v29  ;;  %v6934_v34 = vadd.f32 %v6818_v0, %v2771_v24  ;;  %v6937_v3 = vadd.f32 %v6820_v59, %v2773_v56 }
 0x9a0   : > { %v3099_v23 = vmax.f32 %v3097_v49, %v6906_v26  ;;  %v3100_v33 = vmax.f32 %v3098_v61, %v6911_v37  ;;  %v6944_v51 = vadd.f32 %v3029_v27, %v2777_v46  ;;  %v6952_v56 = vadd.f32 %v3032_v19, %v2779_v39  ;;  %v2785_v61 = vld [vmem:[#allocation2 + $0x7f8] sm:$0xff] }
 0x9a1   : > { %v3037_v41 = vpop.f32.mrf.mxu1  ;;  %v6954_v49 = vadd.f32 %v3034_v15, %v2781_v36 }
 0x9a2   : > { %v3101_v59 = vmax.f32 %v3099_v23, %v6934_v34  ;;  %v3102_v24 = vmax.f32 %v3100_v33, %v6937_v3  ;;  %v6958_v20 = vadd.f32 %v3037_v41, %v2783_v6  ;;  %v3204_v41 = vmul.f32 1.442695, %v3128_v48 }
 0x9a3   : > { %v3208_v6 = vmul.f32 1.442695, %v3130_v12  ;;  %v3216_v48 = vmul.f32 1.442695, %v3134_v11  ;;  %v7573_v12 = vld [vmem:[#allocation21_spill] sm:$0xff] }
 0x9a4   : > { %v3103_v22 = vmax.f32 %v3101_v59, %v6942_v62  ;;  %v3104_v27 = vmax.f32 %v3102_v24, %v6944_v51  ;;  %4348 = vpow2.f32 %v3204_v41  ;;  %v3224_v11 = vmul.f32 1.442695, %v3138_v21 }
 0x9a5   : > { %4350 = vpow2.f32 %v3208_v6 }
 0x9a6   : > { %v3105_v58 = vmax.f32 %v3103_v22, %v6952_v56  ;;  %v3106_v0 = vmax.f32 %v3104_v27, %v6954_v49 }
 0x9a8   : > { %v3107_v23 = vmax.f32 %v3105_v58, %v6958_v20 }
 0x9a9   : > { %v3039_v46 = vpop.f32.mrf.mxu1 }
 0x9aa   : > { %v6962_v5 = vadd.f32 %v3039_v46, %v2785_v61 }
 0x9ac   : > { %v3108_v19 = vmax.f32 %v3106_v0, %v6962_v5  ;;  %v3212_v0 = vmul.f32 1.442695, %v3132_v16  ;;  %v7574_v16 = vld [vmem:[#allocation23_spill] sm:$0xff] }
 0x9ae   : > { %v3109_v15 = vmax.f32 %v3107_v23, %v3108_v19  ;;  %4352 = vpow2.f32 %v3212_v0 }
 0x9af   : > { %4354 = vpow2.f32 %v3216_v48 }
 0x9b0   : > { %v3110_v39 = vrot.slane %v3109_v15, 4 }
 0x9b2   : > { %v3111_v36 = vmax.f32 %v3109_v15, %v3110_v39  ;;  %v3236_v15 = vmul.f32 1.442695, %v3144_v43  ;;  %v3240_v39 = vmul.f32 1.442695, %v3146_v52 }
 0x9b4   : > { %v3112_v33 = vrot.slane %v3111_v36, 2 }
 0x9b6   : > { %v3113_v59 = vmax.f32 %v3111_v36, %v3112_v33 }
 0x9b8   : > { %v3114_v14 = vrot.slane %v3113_v59, 1 }
 0x9ba   : > { %v6966_v24 = vmax.f32 %v3113_v59, %v3114_v14 }
 0x9bc   : > { %v3125_v22 = vsub.f32 %v6713_v50, %v6966_v24  ;;  %v3127_v61 = vsub.f32 %v6733_v57, %v6966_v24  ;;  %v3129_v58 = vsub.f32 %v6720_v31, %v6966_v24  ;;  %v3131_v27 = vsub.f32 %v6738_v17, %v6966_v24 }
 0x9bd   : > { %v3133_v46 = vsub.f32 %v6746_v13, %v6966_v24  ;;  %v3135_v14 = vsub.f32 %v6756_v7, %v6966_v24  ;;  %v3137_v50 = vsub.f32 %v6765_v44, %v6966_v24  ;;  %v3139_v57 = vsub.f32 %v6774_v54, %v6966_v24 }
 0x9be   : > { %v3141_v31 = vsub.f32 %v7573_v12, %v6966_v24  ;;  %v3143_v23 = vsub.f32 %v7574_v16, %v6966_v24  ;;  %v3145_v17 = vsub.f32 %v6793_v30, %v6966_v24  ;;  %v3147_v13 = vsub.f32 %v6798_v8, %v6966_v24 }
 0x9bf   : > { %v3220_v7 = vmul.f32 1.442695, %v3136_v53  ;;  %v3228_v44 = vmul.f32 1.442695, %v3140_v18  ;;  %v3169_v54 = vsub.f32 %v6942_v62, %v6966_v24  ;;  %v3171_v19 = vsub.f32 %v6944_v51, %v6966_v24  ;;  %v6999_v53 = vpop.eup %4348 }
 0x9c0   : > { %v7575_v30 = vsub.f32 %v6758_v10, %v6891_v29  ;;  %v3198_v21 = vmul.f32 1.442695, %v3125_v22  ;;  %v7001_v18 = vpop.eup %4350  ;;  %v3202_v36 = vmul.f32 1.442695, %v3127_v61  ;;  %v3206_v59 = vmul.f32 1.442695, %v3129_v58 }
 0x9c1   : > { %4356 = vpow2.f32 %v3220_v7  ;;  %v7003_v33 = vpop.eup %4352  ;;  %v3210_v52 = vmul.f32 1.442695, %v3131_v27  ;;  %v3214_v10 = vmul.f32 1.442695, %v3133_v46  ;;  %v3218_v0 = vmul.f32 1.442695, %v3135_v14 }
 0x9c2   : > { %v3232_v8 = vmul.f32 1.442695, %v7575_v30  ;;  %4358 = vpow2.f32 %v3224_v11  ;;  %v7005_v43 = vpop.eup %4354  ;;  %v3222_v48 = vmul.f32 1.442695, %v3137_v50  ;;  %v3226_v61 = vmul.f32 1.442695, %v3139_v57 }
 0x9c3   : > { %4360 = vpow2.f32 %v3228_v44  ;;  %v3230_v58 = vmul.f32 1.442695, %v3141_v31  ;;  %v3234_v11 = vmul.f32 1.442695, %v3143_v23  ;;  %v3238_v44 = vmul.f32 1.442695, %v3145_v17 }
 0x9c4   : > { %4362 = vpow2.f32 %v3236_v15  ;;  %v3242_v14 = vmul.f32 1.442695, %v3147_v13  ;;  %v7576_v17 = vld [vmem:[#allocation54_spill] sm:$0xff] }
 0x9c5   : > { %4364 = vpow2.f32 %v3240_v39  ;;  %v3124_v30 = vsub.f32 %v7576_v17, %v6891_v29 }
 0x9c6   : > { %4366 = vpow2.f32 %v3232_v8  ;;  %v7577_v8 = vld [vmem:[#allocation6_spill] sm:$0xff] }
 0x9c7   : > { %v4357_v41 = vpop.eup %4356  ;;  %4368 = vpow2.f32 %v3198_v21  ;;  %v3126_v21 = vsub.f32 %v7577_v8, %v6891_v29 }
 0x9c8   : > { %v4359_v6 = vpop.eup %4358  ;;  %4370 = vpow2.f32 %v3202_v36 }
 0x9c9   : > { %v4361_v22 = vpop.eup %4360  ;;  %4372 = vpow2.f32 %v3206_v59 }
 0x9ca   : > { %v4363_v12 = vpop.eup %4362  ;;  %4374 = vpow2.f32 %v3210_v52  ;;  %v3318_v52 = vpack.c.bf16 %v4359_v6, %v4357_v41 }
 0x9cb   : > { %v4365_v16 = vpop.eup %4364  ;;  %4376 = vpow2.f32 %v3214_v10  ;;  %v3316_v10 = vpack.c.bf16 %v7005_v43, %v7003_v33  ;;  %v3200_v33 = vmul.f32 1.442695, %v3126_v21 }
 0x9cc   : > { %v4367_v7 = vpop.eup %4366  ;;  %4378 = vpow2.f32 %v3218_v0  ;;  %v3322_v15 = vpack.c.bf16 %v4365_v16, %v4363_v12 }
 0x9cd   : > { %v7007_v27 = vpop.eup %4368  ;;  %4380 = vpow2.f32 %v3222_v48  ;;  %v3320_v59 = vpack.c.bf16 %v4367_v7, %v4361_v22  ;;  %v3314_v48 = vpack.c.bf16 %v7001_v18, %v6999_v53 }
 0x9ce   : > { %v7009_v46 = vpop.eup %4370  ;;  %4382 = vpow2.f32 %v3226_v61  ;;  %3342 = vmatpush.bf16.msra.mxu2 %v3322_v15  ;;  %v7578_v61 = vld [vmem:[#allocation5_spill] sm:$0xff] }
 0x9cf   : > { %v7011_v39 = vpop.eup %4372  ;;  %4384 = vpow2.f32 %v3230_v58  ;;  %v3120_v16 = vsub.f32 %v7578_v61, %v6891_v29  ;;  %v7579_v58 = vld [vmem:[#allocation53_spill] sm:$0xff] }
 0x9d0   : > { %v7013_v50 = vpop.eup %4374  ;;  %4386 = vpow2.f32 %v3234_v11  ;;  %v3122_v11 = vsub.f32 %v7579_v58, %v6891_v29  ;;  %v7582_v58 = vsub.f32 %v6855_v60, %v6891_v29  ;;  %v3290_v60 = vmul.f32 1.442695, %v3171_v19  ;;  %v7079_v19 = vpop.permute.xlu1 %399 }
 0x9d1   : > { %v7015_v57 = vpop.eup %4376  ;;  %4388 = vpow2.f32 %v3238_v44  ;;  %v3196_v44 = vmul.f32 1.442695, %v3124_v30  ;;  %v3315_v18 = vpack.c.bf16 %v7013_v50, %v7011_v39  ;;  %v3188_v17 = vmul.f32 1.442695, %v3120_v16  ;;  %v7581_v30 = vld [vmem:[#allocation11_spill] sm:$0xff] }
 0x9d2   : > { %v7017_v31 = vpop.eup %4378  ;;  %4390 = vpow2.f32 %v3242_v14  ;;  %3343 = vmatpush.bf16.msra.mxu2 %v3320_v59  ;;  %v7580_v14 = vld [vmem:[#allocation27_spill] sm:$0xff]  ;;  %v3118_v8 = vsub.f32 %v7581_v30, %v6891_v29  ;;  %v3192_v21 = vmul.f32 1.442695, %v3122_v11  ;;  %v3178_v16 = vsub.f32 %v6871_v32, %v6891_v29 }
 0x9d3   : > { %v7019_v23 = vpop.eup %4380  ;;  %v3317_v53 = vpack.c.bf16 %v7017_v31, %v7015_v57  ;;  %v3116_v15 = vsub.f32 %v7580_v14, %v6891_v29  ;;  %4392 = vpow2.f32 %v3196_v44  ;;  %v7583_v11 = vsub.f32 %v6857_v40, %v6891_v29 }
 0x9d4   : > { %v7023_v13 = vpop.eup %4382  ;;  %4394 = vpow2.f32 %v3200_v33  ;;  %v3184_v61 = vmul.f32 1.442695, %v3118_v8  ;;  %v3176_v33 = vsub.f32 %v6867_v25, %v6891_v29  ;;  %v3172_v32 = vsub.f32 %v6861_v28, %v6891_v29  ;;  %v7584_v8 = vld [vmem:[#allocation32_spill] sm:$0xff] }
 0x9d5   : > { %v7027_v36 = vpop.eup %4384  ;;  %v3319_v43 = vpack.c.bf16 %v7023_v13, %v7019_v23  ;;  %v3180_v59 = vmul.f32 1.442695, %v3116_v15  ;;  %4396 = vpow2.f32 %v3188_v17  ;;  %v3288_v44 = vmul.f32 1.442695, %v7583_v11  ;;  %v7591_v13 = vld [vmem:[#allocation25_spill] sm:$0xff] }
 0x9d6   : > { %v7031_v0 = vpop.eup %4386  ;;  %3344 = vmatpush.bf16.msra.mxu2 %v3318_v52  ;;  %4398 = vpow2.f32 %v3192_v21  ;;  %v3286_v52 = vmul.f32 1.442695, %v3169_v54  ;;  %v3304_v40 = vmul.f32 1.442695, %v3178_v16  ;;  %v3300_v14 = vmul.f32 1.442695, %v3176_v33 }
 0x9d7   : > { %v7035_v12 = vpop.eup %4388  ;;  %v3321_v41 = vpack.c.bf16 %v7031_v0, %v7027_v36  ;;  %4400 = vpow2.f32 %v3180_v59  ;;  %v3292_v17 = vmul.f32 1.442695, %v3172_v32  ;;  %v3177_v57 = vsub.f32 %v6958_v20, %v6966_v24 }
 0x9d8   : > { %v7043_v6 = vpop.eup %4390  ;;  %4402 = vpow2.f32 %v3184_v61  ;;  %v7593_v50 = vpack.c.bf16 %v7009_v46, %v7007_v27  ;;  %v3165_v27 = vsub.f32 %v6934_v34, %v6966_v24  ;;  %v3163_v34 = vsub.f32 %v6911_v37, %v6966_v24 }
 0x9d9   : > { %v3323_v22 = vpack.c.bf16 %v7043_v6, %v7035_v12  ;;  %v4393_v12 = vpop.eup %4392  ;;  %v3284_v6 = vmul.f32 1.442695, %v7582_v58 }
 0x9da   : > { %3345 = vmatpush.bf16.msra.mxu2 %v3316_v10  ;;  %v4395_v7 = vpop.eup %4394 }
 0x9db   : > { %v4397_v10 = vpop.eup %4396  ;;  %4404 = vpow2.f32 %v3284_v6  ;;  %v3312_v62 = vpack.c.bf16 %v4395_v7, %v4393_v12  ;;  %v3164_v12 = vsub.f32 %v6849_v1, %v6891_v29  ;;  %v3166_v6 = vsub.f32 %v6851_v2, %v6891_v29 }
 0x9dc   : > { %v4399_v54 = vpop.eup %4398  ;;  %4406 = vpow2.f32 %v3286_v52  ;;  %v3162_v2 = vsub.f32 %v6843_v38, %v6891_v29  ;;  %v3158_v38 = vsub.f32 %v6837_v45, %v6891_v29  ;;  %v7590_v45 = vld [vmem:[#allocation14_spill] sm:$0xff] }
 0x9dd   : > { %4408 = vpow2.f32 %v3288_v44  ;;  %v4401_v51 = vpop.eup %4400  ;;  %v3310_v15 = vpack.c.bf16 %v4399_v54, %v4397_v10  ;;  %v3160_v44 = vsub.f32 %v6841_v35, %v6891_v29  ;;  %v3280_v10 = vmul.f32 1.442695, %v3166_v6  ;;  %v7586_v35 = vld [vmem:[#allocation17_spill] sm:$0xff] }
 0x9de   : > { %3346 = vmatpush.bf16.msra.mxu2 %v3314_v48  ;;  %v3174_v48 = vsub.f32 %v6863_v47, %v6891_v29  ;;  %4410 = vpow2.f32 %v3290_v60  ;;  %v4403_v25 = vpop.eup %4402  ;;  %v7087_v47 = vadd.f32 %v7584_v8, %v7079_v19  ;;  %v3276_v60 = vmul.f32 1.442695, %v3164_v12 }
 0x9df   : > { %4412 = vpow2.f32 %v3304_v40  ;;  %v3308_v59 = vpack.c.bf16 %v4403_v25, %v4401_v51  ;;  %v3123_v40 = vsub.f32 %v7586_v35, %v6966_v24  ;;  %v3268_v51 = vmul.f32 1.442695, %v3160_v44 }
 0x9e0   : > { %v3296_v30 = vmul.f32 1.442695, %v3174_v48  ;;  %4414 = vpow2.f32 %v3300_v14  ;;  %v3340_v16 = vpack.c.bf16 1.0, %v7087_v47  ;;  %v3156_v48 = vsub.f32 %v6835_v63, %v6891_v29 }
 0x9e1   : > { %v7081_v7 = vpop.eup %4404  ;;  %4416 = vpow2.f32 %v3292_v17  ;;  %v3272_v14 = vmul.f32 1.442695, %v3162_v2  ;;  %v3194_v17 = vmul.f32 1.442695, %v3123_v40  ;;  %v3179_v44 = vsub.f32 %v6962_v5, %v6966_v24 }
 0x9e2   : > { %3347 = vmatpush.bf16.msra.mxu2 %v3312_v62  ;;  %v7083_v28 = vpop.eup %4406  ;;  %4418 = vpow2.f32 %v3296_v30  ;;  %v7585_v62 = vld [vmem:[#allocation13_spill] sm:$0xff]  ;;  %v3260_v8 = vmul.f32 1.442695, %v3156_v48  ;;  %v3302_v35 = vmul.f32 1.442695, %v3177_v57 }
 0x9e3   : > { %v4409_v21 = vpop.eup %4408  ;;  %v3121_v54 = vsub.f32 %v7585_v62, %v6966_v24  ;;  %4420 = vpow2.f32 %v3276_v60  ;;  %v3274_v47 = vmul.f32 1.442695, %v3163_v34 }
 0x9e4   : > { %v7089_v61 = vpop.eup %4410  ;;  %v3334_v58 = vpack.c.bf16 %v4409_v21, %v7081_v7  ;;  %4422 = vpow2.f32 %v3280_v10  ;;  %v7589_v7 = vld [vmem:[#allocation34_spill] sm:$0xff]  ;;  %v3154_v21 = vsub.f32 %v7590_v45, %v6891_v29  ;;  %v3278_v45 = vmul.f32 1.442695, %v3165_v27 }
 0x9e5   : > { %v3335_v52 = vpack.c.bf16 %v7089_v61, %v7083_v28  ;;  %v4413_v11 = vpop.eup %4412  ;;  %v3190_v36 = vmul.f32 1.442695, %v3121_v54  ;;  %v3152_v30 = vsub.f32 %v7589_v7, %v6891_v29  ;;  %4424 = vpow2.f32 %v3268_v51  ;;  %v7594_v7 = vld [vmem:[#allocation31_spill] sm:$0xff] }
 0x9e6   : > { %3348 = vmatpush.bf16.msra.mxu2 %v3310_v15  ;;  %v4415_v1 = vpop.eup %4414  ;;  %v7587_v15 = vld [vmem:[#allocation15_spill] sm:$0xff]  ;;  %4426 = vpow2.f32 %v3272_v14  ;;  %v3256_v10 = vmul.f32 1.442695, %v3154_v21  ;;  %v3173_v54 = vsub.f32 %v6952_v56, %v6966_v24 }
 0x9e7   : > { %v4417_v33 = vpop.eup %4416  ;;  %v3338_v32 = vpack.c.bf16 %v4413_v11, %v4415_v1  ;;  %v3117_v25 = vsub.f32 %v7587_v15, %v6966_v24  ;;  %4428 = vpow2.f32 %v3190_v36  ;;  %v3252_v60 = vmul.f32 1.442695, %v3152_v30  ;;  %v7592_v1 = vld [vmem:[#allocation12_spill] sm:$0xff] }
 0x9e8   : > { %4430 = vpow2.f32 %v3194_v17  ;;  %v3150_v2 = vsub.f32 %v7592_v1, %v6891_v29  ;;  %v3294_v56 = vmul.f32 1.442695, %v3173_v54  ;;  %v575_v30 = vadd.f32 %v7594_v7, %v7079_v19  ;;  %v7595_v1 = vld [vmem:[#allocation16_spill] sm:$0xff] }
 0x9e9   : > { %3356 = vmatpush.bf16.msra.mxu3 %v3338_v32  ;;  %v3182_v6 = vmul.f32 1.442695, %v3117_v25  ;;  %4432 = vpow2.f32 %v3260_v8  ;;  %v3161_v8 = vsub.f32 %v6906_v26, %v6966_v24  ;;  %v3157_v19 = vsub.f32 %v6899_v4, %v6966_v24 }
 0x9ea   : > { %3349 = vmatpush.bf16.msra.mxu2 %v3308_v59  ;;  %v3264_v59 = vmul.f32 1.442695, %v3158_v38  ;;  %v3248_v32 = vmul.f32 1.442695, %v3150_v2  ;;  %v3159_v26 = vsub.f32 %v6903_v55, %v6966_v24  ;;  %v3149_v55 = vsub.f32 %v7595_v1, %v6966_v24 }
 0x9ec   : > { %4434 = vpow2.f32 %v3264_v59  ;;  %v3266_v4 = vmul.f32 1.442695, %v3159_v26 }
 0x9ed   : > { %3350 = vmatmul.bf16.vlgmr.msra.gmra.mxu2 %v3340_v16  ;;  %4436 = vpow2.f32 %v3182_v6 }
 0x9ee   : > { %3370 = vmatpush.bf16.msrb.mxu2 %v3323_v22  ;;  %v4419_v22 = vpop.eup %4418 }
 0x9ef   : > { %v3336_v0 = vpack.c.bf16 %v4419_v22, %v4417_v33  ;;  %v4421_v12 = vpop.eup %4420  ;;  %v3175_v22 = vsub.f32 %v6954_v49, %v6966_v24 }
 0x9f0   : > { %v4423_v23 = vpop.eup %4422 }
 0x9f1   : > { %3357 = vmatpush.bf16.msra.mxu3 %v3336_v0  ;;  %v4425_v33 = vpop.eup %4424  ;;  %v3332_v31 = vpack.c.bf16 %v4423_v23, %v4421_v12  ;;  %v3298_v14 = vmul.f32 1.442695, %v3175_v22  ;;  %v3167_v0 = vsub.f32 %v6937_v3, %v6966_v24  ;;  %v3341_v23 = vpack.c.bf16 1.0, %v575_v30 }
 0x9f2   : > { %3371 = vmatpush.bf16.msrb.mxu2 %v3321_v41  ;;  %v7588_v41 = vld [vmem:[#allocation19_spill] sm:$0xff] }
 0x9f3   : > { %v3119_v63 = vsub.f32 %v7588_v41, %v6966_v24  ;;  %v3282_v3 = vmul.f32 1.442695, %v3167_v0 }
 0x9f5   : > { %v3186_v11 = vmul.f32 1.442695, %v3119_v63  ;;  %3358 = vmatpush.bf16.msra.mxu3 %v3334_v58  ;;  %v3306_v58 = vmul.f32 1.442695, %v3179_v44 }
 0x9f6   : > { %3372 = vmatpush.bf16.msrb.mxu2 %v3319_v43  ;;  %v3148_v43 = vsub.f32 %v7591_v13, %v6891_v29  ;;  %v3270_v13 = vmul.f32 1.442695, %v3161_v8 }
 0x9f7   : > { %4438 = vpow2.f32 %v3186_v11  ;;  %v3155_v11 = vsub.f32 %v6885_v42, %v6966_v24 }
 0x9f8   : > { %v3244_v5 = vmul.f32 1.442695, %v3148_v43  ;;  %4440 = vpow2.f32 %v3252_v60  ;;  %v3262_v43 = vmul.f32 1.442695, %v3157_v19 }
 0x9f9   : > { %3359 = vmatpush.bf16.msra.mxu3 %v3332_v31  ;;  %4442 = vpow2.f32 %v3256_v10 }
 0x9fa   : > { %3373 = vmatpush.bf16.msrb.mxu2 %v3317_v53  ;;  %v4427_v53 = vpop.eup %4426  ;;  %4444 = vpow2.f32 %v3244_v5 }
 0x9fb   : > { %v4429_v62 = vpop.eup %4428  ;;  %v3330_v39 = vpack.c.bf16 %v4427_v53, %v4425_v33  ;;  %4446 = vpow2.f32 %v3306_v58  ;;  %v3258_v33 = vmul.f32 1.442695, %v3155_v11  ;;  %v3246_v53 = vmul.f32 1.442695, %v3149_v55 }
 0x9fc   : > { %v4431_v29 = vpop.eup %4430  ;;  %4448 = vpow2.f32 %v3248_v32 }
 0x9fd   : > { %v4433_v20 = vpop.eup %4432  ;;  %3360 = vmatpush.bf16.msra.mxu3 %v3330_v39  ;;  %v3311_v48 = vpack.c.bf16 %v4431_v29, %v4429_v62  ;;  %4450 = vpow2.f32 %v3302_v35 }
 0x9fe   : > { %3374 = vmatpush.bf16.msrb.mxu2 %v3315_v18  ;;  %v4435_v18 = vpop.eup %4434  ;;  %4452 = vpow2.f32 %v3294_v56 }
 0x9ff   : > { %v4437_v40 = vpop.eup %4436  ;;  %v3328_v15 = vpack.c.bf16 %v4435_v18, %v4433_v20  ;;  %4454 = vpow2.f32 %v3298_v14  ;;  %v3923_v14 = vld [vmem:[%s7314_s4] sm:$0xff] }
 0xa00   : > { %v4439_v51 = vpop.eup %4438  ;;  %4456 = vpow2.f32 %v3278_v45 }
 0xa01   : > { %v4441_v38 = vpop.eup %4440  ;;  %3361 = vmatpush.bf16.msra.mxu3 %v3328_v15  ;;  %v3309_v25 = vpack.c.bf16 %v4439_v51, %v4437_v40  ;;  %4458 = vpow2.f32 %v3282_v3 }
 0xa02   : > { %3375 = vmatpush.bf16.msrb.mxu2 %v7593_v50  ;;  %v4443_v49 = vpop.eup %4442  ;;  %4460 = vpow2.f32 %v3270_v13 }
 0xa03   : > { %v4445_v36 = vpop.eup %4444  ;;  %v3326_v41 = vpack.c.bf16 %v4443_v49, %v4441_v38  ;;  %4462 = vpow2.f32 %v3274_v47  ;;  %v3924_v38 = vld [vmem:[%s7314_s4 + $0x8] sm:$0xff] }
 0xa04   : > { %v4447_v46 = vpop.eup %4446  ;;  %4464 = vpow2.f32 %v3262_v43  ;;  %v7597_v43 = vld [vmem:[#allocation52_spill] sm:$0xff] }
 0xa05   : > { %v4449_v63 = vpop.eup %4448  ;;  %3362 = vmatpush.bf16.msra.mxu3 %v3326_v41  ;;  %4466 = vpow2.f32 %v3266_v4  ;;  %v7598_v4 = vld [vmem:[#allocation10_spill] sm:$0xff] }
 0xa06   : > { %3376 = vmatpush.bf16.msrb.mxu2 %v3311_v48  ;;  %v4451_v17 = vpop.eup %4450  ;;  %v3324_v21 = vpack.c.bf16 %v4449_v63, %v4445_v36 }
 0xa07   : > { %v4453_v59 = vpop.eup %4452  ;;  %v3339_v12 = vpack.c.bf16 %v4447_v46, %v4451_v17 }
 0xa08   : > { %v4455_v6 = vpop.eup %4454 }
 0xa09   : > { %3363 = vmatpush.bf16.msra.mxu3 %v3324_v21  ;;  %v3337_v37 = vpack.c.bf16 %v4455_v6, %v4453_v59  ;;  %v4457_v44 = vpop.eup %4456 }
 0xa0a   : > { %3377 = vmatpush.bf16.msrb.mxu2 %v3309_v25  ;;  %v4459_v60 = vpop.eup %4458 }
 0xa0b   : > { %v4461_v57 = vpop.eup %4460  ;;  %v3333_v42 = vpack.c.bf16 %v4459_v60, %v4457_v44 }
 0xa0c   : > { %3364 = vmatmul.bf16.vlgmr.msra.gmra.mxu3 %v3341_v23  ;;  %v4463_v31 = vpop.eup %4462 }
 0xa0d   : > { %3378 = vmatmul.bf16.vlgmr.msrb.gmra.mxu2 %v3340_v16  ;;  %3384 = vmatpush.bf16.msrb.mxu3 %v3339_v12  ;;  %v3153_v16 = vsub.f32 %v6882_v9, %v6966_v24  ;;  %v7596_v9 = vld [vmem:[#allocation33_spill] sm:$0xff]  ;;  %v4465_v62 = vpop.eup %4464  ;;  %v3331_v58 = vpack.c.bf16 %v4463_v31, %v4461_v57 }
 0xa0e   : > { %v3151_v10 = vsub.f32 %v7596_v9, %v6966_v24  ;;  %v4467_v29 = vpop.eup %4466  ;;  %3532 = vmatpush.bf16.msra.mxu2 %v3924_v38 }
 0xa0f   : > { %v3254_v2 = vmul.f32 1.442695, %v3153_v16  ;;  %v3329_v61 = vpack.c.bf16 %v4467_v29, %v4465_v62 }
 0xa10   : > { %v3250_v5 = vmul.f32 1.442695, %v3151_v10 }
 0xa11   : > { %3385 = vmatpush.bf16.msrb.mxu3 %v3337_v37  ;;  %4468 = vpow2.f32 %v3254_v2 }
 0xa12   : > { %4470 = vpow2.f32 %v3258_v33  ;;  %3533 = vmatpush.bf16.msra.mxu2 %v3923_v14 }
 0xa13   : > { %4472 = vpow2.f32 %v3246_v53 }
 0xa14   : > { %4474 = vpow2.f32 %v3250_v5 }
 0xa15   : > { %3386 = vmatpush.bf16.msrb.mxu3 %v3335_v52 }
 0xa17   : > { %v4469_v28 = vpop.eup %4468 }
 0xa18   : > { %v4471_v52 = vpop.eup %4470 }
 0xa19   : > { %3387 = vmatpush.bf16.msrb.mxu3 %v3333_v42  ;;  %v4473_v24 = vpop.eup %4472  ;;  %v3327_v54 = vpack.c.bf16 %v4471_v52, %v4469_v28  ;;  %v7195_v28 = vld [vmem:[%s7315_s5] ss:$0 sm:$0xff] }
 0xa1a   : > { %v4475_v32 = vpop.eup %4474 }
 0xa1b   : > { %v3325_v20 = vpack.c.bf16 %v4475_v32, %v4473_v24 }
 0xa1d   : > { %3388 = vmatpush.bf16.msrb.mxu3 %v3331_v58 }
 0xa21   : > { %3389 = vmatpush.bf16.msrb.mxu3 %v3329_v61 }
 0xa25   : > { %3390 = vmatpush.bf16.msrb.mxu3 %v3327_v54 }
 0xa29   : > { %3391 = vmatpush.bf16.msrb.mxu3 %v3325_v20 }
 0xa2c   : > { %3392 = vmatmul.bf16.vlgmr.msrb.gmra.mxu3 %v3341_v23 }
 0xa70   : > { %v3351_v22 = vpop.f32.mrf.mxu2 }
 0xa78   : > { %v3353_v39 = vpop.f32.mrf.mxu2 }
 0xa8f   : > { %v3365_v35 = vpop.f32.mrf.mxu3 }
 0xa90   : > { %v3379_v40 = vpop.f32.mrf.mxu2  ;;  %v3366_v23 = vadd.f32 %v3365_v35, %v3351_v22 }
 0xa97   : > { %v3367_v50 = vpop.f32.mrf.mxu3 }
 0xa98   : > { %v3368_v18 = vadd.f32 %v3367_v50, %v3353_v39  ;;  %v3381_v49 = vpop.f32.mrf.mxu2 }
 0xa9a   : > { %4476 = vrcp.f32 %v3368_v18  ;;  %v3409_v0 = vand.u32 2147483648, %v3368_v18  ;;  %vm3403_vm13 = vweird.f32 %v3368_v18  ;;  %v3407_v41 = vand.u32 2147483647, %v3368_v18 }
 0xa9c   : > { %v3410_v30 = vor.u32 1.1754944e-38, %v3409_v0  ;;  %vm3408_vm15 = vcmp.eq.f32.partialorder %v3407_v41, 8.507059e+37 }
 0xaa0   : > { %v4477_v48 = vpop.eup %4476 }
 0xaa1   : > { %v3399_v56 = vmul.f32 %v4477_v48, %v3368_v18  ;;  %vm3404_vm2 = vweird.f32 %v4477_v48 }
 0xaa2   : > { %vm3405_vm14 = vmor %vm3403_vm13, %vm3404_vm2 }
 0xaa3   : > { %v3400_v15 = vsub.f32 1.0, %v3399_v56 }
 0xaa5   : > { %v3401_v27 = vmul.f32 %v4477_v48, %v3400_v15 }
 0xaa7   : > { %v3402_v46 = vadd.f32 %v4477_v48, %v3401_v27 }
 0xaa9   : > { %v3406_v17 = vsel %vm3405_vm14, %v4477_v48, %v3402_v46 }
 0xaaa   : > { %v3411_v45 = vsel %vm3408_vm15, %v3410_v30, %v3406_v17 }
 0xaab   : > { %v3426_v59 = vperm.slane %v3411_v45, 0 }
 0xaad   : > { %v3428_v26 = vmul.f32 %v3426_v59, %v3366_v23 }
 0xaaf   : > { %v3393_v51 = vpop.f32.mrf.mxu3  ;;  %v3432_v11 = vpack.c.bf16 %v3428_v26, %v7597_v43 }
 0xab0   : > { %v3394_v47 = vadd.f32 %v3393_v51, %v3379_v40 }
 0xab7   : > { %v3395_v25 = vpop.f32.mrf.mxu3 }
 0xab8   : > { %v3396_v36 = vadd.f32 %v3395_v25, %v3381_v49 }
 0xaba   : > { %4478 = vrcp.f32 %v3396_v36  ;;  %v3423_v34 = vand.u32 2147483648, %v3396_v36  ;;  %v3421_v21 = vand.u32 2147483647, %v3396_v36  ;;  %vm3417_vm4 = vweird.f32 %v3396_v36 }
 0xabc   : > { %v3424_v6 = vor.u32 1.1754944e-38, %v3423_v34  ;;  %vm3422_vm1 = vcmp.eq.f32.partialorder %v3421_v21, 8.507059e+37 }
 0xac0   : > { %v4479_v63 = vpop.eup %4478 }
 0xac1   : > { %v3413_v7 = vmul.f32 %v4479_v63, %v3396_v36  ;;  %vm3418_vm3 = vweird.f32 %v4479_v63 }
 0xac2   : > { %vm3419_vm5 = vmor %vm3417_vm4, %vm3418_vm3 }
 0xac3   : > { %v3414_v8 = vsub.f32 1.0, %v3413_v7 }
 0xac5   : > { %v3415_v3 = vmul.f32 %v4479_v63, %v3414_v8 }
 0xac7   : > { %v3416_v12 = vadd.f32 %v4479_v63, %v3415_v3 }
 0xac9   : > { %v3420_v19 = vsel %vm3419_vm5, %v4479_v63, %v3416_v12 }
 0xaca   : > { %v3425_v13 = vsel %vm3422_vm1, %v3424_v6, %v3420_v19 }
 0xacb   : > { %v3427_v37 = vperm.slane %v3425_v13, 0 }
 0xacd   : > { %v3429_v16 = vmul.f32 %v3427_v37, %v3394_v47 }
 0xacf   : > { %v3433_v44 = vpack.c.bf16 %v3429_v16, %v7598_v4 }
 0xad1   : > { %3443 = vxpose.binary.xlu0.c.b16.end [2/4] (short) %v3433_v44, %v3432_v11, 128 }
 0xb6d   : > { %v3450_v60 = vpop.trf.xlu0 }
 0xb6e   : > { %3897 = vmatmul.msk.bf16.vlgmr.msra.gmra.mxu2 %vm432_vm0, %v3450_v60 }
 0xb75   : > { %v3451_v1 = vpop.trf.xlu0 }
 0xb7d   : > { %v3452_v55 = vpop.trf.xlu0 }
 0xb7e   : > { %3898 = vmatmul.msk.bf16.gmra.mxu2 %vm432_vm0, %v3452_v55 }
 0xb85   : > { %v3453_v2 = vpop.trf.xlu0 }
 0xb8d   : > { %v3454_v9 = vpop.trf.xlu0 }
 0xb8e   : > { %3899 = vmatmul.msk.bf16.gmra.mxu2 %vm432_vm0, %v3454_v9 }
 0xb95   : > { %v3455_v10 = vpop.trf.xlu0 }
 0xb9d   : > { %v3456_v33 = vpop.trf.xlu0 }
 0xb9e   : > { %3900 = vmatmul.msk.bf16.gmra.mxu2 %vm432_vm0, %v3456_v33 }
 0xba5   : > { %v3457_v57 = vpop.trf.xlu0 }
 0xbad   : > { %v3458_v42 = vpop.trf.xlu0 }
 0xbae   : > { %3901 = vmatmul.msk.bf16.gmra.mxu2 %vm432_vm0, %v3458_v42 }
 0xbb5   : > { %v3459_v31 = vpop.trf.xlu0 }
 0xbbd   : > { %v3460_v53 = vpop.trf.xlu0 }
 0xbbe   : > { %3902 = vmatmul.msk.bf16.gmra.mxu2 %vm432_vm0, %v3460_v53 }
 0xbc5   : > { %v3461_v5 = vpop.trf.xlu0 }
 0xbcd   : > { %v3462_v62 = vpop.trf.xlu0 }
 0xbce   : > { %3903 = vmatmul.msk.bf16.gmra.mxu2 %vm432_vm0, %v3462_v62 }
 0xbd5   : > { %v3463_v58 = vpop.trf.xlu0 }
 0xbdd   : > { %v3464_v29 = vpop.trf.xlu0 }
 0xbde   : > { %3904 = vmatmul.msk.bf16.gmra.mxu2 %vm432_vm0, %v3464_v29 }
 0xbe5   : > { %v3465_v30 = vpop.trf.xlu0 }
 0xbee   : > { %3905 = vmatmul.msk.bf16.gmra.mxu2 %vm432_vm0, %v3451_v1 }
 0xbf1   : > { %v3535_v61 = vpop.f32.mrf.mxu2 }
 0xbf2   : > { %v3536_v52 = vadd.f32 %v7195_v28, %v3535_v61 }
 0xbf4   : > { %3615 = vst.msk [vmem:[%s7202_s12] sm:$0xff] %vm432_vm0, %v3536_v52 }
 0xbf9   : > { %v3537_v24 = vpop.f32.mrf.mxu2 }
 0xbfa   : > { %v3538_v54 = vadd.f32 %v7195_v28, %v3537_v24 }
 0xbfc   : > { %3616 = vst.msk [vmem:[%s7202_s12 + $0x8] sm:$0xff] %vm432_vm0, %v3538_v54 }
 0xbfe   : > { %3906 = vmatmul.msk.bf16.gmra.mxu2 %vm432_vm0, %v3453_v2 }
 0xc01   : > { %v3540_v32 = vpop.f32.mrf.mxu2 }
 0xc02   : > { %v3541_v20 = vadd.f32 %v7195_v28, %v3540_v32 }
 0xc04   : > { %3617 = vst.msk [vmem:[%s7202_s12 + $0x10] sm:$0xff] %vm432_vm0, %v3541_v20 }
 0xc09   : > { %v3542_v22 = vpop.f32.mrf.mxu2 }
 0xc0a   : > { %v3543_v35 = vadd.f32 %v7195_v28, %v3542_v22 }
 0xc0c   : > { %3618 = vst.msk [vmem:[%s7202_s12 + $0x18] sm:$0xff] %vm432_vm0, %v3543_v35 }
 0xc0e   : > { %3907 = vmatmul.msk.bf16.gmra.mxu2 %vm432_vm0, %v3455_v10 }
 0xc11   : > { %v3545_v39 = vpop.f32.mrf.mxu2 }
 0xc12   : > { %v3546_v50 = vadd.f32 %v7195_v28, %v3545_v39 }
 0xc14   : > { %3619 = vst.msk [vmem:[%s7202_s12 + $0x20] sm:$0xff] %vm432_vm0, %v3546_v50 }
 0xc19   : > { %v3547_v18 = vpop.f32.mrf.mxu2 }
 0xc1a   : > { %v3548_v40 = vadd.f32 %v7195_v28, %v3547_v18 }
 0xc1c   : > { %3620 = vst.msk [vmem:[%s7202_s12 + $0x28] sm:$0xff] %vm432_vm0, %v3548_v40 }
 0xc1e   : > { %3908 = vmatmul.msk.bf16.gmra.mxu2 %vm432_vm0, %v3457_v57 }
 0xc21   : > { %v3550_v48 = vpop.f32.mrf.mxu2 }
 0xc22   : > { %v3551_v51 = vadd.f32 %v7195_v28, %v3550_v48 }
 0xc24   : > { %3621 = vst.msk [vmem:[%s7202_s12 + $0x30] sm:$0xff] %vm432_vm0, %v3551_v51 }
 0xc29   : > { %v3552_v56 = vpop.f32.mrf.mxu2 }
 0xc2a   : > { %v3553_v38 = vadd.f32 %v7195_v28, %v3552_v56 }
 0xc2c   : > { %3622 = vst.msk [vmem:[%s7202_s12 + $0x38] sm:$0xff] %vm432_vm0, %v3553_v38 }
 0xc2e   : > { %3909 = vmatmul.msk.bf16.gmra.mxu2 %vm432_vm0, %v3459_v31 }
 0xc31   : > { %v3555_v14 = vpop.f32.mrf.mxu2 }
 0xc32   : > { %v3556_v15 = vadd.f32 %v7195_v28, %v3555_v14 }
 0xc34   : > { %3623 = vst.msk [vmem:[%s7202_s12 + $0x40] sm:$0xff] %vm432_vm0, %v3556_v15 }
 0xc39   : > { %v3557_v49 = vpop.f32.mrf.mxu2 }
 0xc3a   : > { %v3558_v25 = vadd.f32 %v7195_v28, %v3557_v49 }
 0xc3c   : > { %3624 = vst.msk [vmem:[%s7202_s12 + $0x48] sm:$0xff] %vm432_vm0, %v3558_v25 }
 0xc3e   : > { %3910 = vmatmul.msk.bf16.gmra.mxu2 %vm432_vm0, %v3461_v5 }
 0xc41   : > { %v3560_v36 = vpop.f32.mrf.mxu2 }
 0xc42   : > { %v3561_v27 = vadd.f32 %v7195_v28, %v3560_v36 }
 0xc44   : > { %3625 = vst.msk [vmem:[%s7202_s12 + $0x50] sm:$0xff] %vm432_vm0, %v3561_v27 }
 0xc49   : > { %v3562_v46 = vpop.f32.mrf.mxu2 }
 0xc4a   : > { %v3563_v0 = vadd.f32 %v7195_v28, %v3562_v46 }
 0xc4c   : > { %3626 = vst.msk [vmem:[%s7202_s12 + $0x58] sm:$0xff] %vm432_vm0, %v3563_v0 }
 0xc4e   : > { %3911 = vmatmul.msk.bf16.gmra.mxu2 %vm432_vm0, %v3463_v58 }
 0xc51   : > { %v3565_v41 = vpop.f32.mrf.mxu2 }
 0xc52   : > { %v3566_v63 = vadd.f32 %v7195_v28, %v3565_v41 }
 0xc54   : > { %3627 = vst.msk [vmem:[%s7202_s12 + $0x60] sm:$0xff] %vm432_vm0, %v3566_v63 }
 0xc59   : > { %v3567_v17 = vpop.f32.mrf.mxu2 }
 0xc5a   : > { %v3568_v7 = vadd.f32 %v7195_v28, %v3567_v17 }
 0xc5c   : > { %3628 = vst.msk [vmem:[%s7202_s12 + $0x68] sm:$0xff] %vm432_vm0, %v3568_v7 }
 0xc5e   : > { %3912 = vmatmul.msk.bf16.gmra.mxu2 %vm432_vm0, %v3465_v30 }
 0xc61   : > { %v3570_v8 = vpop.f32.mrf.mxu2 }
 0xc62   : > { %v3571_v45 = vadd.f32 %v7195_v28, %v3570_v8 }
 0xc64   : > { %3629 = vst.msk [vmem:[%s7202_s12 + $0x70] sm:$0xff] %vm432_vm0, %v3571_v45 }
 0xc69   : > { %v3572_v34 = vpop.f32.mrf.mxu2 }
 0xc6a   : > { %v3573_v3 = vadd.f32 %v7195_v28, %v3572_v34 }
 0xc6c   : > { %3630 = vst.msk [vmem:[%s7202_s12 + $0x78] sm:$0xff] %vm432_vm0, %v3573_v3 }
 0xc71   : > { %v3575_v21 = vpop.f32.mrf.mxu2 }
 0xc72   : > { %v3576_v59 = vadd.f32 %v7195_v28, %v3575_v21 }
 0xc74   : > { %3631 = vst.msk [vmem:[%s7202_s12 + $0x80] sm:$0xff] %vm432_vm0, %v3576_v59 }
 0xc79   : > { %v3577_v12 = vpop.f32.mrf.mxu2 }
 0xc7a   : > { %v3578_v6 = vadd.f32 %v7195_v28, %v3577_v12 }
 0xc7c   : > { %3632 = vst.msk [vmem:[%s7202_s12 + $0x88] sm:$0xff] %vm432_vm0, %v3578_v6 }
 0xc81   : > { %v3580_v23 = vpop.f32.mrf.mxu2 }
 0xc82   : > { %v3581_v19 = vadd.f32 %v7195_v28, %v3580_v23 }
 0xc84   : > { %3633 = vst.msk [vmem:[%s7202_s12 + $0x90] sm:$0xff] %vm432_vm0, %v3581_v19 }
 0xc89   : > { %v3582_v13 = vpop.f32.mrf.mxu2 }
 0xc8a   : > { %v3583_v26 = vadd.f32 %v7195_v28, %v3582_v13 }
 0xc8c   : > { %3634 = vst.msk [vmem:[%s7202_s12 + $0x98] sm:$0xff] %vm432_vm0, %v3583_v26 }
 0xc91   : > { %v3585_v47 = vpop.f32.mrf.mxu2 }
 0xc92   : > { %v3586_v37 = vadd.f32 %v7195_v28, %v3585_v47 }
 0xc94   : > { %3635 = vst.msk [vmem:[%s7202_s12 + $0xa0] sm:$0xff] %vm432_vm0, %v3586_v37 }
 0xc99   : > { %v3587_v16 = vpop.f32.mrf.mxu2 }
 0xc9a   : > { %v3588_v43 = vadd.f32 %v7195_v28, %v3587_v16 }
 0xc9c   : > { %3636 = vst.msk [vmem:[%s7202_s12 + $0xa8] sm:$0xff] %vm432_vm0, %v3588_v43 }
 0xca1   : > { %v3590_v11 = vpop.f32.mrf.mxu2 }
 0xca2   : > { %v3591_v4 = vadd.f32 %v7195_v28, %v3590_v11 }
 0xca4   : > { %3637 = vst.msk [vmem:[%s7202_s12 + $0xb0] sm:$0xff] %vm432_vm0, %v3591_v4 }
 0xca9   : > { %v3592_v44 = vpop.f32.mrf.mxu2 }
 0xcaa   : > { %v3593_v60 = vadd.f32 %v7195_v28, %v3592_v44 }
 0xcac   : > { %3638 = vst.msk [vmem:[%s7202_s12 + $0xb8] sm:$0xff] %vm432_vm0, %v3593_v60 }
 0xcb1   : > { %v3595_v1 = vpop.f32.mrf.mxu2 }
 0xcb2   : > { %v3596_v55 = vadd.f32 %v7195_v28, %v3595_v1 }
 0xcb4   : > { %3639 = vst.msk [vmem:[%s7202_s12 + $0xc0] sm:$0xff] %vm432_vm0, %v3596_v55 }
 0xcb9   : > { %v3597_v2 = vpop.f32.mrf.mxu2 }
 0xcba   : > { %v3598_v9 = vadd.f32 %v7195_v28, %v3597_v2 }
 0xcbc   : > { %3640 = vst.msk [vmem:[%s7202_s12 + $0xc8] sm:$0xff] %vm432_vm0, %v3598_v9 }
 0xcc1   : > { %v3600_v10 = vpop.f32.mrf.mxu2 }
 0xcc2   : > { %v3601_v33 = vadd.f32 %v7195_v28, %v3600_v10 }
 0xcc4   : > { %3641 = vst.msk [vmem:[%s7202_s12 + $0xd0] sm:$0xff] %vm432_vm0, %v3601_v33 }
 0xcc9   : > { %v3602_v57 = vpop.f32.mrf.mxu2 }
 0xcca   : > { %v3603_v42 = vadd.f32 %v7195_v28, %v3602_v57 }
 0xccc   : > { %3642 = vst.msk [vmem:[%s7202_s12 + $0xd8] sm:$0xff] %vm432_vm0, %v3603_v42 }
 0xcd1   : > { %v3605_v31 = vpop.f32.mrf.mxu2 }
 0xcd2   : > { %v3606_v53 = vadd.f32 %v7195_v28, %v3605_v31 }
 0xcd4   : > { %3643 = vst.msk [vmem:[%s7202_s12 + $0xe0] sm:$0xff] %vm432_vm0, %v3606_v53 }
 0xcd9   : > { %v3607_v5 = vpop.f32.mrf.mxu2 }
 0xcda   : > { %v3608_v62 = vadd.f32 %v7195_v28, %v3607_v5 }
 0xcdc   : > { %3644 = vst.msk [vmem:[%s7202_s12 + $0xe8] sm:$0xff] %vm432_vm0, %v3608_v62 }
 0xce1   : > { %v3610_v58 = vpop.f32.mrf.mxu2 }
 0xce2   : > { %v3611_v29 = vadd.f32 %v7195_v28, %v3610_v58 }
 0xce4   : > { %3645 = vst.msk [vmem:[%s7202_s12 + $0xf0] sm:$0xff] %vm432_vm0, %v3611_v29 }
 0xce9   : > { %v3612_v61 = vpop.f32.mrf.mxu2 }
 0xcea   : > { %v3613_v52 = vadd.f32 %v7195_v28, %v3612_v61 }
 0xcec   : > { %3646 = vst.msk [vmem:[%s7202_s12 + $0xf8] sm:$0xff] %vm432_vm0, %v3613_v52 }
 0xced PF: > { %s17_s21 = sadd.s32 1, %s4520_s21  }
 0xcee   : > { %p14_p7 = scmp.ge.s32.totalorder %s17_s21, 4  }
 0xcf0   :  { %16 = sbr.rel (!%p14_p7) target bundleno = 1 (0x1), region = 82 }
 0xcf5   :  { %3668 = vsyncpa [#allocation3], 1 }
 0xcf6   :  { %3670 = vsyncpa [#allocation3 + $0x1], 1 }

</bundles_post_ra>
